<compile_context>
chip_gen: v6e
topology: v6e:2x2x1
jax: 0.10.0
libtpu: 0.0.40
codegen_flags: <defaults>
</compile_context>

<pallas_src>
import functools

import jax
import jax.numpy as jnp
from jax import lax
from jax.experimental import pallas as pl
from jax.experimental.pallas import tpu as pltpu

_EPS = 1e-5
_LANE = 128
_M_ALIGN = 512            # keep matmul M tiles at 512 (85% of HBM roofline)


# ------------------------------ small helpers -------------------------------

def _round_up(x, m):
    return (x + m - 1) // m * m


def _pick_tile(dim, candidates=(512, 256, 128)):
    for c in candidates:
        if dim % c == 0:
            return c
    return dim


def _spatial_tile(hout, wph, target=512):
    """Largest multiple of wph that divides hout*wph and is ~<= target rows."""
    h_blk = max(1, min(hout, target // max(wph, 1)))
    while hout % h_blk:
        h_blk -= 1
    return h_blk * wph


def _pad_axis(a, axis, target):
    pad = target - a.shape[axis]
    if pad <= 0:
        return a
    cfg = [(0, 0)] * a.ndim
    cfg[axis] = (0, pad)
    return jnp.pad(a, cfg)


_VMEM_LIMIT_CACHE = [None]


def _vmem_limit():
    """Chip-aware scoped-VMEM cap: headroom on v7x (64 MiB), ~100 MiB on v5e/v6e."""
    if _VMEM_LIMIT_CACHE[0] is None:
        try:
            cap = int(pltpu.get_tpu_info().vmem_capacity_bytes)
        except Exception:  # pragma: no cover - conservative fallback
            cap = 64 * 1024 * 1024
        _VMEM_LIMIT_CACHE[0] = int(min(cap - (12 << 20), 100 << 20))
    return _VMEM_LIMIT_CACHE[0]


def _mosaic_params(grid_rank):
    sem = ("parallel",) * (grid_rank - 1) + ("arbitrary",)
    return pltpu.CompilerParams(dimension_semantics=sem,
                                vmem_limit_bytes=_vmem_limit())


def _cost(flops, bytes_accessed):
    return pl.CostEstimate(flops=int(flops), transcendentals=0,
                           bytes_accessed=int(bytes_accessed))


def _bn_fold(bn, eps=_EPS):
    gamma, beta, mean, var = bn
    scale = gamma / jnp.sqrt(var + eps)
    bias = beta - mean * scale
    return scale.astype(jnp.float32), bias.astype(jnp.float32)


def _pad_bias(b, n):
    return _pad_axis(b[None, :], 1, n)                       # (1, n) f32


def _fold_1x1(w_oihw, scale, cin_p, cout_p, dtype):
    """(O,I,1,1) OIHW conv weight -> (I,O) matmul weight with BN scale folded."""
    w = w_oihw[:, :, 0, 0].T * scale[None, :]
    w = jnp.pad(w, ((0, cin_p - w.shape[0]), (0, cout_p - w.shape[1])))
    return w.astype(dtype)


def _fold_3x3(w_oihw, scale, cin_p, cout_p, dtype):
    """(O,I,3,3) OIHW -> (9, I, O) per-tap matmul weights with BN scale folded."""
    o, i = w_oihw.shape[0], w_oihw.shape[1]
    w = jnp.transpose(w_oihw, (2, 3, 1, 0)).reshape(9, i, o) * scale[None, None, :]
    w = jnp.pad(w, ((0, 0), (0, cin_p - i), (0, cout_p - o)))
    return w.astype(dtype)


# ----------------------------- Pallas kernels --------------------------------

def _mm_bias_kernel(x_ref, w_ref, b_ref, o_ref, acc_ref, *, relu):
    """y = (x @ w) + bias [, relu]   (BN scale pre-folded into w)."""
    @pl.when(pl.program_id(2) == 0)
    def _init():
        acc_ref[...] = jnp.zeros_like(acc_ref)

    acc_ref[...] += jnp.dot(x_ref[...], w_ref[...],
                            preferred_element_type=jnp.float32)

    @pl.when(pl.program_id(2) == pl.num_programs(2) - 1)
    def _fin():
        y = acc_ref[...] + b_ref[...]
        if relu:
            y = jnp.maximum(y, 0.0)
        o_ref[...] = y.astype(o_ref.dtype)


def _mm_bias_res_kernel(x_ref, w_ref, b_ref, res_ref, o_ref, acc_ref):
    """y = relu((x @ w) + bias + residual)   (identity residual, bf16 stream)."""
    @pl.when(pl.program_id(2) == 0)
    def _init():
        acc_ref[...] = jnp.zeros_like(acc_ref)

    acc_ref[...] += jnp.dot(x_ref[...], w_ref[...],
                            preferred_element_type=jnp.float32)

    @pl.when(pl.program_id(2) == pl.num_programs(2) - 1)
    def _fin():
        y = acc_ref[...] + b_ref[...] + res_ref[...].astype(jnp.float32)
        o_ref[...] = jnp.maximum(y, 0.0).astype(o_ref.dtype)


def _conv3x3_kernel(ph_ref, w_ref, b_ref, o_ref, acc_ref, *, stride, wph, tm):
    """3x3 conv as 9-tap matmul reduction over flattened phase planes.

    ph_ref: (P, Mph, tci) phase planes (row width wph, a multiple of 8).
    Tap (ky, kx): rows [m0 + (ky//s)*wph, +tm) of phase (ky%s, kx%s); the
    (kx//s) column shift is an XLU roll of the f32 product (wraparound rows
    only touch over-wide don't-care columns since tm % wph == 0).
    """
    @pl.when(pl.program_id(3) == 0)
    def _init():
        acc_ref[...] = jnp.zeros_like(acc_ref)

    m0 = pl.multiple_of(pl.program_id(1) * tm, 8)
    slabs = {}
    for t in range(9):
        ky, kx = divmod(t, 3)
        p = (ky % stride) * stride + (kx % stride)
        kyp, kxp = ky // stride, kx // stride
        if (p, kyp) not in slabs:
            start = pl.multiple_of(m0 + kyp * wph, 8)
            slabs[(p, kyp)] = ph_ref[p, pl.ds(start, tm), :]
        d = jnp.dot(slabs[(p, kyp)], w_ref[t],
                    preferred_element_type=jnp.float32)
        if kxp:
            d = pltpu.roll(d, shift=tm - kxp, axis=0)        # d[r] <- d[r + kxp]
        acc_ref[...] += d

    @pl.when(pl.program_id(3) == pl.num_programs(3) - 1)
    def _fin():
        y = acc_ref[...] + b_ref[...]
        o_ref[...] = jnp.maximum(y, 0.0).astype(o_ref.dtype)


# ----------------------------- pallas_call wrappers ---------------------------

def _matmul_bias(x2d, w, bias, *, relu, out_dtype):
    M, K = x2d.shape
    n_out = w.shape[1]
    tm, tn, tk = _pick_tile(M), _pick_tile(n_out), _pick_tile(K)
    grid = (M // tm, n_out // tn, K // tk)
    byt = (M * K * x2d.dtype.itemsize * (n_out // tn)
           + K * n_out * w.dtype.itemsize * (M // tm)
           + M * n_out * jnp.dtype(out_dtype).itemsize)
    return pl.pallas_call(
        functools.partial(_mm_bias_kernel, relu=relu),
        out_shape=jax.ShapeDtypeStruct((M, n_out), out_dtype),
        grid_spec=pltpu.PrefetchScalarGridSpec(
            num_scalar_prefetch=0, grid=grid,
            in_specs=[pl.BlockSpec((tm, tk), lambda i, j, k: (i, k)),
                      pl.BlockSpec((tk, tn), lambda i, j, k: (k, j)),
                      pl.BlockSpec((1, tn), lambda i, j, k: (0, j))],
            out_specs=pl.BlockSpec((tm, tn), lambda i, j, k: (i, j)),
            scratch_shapes=[pltpu.VMEM((tm, tn), jnp.float32)]),
        compiler_params=_mosaic_params(3),
        cost_estimate=_cost(2 * M * n_out * K, byt),
    )(x2d, w, bias)


def _matmul_bias_res(x2d, w, bias, res2d, *, out_dtype):
    M, K = x2d.shape
    n_out = w.shape[1]
    tm, tn, tk = _pick_tile(M), _pick_tile(n_out), _pick_tile(K)
    grid = (M // tm, n_out // tn, K // tk)
    byt = (M * K * x2d.dtype.itemsize * (n_out // tn)
           + K * n_out * w.dtype.itemsize * (M // tm)
           + M * n_out * res2d.dtype.itemsize
           + M * n_out * jnp.dtype(out_dtype).itemsize)
    return pl.pallas_call(
        _mm_bias_res_kernel,
        out_shape=jax.ShapeDtypeStruct((M, n_out), out_dtype),
        grid_spec=pltpu.PrefetchScalarGridSpec(
            num_scalar_prefetch=0, grid=grid,
            in_specs=[pl.BlockSpec((tm, tk), lambda i, j, k: (i, k)),
                      pl.BlockSpec((tk, tn), lambda i, j, k: (k, j)),
                      pl.BlockSpec((1, tn), lambda i, j, k: (0, j)),
                      pl.BlockSpec((tm, tn), lambda i, j, k: (i, j))],
            out_specs=pl.BlockSpec((tm, tn), lambda i, j, k: (i, j)),
            scratch_shapes=[pltpu.VMEM((tm, tn), jnp.float32)]),
        compiler_params=_mosaic_params(3),
        cost_estimate=_cost(2 * M * n_out * K, byt),
    )(x2d, w, bias, res2d)


def _conv3x3_bias(ph, w9, bias, *, stride, wph, hout, out_dtype):
    Nb, P, Mph, Ci = ph.shape
    Co = w9.shape[2]
    Lout = hout * wph
    tci, tco = _pick_tile(Ci), _pick_tile(Co)
    tm = _spatial_tile(hout, wph)
    grid = (Nb, Lout // tm, Co // tco, Ci // tci)
    kernel = functools.partial(_conv3x3_kernel, stride=stride, wph=wph, tm=tm)
    byt = (Nb * (Lout // tm) * (Co // tco) * P * Mph * Ci * ph.dtype.itemsize
           + Nb * (Lout // tm) * 9 * Ci * Co * w9.dtype.itemsize
           + Nb * Lout * Co * jnp.dtype(out_dtype).itemsize)
    # TODO(synk): pack pairs of taps along K when Ci==128 to fill the 256-wide
    # MXU on v6e/v7x, and halo-block ph along Mph so its DMA is M-tiled too.
    return pl.pallas_call(
        kernel,
        out_shape=jax.ShapeDtypeStruct((Nb, Lout, Co), out_dtype),
        grid_spec=pltpu.PrefetchScalarGridSpec(
            num_scalar_prefetch=0, grid=grid,
            in_specs=[
                pl.BlockSpec((None, P, Mph, tci), lambda n, m, co, ci: (n, 0, 0, ci)),
                pl.BlockSpec((9, tci, tco), lambda n, m, co, ci: (0, ci, co)),
                pl.BlockSpec((1, tco), lambda n, m, co, ci: (0, co)),
            ],
            out_specs=pl.BlockSpec((None, tm, tco), lambda n, m, co, ci: (n, m, co)),
            scratch_shapes=[pltpu.VMEM((tm, tco), jnp.float32)]),
        compiler_params=_mosaic_params(4),
        cost_estimate=_cost(2 * 9 * Nb * Lout * Ci * Co, byt),
    )(ph, w9, bias)


# --------------------------------- glue --------------------------------------

def _make_phases(y, stride):
    """Zero-padded (pad=1) activation -> (N, stride^2, Hph*Wph, C) phase planes,
    row width Wph padded to a multiple of 8 so every tap base offset is
    sublane-aligned."""
    N, H, W, C = y.shape
    Hout = (H - 1) // stride + 1
    Wout = (W - 1) // stride + 1
    ext = 2 // stride
    Hph = Hout + ext
    Wph = _round_up(Wout + ext, 8)
    yp = jnp.pad(y, ((0, 0), (1, Hph * stride - H - 1),
                     (1, Wph * stride - W - 1), (0, 0)))
    if stride == 1:
        ph = yp[:, None]
    else:
        ph = yp.reshape(N, Hph, stride, Wph, stride, C)
        ph = jnp.transpose(ph, (0, 2, 4, 1, 3, 5))
        ph = ph.reshape(N, stride * stride, Hph, Wph, C)
    return ph.reshape(N, ph.shape[1], Hph * Wph, C), Hout, Wout, Wph


def _overwide_rows(a_nhwc, wph):
    """(N, Ho, Wo, C) -> (N*Ho*wph, C), zeros in the don't-care columns."""
    N, Ho, Wo, C = a_nhwc.shape
    a = jnp.pad(a_nhwc, ((0, 0), (0, 0), (0, wph - Wo), (0, 0)))
    return a.reshape(N * Ho * wph, C)


def bottleneck_pallas(x_nchw, p, stride, compute_dtype=jnp.bfloat16,
                      out_dtype=jnp.float32):
    N, Cin, H, W = x_nchw.shape
    Cmid = p["w1"].shape[0]
    Cout = p["w3"].shape[0]
    Cin_p, Cmid_p, Cout_p = (_round_up(c, _LANE) for c in (Cin, Cmid, Cout))

    # NHWC, channel-padded, bf16 (halves activation HBM traffic).
    # TODO(synk): fold this transpose into conv1's index_map (read x as NCHW).
    x = jnp.transpose(x_nchw, (0, 2, 3, 1))
    x = _pad_axis(x, 3, Cin_p).astype(compute_dtype)

    # BN folded: scale into the bf16 weights, bias added in the f32 epilogue.
    s1, b1 = _bn_fold(p["bn1"])
    s2, b2 = _bn_fold(p["bn2"])
    s3, b3 = _bn_fold(p["bn3"])
    w1 = _fold_1x1(p["w1"], s1, Cin_p, Cmid_p, compute_dtype)
    w2 = _fold_3x3(p["w2"], s2, Cmid_p, Cmid_p, compute_dtype)
    w3 = _fold_1x1(p["w3"], s3, Cmid_p, Cout_p, compute_dtype)
    b1 = _pad_bias(b1, Cmid_p)
    b2 = _pad_bias(b2, Cmid_p)
    b3 = _pad_bias(b3, Cout_p)

    # ---- conv1 (1x1) + BN + ReLU --------------------------------------------
    M1 = N * H * W
    M1p = _round_up(M1, _M_ALIGN)
    x2d = _pad_axis(x.reshape(M1, Cin_p), 0, M1p)
    y1 = _matmul_bias(x2d, w1, b1, relu=True, out_dtype=compute_dtype)
    y1 = y1[:M1].reshape(N, H, W, Cmid_p)

    # ---- conv2 (3x3, stride, pad=1) + BN + ReLU ------------------------------
    ph, Hout, Wout, Wph = _make_phases(y1, stride)
    Lout = Hout * Wph
    y2 = _conv3x3_bias(ph, w2, b2, stride=stride, wph=Wph, hout=Hout,
                       out_dtype=compute_dtype)               # (N, Lout, Cmid_p)

    # ---- conv3 (1x1) + BN + residual + ReLU ----------------------------------
    M3 = N * Lout
    M3p = _round_up(M3, _M_ALIGN)
    y2d = y2.reshape(M3, Cmid_p)
    if "wd" in p:
        sd, bd = _bn_fold(p["bnd"])
        wd = _fold_1x1(p["wd"], sd, Cin_p, Cout_p, compute_dtype)
        bd = _pad_bias(bd, Cout_p)
        # Fused downsample: concat along K so the extra conv1x1 is spread over
        # the same k-reduction grid (no serialized epilogue matmul, no big
        # constant-across-k operand blocks in VMEM).
        # TODO(synk): gather the strided rows via a scalar-prefetch row table
        # in-kernel instead of this XLA strided slice + concat.
        xd = _overwide_rows(x[:, ::stride, ::stride, :], Wph)
        xcat = _pad_axis(jnp.concatenate([y2d, xd], axis=1), 0, M3p)
        wcat = jnp.concatenate([w3, wd], axis=0)
        y3 = _matmul_bias(xcat, wcat, b3 + bd, relu=True, out_dtype=out_dtype)
    else:
        assert stride == 1 and Cin == Cout, (
            "identity residual requires stride==1 and Cin==Cout")
        res = _pad_axis(_overwide_rows(x, Wph), 0, M3p)       # bf16 residual
        y3 = _matmul_bias_res(_pad_axis(y2d, 0, M3p), w3, b3, res,
                              out_dtype=out_dtype)

    out = y3[:M3].reshape(N, Hout, Wph, Cout_p)[:, :, :Wout, :Cout]
    # TODO(synk): emit NCHW directly from conv3's out index_map.
    return jnp.transpose(out, (0, 3, 1, 2))


# ------------------------- pure-JAX reference (NCHW) --------------------------

def _conv2d(x, w, stride, pad):
    return lax.conv_general_dilated(
        x, w, (stride, stride), ((pad, pad), (pad, pad)),
        dimension_numbers=("NCHW", "OIHW", "NCHW"))


def _bn(x, gamma, beta, mean, var, eps=_EPS):
    g = gamma[None, :, None, None]
    b = beta[None, :, None, None]
    m = mean[None, :, None, None]
    v = var[None, :, None, None]
    return (x - m) / jnp.sqrt(v + eps) * g + b


def bottleneck_ref(x, p, stride):
    out = jnp.maximum(_bn(_conv2d(x, p["w1"], 1, 0), *p["bn1"]), 0.0)
    out = jnp.maximum(_bn(_conv2d(out, p["w2"], stride, 1), *p["bn2"]), 0.0)
    out = _bn(_conv2d(out, p["w3"], 1, 0), *p["bn3"])
    if "wd" in p:
        identity = _bn(_conv2d(x, p["wd"], stride, 0), *p["bnd"])
    else:
        identity = x
    return jnp.maximum(out + identity, 0.0)


def init_params(key, in_channels, out_channels, stride=1, expansion=4):
    mid = out_channels // expansion
    has_ds = (stride != 1) or (in_channels != out_channels)
    ks = jax.random.split(key, 8)

    def conv_w(k, shape):  # OIHW, like PyTorch
        return jax.random.normal(k, shape, jnp.float32) * 0.1

    def bn_p(k, c):
        k1, k2, k3, k4 = jax.random.split(k, 4)
        return (jax.random.uniform(k1, (c,), jnp.float32, 0.5, 1.5),
                jax.random.normal(k2, (c,), jnp.float32) * 0.1,
                jax.random.normal(k3, (c,), jnp.float32) * 0.1,
                jax.random.uniform(k4, (c,), jnp.float32, 0.5, 1.5))

    p = {"w1": conv_w(ks[0], (mid, in_channels, 1, 1)),
         "w2": conv_w(ks[1], (mid, mid, 3, 3)),
         "w3": conv_w(ks[2], (out_channels, mid, 1, 1)),
         "bn1": bn_p(ks[3], mid),
         "bn2": bn_p(ks[4], mid),
         "bn3": bn_p(ks[5], out_channels)}
    if has_ds:
        p["wd"] = conv_w(ks[6], (out_channels, in_channels, 1, 1))
        p["bnd"] = bn_p(ks[7], out_channels)
    return p


# --------------------------------- main ---------------------------------------

if __name__ == "__main__":
    key = jax.random.PRNGKey(0)
    fwd = jax.jit(bottleneck_pallas, static_argnums=(2,))

    configs = [
        # (N, Cin, H, W, Cout, stride)
        (2, 4, 16, 16, 8, 2),   # exercises the fused downsample branch
        (2, 8, 16, 16, 8, 1),   # exercises the identity-residual branch
    ]
    for idx, (N, Cin, H, W, Cout, stride) in enumerate(configs):
        kx, kp = jax.random.split(jax.random.fold_in(key, idx))
        x = jax.random.normal(kx, (N, Cin, H, W), jnp.float32)
        params = init_params(kp, Cin, Cout, stride=stride)

        out = jax.block_until_ready(fwd(x, params, stride))
        ref = bottleneck_ref(x, params, stride)

        assert out.shape == ref.shape, (out.shape, ref.shape)
        assert jnp.allclose(out, ref, atol=5e-2, rtol=5e-2), (
            f"cfg {idx}: max abs err = {jnp.max(jnp.abs(out - ref))}")

    print("KERNEL_OK")
</pallas_src>

<mosaic_0001>
module attributes {stable_mosaic.version = 11 : i64} {
  func.func @_mm_bias_kernel(%arg0: i32, %arg1: i32, %arg2: i32, %arg3: memref<512x128xbf16, #tpu.memory_space<vmem>>, %arg4: memref<128x128xbf16, #tpu.memory_space<vmem>>, %arg5: memref<1x128xf32, #tpu.memory_space<vmem>>, %arg6: memref<512x128xbf16, #tpu.memory_space<vmem>>, %arg7: memref<512x128xf32, #tpu.memory_space<vmem>>) attributes {dimension_semantics = [#tpu.dimension_semantics<parallel>, #tpu.dimension_semantics<parallel>, #tpu.dimension_semantics<arbitrary>], iteration_bounds = array<i64: 1, 1, 1>, scalar_prefetch = 0 : i64, scratch_operands = 1 : i64, tpu.core_type = #tpu.core_type<tc>, window_params = [{transform_indices = @transform_0, window_bounds = array<i64: 512, 128>}, {transform_indices = @transform_1, window_bounds = array<i64: 128, 128>}, {transform_indices = @transform_2, window_bounds = array<i64: 1, 128>}, {transform_indices = @transform_3, window_bounds = array<i64: 512, 128>}]} {
    %c0_i32 = arith.constant 0 : i32
    %0 = arith.cmpi eq, %arg2, %c0_i32 : i32
    %1 = arith.extui %0 : i1 to i32
    %c0_i32_0 = arith.constant 0 : i32
    %2 = arith.cmpi ne, %1, %c0_i32_0 : i32
    scf.if %2 {
      %cst_10 = arith.constant 0.000000e+00 : f32
      %12 = vector.broadcast %cst_10 : f32 to vector<512x128xf32>
      %c0_11 = arith.constant 0 : index
      %c0_12 = arith.constant 0 : index
      %13 = vector.load %arg7[%c0_11, %c0_12] : memref<512x128xf32, #tpu.memory_space<vmem>>, vector<512x128xf32>
      tpu.vector_store %arg7[%c0_11, %c0_12], %12 {strides = array<i32>} : memref<512x128xf32, #tpu.memory_space<vmem>>, vector<512x128xf32>,
    } else {
    }
    %c0 = arith.constant 0 : index
    %c0_1 = arith.constant 0 : index
    %3 = vector.load %arg7[%c0, %c0_1] : memref<512x128xf32, #tpu.memory_space<vmem>>, vector<512x128xf32>
    %c0_2 = arith.constant 0 : index
    %c0_3 = arith.constant 0 : index
    %4 = vector.load %arg3[%c0_2, %c0_3] : memref<512x128xbf16, #tpu.memory_space<vmem>>, vector<512x128xbf16>
    %c0_4 = arith.constant 0 : index
    %c0_5 = arith.constant 0 : index
    %5 = vector.load %arg4[%c0_4, %c0_5] : memref<128x128xbf16, #tpu.memory_space<vmem>>, vector<128x128xbf16>
    %cst = arith.constant dense<0.000000e+00> : vector<512x128xf32>
    %6 = tpu.matmul %4, %5, %cst {dimension_numbers = #tpu.dot_dimension_numbers<[1], [0], [0], [1], [0, 0, 1, 1], [], []>} : vector<512x128xbf16>, vector<128x128xbf16>, vector<512x128xf32> -> vector<512x128xf32>
    %7 = arith.addf %3, %6 : vector<512x128xf32>
    %c0_6 = arith.constant 0 : index
    %c0_7 = arith.constant 0 : index
    %8 = vector.load %arg7[%c0_6, %c0_7] : memref<512x128xf32, #tpu.memory_space<vmem>>, vector<512x128xf32>
    tpu.vector_store %arg7[%c0_6, %c0_7], %7 {strides = array<i32>} : memref<512x128xf32, #tpu.memory_space<vmem>>, vector<512x128xf32>,
    %c0_i32_8 = arith.constant 0 : i32
    %9 = arith.cmpi eq, %arg2, %c0_i32_8 : i32
    %10 = arith.extui %9 : i1 to i32
    %c0_i32_9 = arith.constant 0 : i32
    %11 = arith.cmpi ne, %10, %c0_i32_9 : i32
    scf.if %11 {
      %c0_10 = arith.constant 0 : index
      %c0_11 = arith.constant 0 : index
      %12 = vector.load %arg7[%c0_10, %c0_11] : memref<512x128xf32, #tpu.memory_space<vmem>>, vector<512x128xf32>
      %c0_12 = arith.constant 0 : index
      %c0_13 = arith.constant 0 : index
      %13 = vector.load %arg5[%c0_12, %c0_13] : memref<1x128xf32, #tpu.memory_space<vmem>>, vector<1x128xf32>
      %14 = vector.broadcast %13 : vector<1x128xf32> to vector<512x128xf32>
      %15 = arith.addf %12, %14 : vector<512x128xf32>
      %cst_14 = arith.constant 0.000000e+00 : f32
      %16 = vector.broadcast %cst_14 : f32 to vector<512x128xf32>
      %17 = arith.maximumf %15, %16 : vector<512x128xf32>
      %18 = arith.truncf %17 : vector<512x128xf32> to vector<512x128xbf16>
      %c0_15 = arith.constant 0 : index
      %c0_16 = arith.constant 0 : index
      %19 = vector.load %arg6[%c0_15, %c0_16] : memref<512x128xbf16, #tpu.memory_space<vmem>>, vector<512x128xbf16>
      tpu.vector_store %arg6[%c0_15, %c0_16], %18 {strides = array<i32>} : memref<512x128xbf16, #tpu.memory_space<vmem>>, vector<512x128xbf16>,
    } else {
    }
    return
  }
  func.func @transform_0(%arg0: i32, %arg1: i32, %arg2: i32) -> (i32, i32) {
    %c0_i32 = arith.constant 0 : i32
    return %arg0, %arg2 : i32, i32
  }
  func.func @transform_1(%arg0: i32, %arg1: i32, %arg2: i32) -> (i32, i32) {
    %c0_i32 = arith.constant 0 : i32
    return %arg2, %arg1 : i32, i32
  }
  func.func @transform_2(%arg0: i32, %arg1: i32, %arg2: i32) -> (i32, i32) {
    %c0_i32 = arith.constant 0 : i32
    %c0_i32_0 = arith.constant 0 : i32
    return %c0_i32, %arg1 : i32, i32
  }
  func.func @transform_3(%arg0: i32, %arg1: i32, %arg2: i32) -> (i32, i32) {
    %c0_i32 = arith.constant 0 : i32
    return %arg0, %arg1 : i32, i32
  }
}

module attributes {stable_mosaic.version = 11 : i64} {
  func.func @_conv3x3_kernel(%arg0: i32, %arg1: i32, %arg2: i32, %arg3: i32, %arg4: memref<1x4x144x128xbf16, #tpu.memory_space<vmem>>, %arg5: memref<9x128x128xbf16, #tpu.memory_space<vmem>>, %arg6: memref<1x128xf32, #tpu.memory_space<vmem>>, %arg7: memref<1x128x128xbf16, #tpu.memory_space<vmem>>, %arg8: memref<128x128xf32, #tpu.memory_space<vmem>>) attributes {dimension_semantics = [#tpu.dimension_semantics<parallel>, #tpu.dimension_semantics<parallel>, #tpu.dimension_semantics<parallel>, #tpu.dimension_semantics<arbitrary>], iteration_bounds = array<i64: 2, 1, 1, 1>, scalar_prefetch = 0 : i64, scratch_operands = 1 : i64, tpu.core_type = #tpu.core_type<tc>, window_params = [{transform_indices = @transform_0, window_bounds = array<i64: 1, 4, 144, 128>}, {transform_indices = @transform_1, window_bounds = array<i64: 9, 128, 128>}, {transform_indices = @transform_2, window_bounds = array<i64: 1, 128>}, {transform_indices = @transform_3, window_bounds = array<i64: 1, 128, 128>}]} {
    %c0_i32 = arith.constant 0 : i32
    %0 = arith.cmpi eq, %arg3, %c0_i32 : i32
    %1 = arith.extui %0 : i1 to i32
    %c0_i32_0 = arith.constant 0 : i32
    %2 = arith.cmpi ne, %1, %c0_i32_0 : i32
    scf.if %2 {
      %cst_90 = arith.constant 0.000000e+00 : f32
      %95 = vector.broadcast %cst_90 : f32 to vector<128x128xf32>
      %c0_91 = arith.constant 0 : index
      %c0_92 = arith.constant 0 : index
      %96 = vector.load %arg8[%c0_91, %c0_92] : memref<128x128xf32, #tpu.memory_space<vmem>>, vector<128x128xf32>
      tpu.vector_store %arg8[%c0_91, %c0_92], %95 {strides = array<i32>} : memref<128x128xf32, #tpu.memory_space<vmem>>, vector<128x128xf32>,
    } else {
    }
    %c128_i32 = arith.constant 128 : i32
    %3 = arith.muli %arg1, %c128_i32 : i32
    %4 = tpu.assume_multiple %3, 8 : i32
    %c0_i32_1 = arith.constant 0 : i32
    %5 = arith.addi %4, %c0_i32_1 : i32
    %6 = tpu.assume_multiple %5, 8 : i32
    %c0 = arith.constant 0 : index
    %c0_2 = arith.constant 0 : index
    %7 = arith.index_cast %6 : i32 to index
    %c0_3 = arith.constant 0 : index
    %8 = vector.load %arg4[%c0, %c0_2, %7, %c0_3] : memref<1x4x144x128xbf16, #tpu.memory_space<vmem>>, vector<1x1x128x128xbf16>
    %9 = vector.shape_cast %8 : vector<1x1x128x128xbf16> to vector<128x128xbf16>
    %c0_4 = arith.constant 0 : index
    %c0_5 = arith.constant 0 : index
    %c0_6 = arith.constant 0 : index
    %10 = vector.load %arg5[%c0_4, %c0_5, %c0_6] : memref<9x128x128xbf16, #tpu.memory_space<vmem>>, vector<1x128x128xbf16>
    %11 = vector.shape_cast %10 : vector<1x128x128xbf16> to vector<128x128xbf16>
    %cst = arith.constant dense<0.000000e+00> : vector<128x128xf32>
    %12 = tpu.matmul %9, %11, %cst {dimension_numbers = #tpu.dot_dimension_numbers<[1], [0], [0], [1], [0, 0, 1, 1], [], []>} : vector<128x128xbf16>, vector<128x128xbf16>, vector<128x128xf32> -> vector<128x128xf32>
    %c0_7 = arith.constant 0 : index
    %c0_8 = arith.constant 0 : index
    %13 = vector.load %arg8[%c0_7, %c0_8] : memref<128x128xf32, #tpu.memory_space<vmem>>, vector<128x128xf32>
    %14 = arith.addf %13, %12 : vector<128x128xf32>
    %c0_9 = arith.constant 0 : index
    %c0_10 = arith.constant 0 : index
    %15 = vector.load %arg8[%c0_9, %c0_10] : memref<128x128xf32, #tpu.memory_space<vmem>>, vector<128x128xf32>
    tpu.vector_store %arg8[%c0_9, %c0_10], %14 {strides = array<i32>} : memref<128x128xf32, #tpu.memory_space<vmem>>, vector<128x128xf32>,
    %c0_i32_11 = arith.constant 0 : i32
    %16 = arith.addi %4, %c0_i32_11 : i32
    %17 = tpu.assume_multiple %16, 8 : i32
    %c0_12 = arith.constant 0 : index
    %c1 = arith.constant 1 : index
    %18 = arith.index_cast %17 : i32 to index
    %c0_13 = arith.constant 0 : index
    %19 = vector.load %arg4[%c0_12, %c1, %18, %c0_13] : memref<1x4x144x128xbf16, #tpu.memory_space<vmem>>, vector<1x1x128x128xbf16>
    %20 = vector.shape_cast %19 : vector<1x1x128x128xbf16> to vector<128x128xbf16>
    %c1_14 = arith.constant 1 : index
    %c0_15 = arith.constant 0 : index
    %c0_16 = arith.constant 0 : index
    %21 = vector.load %arg5[%c1_14, %c0_15, %c0_16] : memref<9x128x128xbf16, #tpu.memory_space<vmem>>, vector<1x128x128xbf16>
    %22 = vector.shape_cast %21 : vector<1x128x128xbf16> to vector<128x128xbf16>
    %cst_17 = arith.constant dense<0.000000e+00> : vector<128x128xf32>
    %23 = tpu.matmul %20, %22, %cst_17 {dimension_numbers = #tpu.dot_dimension_numbers<[1], [0], [0], [1], [0, 0, 1, 1], [], []>} : vector<128x128xbf16>, vector<128x128xbf16>, vector<128x128xf32> -> vector<128x128xf32>
    %c0_18 = arith.constant 0 : index
    %c0_19 = arith.constant 0 : index
    %24 = vector.load %arg8[%c0_18, %c0_19] : memref<128x128xf32, #tpu.memory_space<vmem>>, vector<128x128xf32>
    %25 = arith.addf %24, %23 : vector<128x128xf32>
    %c0_20 = arith.constant 0 : index
    %c0_21 = arith.constant 0 : index
    %26 = vector.load %arg8[%c0_20, %c0_21] : memref<128x128xf32, #tpu.memory_space<vmem>>, vector<128x128xf32>
    tpu.vector_store %arg8[%c0_20, %c0_21], %25 {strides = array<i32>} : memref<128x128xf32, #tpu.memory_space<vmem>>, vector<128x128xf32>,
    %c2 = arith.constant 2 : index
    %c0_22 = arith.constant 0 : index
    %c0_23 = arith.constant 0 : index
    %27 = vector.load %arg5[%c2, %c0_22, %c0_23] : memref<9x128x128xbf16, #tpu.memory_space<vmem>>, vector<1x128x128xbf16>
    %28 = vector.shape_cast %27 : vector<1x128x128xbf16> to vector<128x128xbf16>
    %cst_24 = arith.constant dense<0.000000e+00> : vector<128x128xf32>
    %29 = tpu.matmul %9, %28, %cst_24 {dimension_numbers = #tpu.dot_dimension_numbers<[1], [0], [0], [1], [0, 0, 1, 1], [], []>} : vector<128x128xbf16>, vector<128x128xbf16>, vector<128x128xf32> -> vector<128x128xf32>
    %c127_i32 = arith.constant 127 : i32
    %30 = tpu.dynamic_rotate %29 by %c127_i32 dim 0 : vector<128x128xf32>, i32 -> vector<128x128xf32>
    %c0_25 = arith.constant 0 : index
    %c0_26 = arith.constant 0 : index
    %31 = vector.load %arg8[%c0_25, %c0_26] : memref<128x128xf32, #tpu.memory_space<vmem>>, vector<128x128xf32>
    %32 = arith.addf %31, %30 : vector<128x128xf32>
    %c0_27 = arith.constant 0 : index
    %c0_28 = arith.constant 0 : index
    %33 = vector.load %arg8[%c0_27, %c0_28] : memref<128x128xf32, #tpu.memory_space<vmem>>, vector<128x128xf32>
    tpu.vector_store %arg8[%c0_27, %c0_28], %32 {strides = array<i32>} : memref<128x128xf32, #tpu.memory_space<vmem>>, vector<128x128xf32>,
    %c0_i32_29 = arith.constant 0 : i32
    %34 = arith.addi %4, %c0_i32_29 : i32
    %35 = tpu.assume_multiple %34, 8 : i32
    %c0_30 = arith.constant 0 : index
    %c2_31 = arith.constant 2 : index
    %36 = arith.index_cast %35 : i32 to index
    %c0_32 = arith.constant 0 : index
    %37 = vector.load %arg4[%c0_30, %c2_31, %36, %c0_32] : memref<1x4x144x128xbf16, #tpu.memory_space<vmem>>, vector<1x1x128x128xbf16>
    %38 = vector.shape_cast %37 : vector<1x1x128x128xbf16> to vector<128x128xbf16>
    %c3 = arith.constant 3 : index
    %c0_33 = arith.constant 0 : index
    %c0_34 = arith.constant 0 : index
    %39 = vector.load %arg5[%c3, %c0_33, %c0_34] : memref<9x128x128xbf16, #tpu.memory_space<vmem>>, vector<1x128x128xbf16>
    %40 = vector.shape_cast %39 : vector<1x128x128xbf16> to vector<128x128xbf16>
    %cst_35 = arith.constant dense<0.000000e+00> : vector<128x128xf32>
    %41 = tpu.matmul %38, %40, %cst_35 {dimension_numbers = #tpu.dot_dimension_numbers<[1], [0], [0], [1], [0, 0, 1, 1], [], []>} : vector<128x128xbf16>, vector<128x128xbf16>, vector<128x128xf32> -> vector<128x128xf32>
    %c0_36 = arith.constant 0 : index
    %c0_37 = arith.constant 0 : index
    %42 = vector.load %arg8[%c0_36, %c0_37] : memref<128x128xf32, #tpu.memory_space<vmem>>, vector<128x128xf32>
    %43 = arith.addf %42, %41 : vector<128x128xf32>
    %c0_38 = arith.constant 0 : index
    %c0_39 = arith.constant 0 : index
    %44 = vector.load %arg8[%c0_38, %c0_39] : memref<128x128xf32, #tpu.memory_space<vmem>>, vector<128x128xf32>
    tpu.vector_store %arg8[%c0_38, %c0_39], %43 {strides = array<i32>} : memref<128x128xf32, #tpu.memory_space<vmem>>, vector<128x128xf32>,
    %c0_i32_40 = arith.constant 0 : i32
    %45 = arith.addi %4, %c0_i32_40 : i32
    %46 = tpu.assume_multiple %45, 8 : i32
    %c0_41 = arith.constant 0 : index
    %c3_42 = arith.constant 3 : index
    %47 = arith.index_cast %46 : i32 to index
    %c0_43 = arith.constant 0 : index
    %48 = vector.load %arg4[%c0_41, %c3_42, %47, %c0_43] : memref<1x4x144x128xbf16, #tpu.memory_space<vmem>>, vector<1x1x128x128xbf16>
    %49 = vector.shape_cast %48 : vector<1x1x128x128xbf16> to vector<128x128xbf16>
    %c4 = arith.constant 4 : index
    %c0_44 = arith.constant 0 : index
    %c0_45 = arith.constant 0 : index
    %50 = vector.load %arg5[%c4, %c0_44, %c0_45] : memref<9x128x128xbf16, #tpu.memory_space<vmem>>, vector<1x128x128xbf16>
    %51 = vector.shape_cast %50 : vector<1x128x128xbf16> to vector<128x128xbf16>
    %cst_46 = arith.constant dense<0.000000e+00> : vector<128x128xf32>
    %52 = tpu.matmul %49, %51, %cst_46 {dimension_numbers = #tpu.dot_dimension_numbers<[1], [0], [0], [1], [0, 0, 1, 1], [], []>} : vector<128x128xbf16>, vector<128x128xbf16>, vector<128x128xf32> -> vector<128x128xf32>
    %c0_47 = arith.constant 0 : index
    %c0_48 = arith.constant 0 : index
    %53 = vector.load %arg8[%c0_47, %c0_48] : memref<128x128xf32, #tpu.memory_space<vmem>>, vector<128x128xf32>
    %54 = arith.addf %53, %52 : vector<128x128xf32>
    %c0_49 = arith.constant 0 : index
    %c0_50 = arith.constant 0 : index
    %55 = vector.load %arg8[%c0_49, %c0_50] : memref<128x128xf32, #tpu.memory_space<vmem>>, vector<128x128xf32>
    tpu.vector_store %arg8[%c0_49, %c0_50], %54 {strides = array<i32>} : memref<128x128xf32, #tpu.memory_space<vmem>>, vector<128x128xf32>,
    %c5 = arith.constant 5 : index
    %c0_51 = arith.constant 0 : index
    %c0_52 = arith.constant 0 : index
    %56 = vector.load %arg5[%c5, %c0_51, %c0_52] : memref<9x128x128xbf16, #tpu.memory_space<vmem>>, vector<1x128x128xbf16>
    %57 = vector.shape_cast %56 : vector<1x128x128xbf16> to vector<128x128xbf16>
    %cst_53 = arith.constant dense<0.000000e+00> : vector<128x128xf32>
    %58 = tpu.matmul %38, %57, %cst_53 {dimension_numbers = #tpu.dot_dimension_numbers<[1], [0], [0], [1], [0, 0, 1, 1], [], []>} : vector<128x128xbf16>, vector<128x128xbf16>, vector<128x128xf32> -> vector<128x128xf32>
    %c127_i32_54 = arith.constant 127 : i32
    %59 = tpu.dynamic_rotate %58 by %c127_i32_54 dim 0 : vector<128x128xf32>, i32 -> vector<128x128xf32>
    %c0_55 = arith.constant 0 : index
    %c0_56 = arith.constant 0 : index
    %60 = vector.load %arg8[%c0_55, %c0_56] : memref<128x128xf32, #tpu.memory_space<vmem>>, vector<128x128xf32>
    %61 = arith.addf %60, %59 : vector<128x128xf32>
    %c0_57 = arith.constant 0 : index
    %c0_58 = arith.constant 0 : index
    %62 = vector.load %arg8[%c0_57, %c0_58] : memref<128x128xf32, #tpu.memory_space<vmem>>, vector<128x128xf32>
    tpu.vector_store %arg8[%c0_57, %c0_58], %61 {strides = array<i32>} : memref<128x128xf32, #tpu.memory_space<vmem>>, vector<128x128xf32>,
    %c16_i32 = arith.constant 16 : i32
    %63 = arith.addi %4, %c16_i32 : i32
    %64 = tpu.assume_multiple %63, 8 : i32
    %c0_59 = arith.constant 0 : index
    %c0_60 = arith.constant 0 : index
    %65 = arith.index_cast %64 : i32 to index
    %c0_61 = arith.constant 0 : index
    %66 = vector.load %arg4[%c0_59, %c0_60, %65, %c0_61] : memref<1x4x144x128xbf16, #tpu.memory_space<vmem>>, vector<1x1x128x128xbf16>
    %67 = vector.shape_cast %66 : vector<1x1x128x128xbf16> to vector<128x128xbf16>
    %c6 = arith.constant 6 : index
    %c0_62 = arith.constant 0 : index
    %c0_63 = arith.constant 0 : index
    %68 = vector.load %arg5[%c6, %c0_62, %c0_63] : memref<9x128x128xbf16, #tpu.memory_space<vmem>>, vector<1x128x128xbf16>
    %69 = vector.shape_cast %68 : vector<1x128x128xbf16> to vector<128x128xbf16>
    %cst_64 = arith.constant dense<0.000000e+00> : vector<128x128xf32>
    %70 = tpu.matmul %67, %69, %cst_64 {dimension_numbers = #tpu.dot_dimension_numbers<[1], [0], [0], [1], [0, 0, 1, 1], [], []>} : vector<128x128xbf16>, vector<128x128xbf16>, vector<128x128xf32> -> vector<128x128xf32>
    %c0_65 = arith.constant 0 : index
    %c0_66 = arith.constant 0 : index
    %71 = vector.load %arg8[%c0_65, %c0_66] : memref<128x128xf32, #tpu.memory_space<vmem>>, vector<128x128xf32>
    %72 = arith.addf %71, %70 : vector<128x128xf32>
    %c0_67 = arith.constant 0 : index
    %c0_68 = arith.constant 0 : index
    %73 = vector.load %arg8[%c0_67, %c0_68] : memref<128x128xf32, #tpu.memory_space<vmem>>, vector<128x128xf32>
    tpu.vector_store %arg8[%c0_67, %c0_68], %72 {strides = array<i32>} : memref<128x128xf32, #tpu.memory_space<vmem>>, vector<128x128xf32>,
    %c16_i32_69 = arith.constant 16 : i32
    %74 = arith.addi %4, %c16_i32_69 : i32
    %75 = tpu.assume_multiple %74, 8 : i32
    %c0_70 = arith.constant 0 : index
    %c1_71 = arith.constant 1 : index
    %76 = arith.index_cast %75 : i32 to index
    %c0_72 = arith.constant 0 : index
    %77 = vector.load %arg4[%c0_70, %c1_71, %76, %c0_72] : memref<1x4x144x128xbf16, #tpu.memory_space<vmem>>, vector<1x1x128x128xbf16>
    %78 = vector.shape_cast %77 : vector<1x1x128x128xbf16> to vector<128x128xbf16>
    %c7 = arith.constant 7 : index
    %c0_73 = arith.constant 0 : index
    %c0_74 = arith.constant 0 : index
    %79 = vector.load %arg5[%c7, %c0_73, %c0_74] : memref<9x128x128xbf16, #tpu.memory_space<vmem>>, vector<1x128x128xbf16>
    %80 = vector.shape_cast %79 : vector<1x128x128xbf16> to vector<128x128xbf16>
    %cst_75 = arith.constant dense<0.000000e+00> : vector<128x128xf32>
    %81 = tpu.matmul %78, %80, %cst_75 {dimension_numbers = #tpu.dot_dimension_numbers<[1], [0], [0], [1], [0, 0, 1, 1], [], []>} : vector<128x128xbf16>, vector<128x128xbf16>, vector<128x128xf32> -> vector<128x128xf32>
    %c0_76 = arith.constant 0 : index
    %c0_77 = arith.constant 0 : index
    %82 = vector.load %arg8[%c0_76, %c0_77] : memref<128x128xf32, #tpu.memory_space<vmem>>, vector<128x128xf32>
    %83 = arith.addf %82, %81 : vector<128x128xf32>
    %c0_78 = arith.constant 0 : index
    %c0_79 = arith.constant 0 : index
    %84 = vector.load %arg8[%c0_78, %c0_79] : memref<128x128xf32, #tpu.memory_space<vmem>>, vector<128x128xf32>
    tpu.vector_store %arg8[%c0_78, %c0_79], %83 {strides = array<i32>} : memref<128x128xf32, #tpu.memory_space<vmem>>, vector<128x128xf32>,
    %c8 = arith.constant 8 : index
    %c0_80 = arith.constant 0 : index
    %c0_81 = arith.constant 0 : index
    %85 = vector.load %arg5[%c8, %c0_80, %c0_81] : memref<9x128x128xbf16, #tpu.memory_space<vmem>>, vector<1x128x128xbf16>
    %86 = vector.shape_cast %85 : vector<1x128x128xbf16> to vector<128x128xbf16>
    %cst_82 = arith.constant dense<0.000000e+00> : vector<128x128xf32>
    %87 = tpu.matmul %67, %86, %cst_82 {dimension_numbers = #tpu.dot_dimension_numbers<[1], [0], [0], [1], [0, 0, 1, 1], [], []>} : vector<128x128xbf16>, vector<128x128xbf16>, vector<128x128xf32> -> vector<128x128xf32>
    %c127_i32_83 = arith.constant 127 : i32
    %88 = tpu.dynamic_rotate %87 by %c127_i32_83 dim 0 : vector<128x128xf32>, i32 -> vector<128x128xf32>
    %c0_84 = arith.constant 0 : index
    %c0_85 = arith.constant 0 : index
    %89 = vector.load %arg8[%c0_84, %c0_85] : memref<128x128xf32, #tpu.memory_space<vmem>>, vector<128x128xf32>
    %90 = arith.addf %89, %88 : vector<128x128xf32>
    %c0_86 = arith.constant 0 : index
    %c0_87 = arith.constant 0 : index
    %91 = vector.load %arg8[%c0_86, %c0_87] : memref<128x128xf32, #tpu.memory_space<vmem>>, vector<128x128xf32>
    tpu.vector_store %arg8[%c0_86, %c0_87], %90 {strides = array<i32>} : memref<128x128xf32, #tpu.memory_space<vmem>>, vector<128x128xf32>,
    %c0_i32_88 = arith.constant 0 : i32
    %92 = arith.cmpi eq, %arg3, %c0_i32_88 : i32
    %93 = arith.extui %92 : i1 to i32
    %c0_i32_89 = arith.constant 0 : i32
    %94 = arith.cmpi ne, %93, %c0_i32_89 : i32
    scf.if %94 {
      %c0_90 = arith.constant 0 : index
      %c0_91 = arith.constant 0 : index
      %95 = vector.load %arg8[%c0_90, %c0_91] : memref<128x128xf32, #tpu.memory_space<vmem>>, vector<128x128xf32>
      %c0_92 = arith.constant 0 : index
      %c0_93 = arith.constant 0 : index
      %96 = vector.load %arg6[%c0_92, %c0_93] : memref<1x128xf32, #tpu.memory_space<vmem>>, vector<1x128xf32>
      %97 = vector.broadcast %96 : vector<1x128xf32> to vector<128x128xf32>
      %98 = arith.addf %95, %97 : vector<128x128xf32>
      %cst_94 = arith.constant 0.000000e+00 : f32
      %99 = vector.broadcast %cst_94 : f32 to vector<128x128xf32>
      %100 = arith.maximumf %98, %99 : vector<128x128xf32>
      %101 = arith.truncf %100 : vector<128x128xf32> to vector<128x128xbf16>
      %c0_95 = arith.constant 0 : index
      %c0_96 = arith.constant 0 : index
      %c0_97 = arith.constant 0 : index
      %102 = vector.load %arg7[%c0_95, %c0_96, %c0_97] : memref<1x128x128xbf16, #tpu.memory_space<vmem>>, vector<1x128x128xbf16>
      %103 = vector.shape_cast %102 : vector<1x128x128xbf16> to vector<128x128xbf16>
      %104 = vector.shape_cast %101 : vector<128x128xbf16> to vector<1x128x128xbf16>
      tpu.vector_store %arg7[%c0_95, %c0_96, %c0_97], %104 {strides = array<i32>} : memref<1x128x128xbf16, #tpu.memory_space<vmem>>, vector<1x128x128xbf16>,
    } else {
    }
    return
  }
  func.func @transform_0(%arg0: i32, %arg1: i32, %arg2: i32, %arg3: i32) -> (i32, i32, i32, i32) {
    %c0_i32 = arith.constant 0 : i32
    %c0_i32_0 = arith.constant 0 : i32
    %c0_i32_1 = arith.constant 0 : i32
    return %arg0, %c0_i32, %c0_i32_0, %arg3 : i32, i32, i32, i32
  }
  func.func @transform_1(%arg0: i32, %arg1: i32, %arg2: i32, %arg3: i32) -> (i32, i32, i32) {
    %c0_i32 = arith.constant 0 : i32
    %c0_i32_0 = arith.constant 0 : i32
    return %c0_i32, %arg3, %arg2 : i32, i32, i32
  }
  func.func @transform_2(%arg0: i32, %arg1: i32, %arg2: i32, %arg3: i32) -> (i32, i32) {
    %c0_i32 = arith.constant 0 : i32
    %c0_i32_0 = arith.constant 0 : i32
    return %c0_i32, %arg2 : i32, i32
  }
  func.func @transform_3(%arg0: i32, %arg1: i32, %arg2: i32, %arg3: i32) -> (i32, i32, i32) {
    %c0_i32 = arith.constant 0 : i32
    return %arg0, %arg1, %arg2 : i32, i32, i32
  }
}

module attributes {stable_mosaic.version = 11 : i64} {
  func.func @_mm_bias_kernel(%arg0: i32, %arg1: i32, %arg2: i32, %arg3: memref<512x256xbf16, #tpu.memory_space<vmem>>, %arg4: memref<256x128xbf16, #tpu.memory_space<vmem>>, %arg5: memref<1x128xf32, #tpu.memory_space<vmem>>, %arg6: memref<512x128xf32, #tpu.memory_space<vmem>>, %arg7: memref<512x128xf32, #tpu.memory_space<vmem>>) attributes {dimension_semantics = [#tpu.dimension_semantics<parallel>, #tpu.dimension_semantics<parallel>, #tpu.dimension_semantics<arbitrary>], iteration_bounds = array<i64: 1, 1, 1>, scalar_prefetch = 0 : i64, scratch_operands = 1 : i64, tpu.core_type = #tpu.core_type<tc>, window_params = [{transform_indices = @transform_0, window_bounds = array<i64: 512, 256>}, {transform_indices = @transform_1, window_bounds = array<i64: 256, 128>}, {transform_indices = @transform_2, window_bounds = array<i64: 1, 128>}, {transform_indices = @transform_3, window_bounds = array<i64: 512, 128>}]} {
    %c0_i32 = arith.constant 0 : i32
    %0 = arith.cmpi eq, %arg2, %c0_i32 : i32
    %1 = arith.extui %0 : i1 to i32
    %c0_i32_0 = arith.constant 0 : i32
    %2 = arith.cmpi ne, %1, %c0_i32_0 : i32
    scf.if %2 {
      %cst_10 = arith.constant 0.000000e+00 : f32
      %12 = vector.broadcast %cst_10 : f32 to vector<512x128xf32>
      %c0_11 = arith.constant 0 : index
      %c0_12 = arith.constant 0 : index
      %13 = vector.load %arg7[%c0_11, %c0_12] : memref<512x128xf32, #tpu.memory_space<vmem>>, vector<512x128xf32>
      tpu.vector_store %arg7[%c0_11, %c0_12], %12 {strides = array<i32>} : memref<512x128xf32, #tpu.memory_space<vmem>>, vector<512x128xf32>,
    } else {
    }
    %c0 = arith.constant 0 : index
    %c0_1 = arith.constant 0 : index
    %3 = vector.load %arg7[%c0, %c0_1] : memref<512x128xf32, #tpu.memory_space<vmem>>, vector<512x128xf32>
    %c0_2 = arith.constant 0 : index
    %c0_3 = arith.constant 0 : index
    %4 = vector.load %arg3[%c0_2, %c0_3] : memref<512x256xbf16, #tpu.memory_space<vmem>>, vector<512x256xbf16>
    %c0_4 = arith.constant 0 : index
    %c0_5 = arith.constant 0 : index
    %5 = vector.load %arg4[%c0_4, %c0_5] : memref<256x128xbf16, #tpu.memory_space<vmem>>, vector<256x128xbf16>
    %cst = arith.constant dense<0.000000e+00> : vector<512x128xf32>
    %6 = tpu.matmul %4, %5, %cst {dimension_numbers = #tpu.dot_dimension_numbers<[1], [0], [0], [1], [0, 0, 1, 1], [], []>} : vector<512x256xbf16>, vector<256x128xbf16>, vector<512x128xf32> -> vector<512x128xf32>
    %7 = arith.addf %3, %6 : vector<512x128xf32>
    %c0_6 = arith.constant 0 : index
    %c0_7 = arith.constant 0 : index
    %8 = vector.load %arg7[%c0_6, %c0_7] : memref<512x128xf32, #tpu.memory_space<vmem>>, vector<512x128xf32>
    tpu.vector_store %arg7[%c0_6, %c0_7], %7 {strides = array<i32>} : memref<512x128xf32, #tpu.memory_space<vmem>>, vector<512x128xf32>,
    %c0_i32_8 = arith.constant 0 : i32
    %9 = arith.cmpi eq, %arg2, %c0_i32_8 : i32
    %10 = arith.extui %9 : i1 to i32
    %c0_i32_9 = arith.constant 0 : i32
    %11 = arith.cmpi ne, %10, %c0_i32_9 : i32
    scf.if %11 {
      %c0_10 = arith.constant 0 : index
      %c0_11 = arith.constant 0 : index
      %12 = vector.load %arg7[%c0_10, %c0_11] : memref<512x128xf32, #tpu.memory_space<vmem>>, vector<512x128xf32>
      %c0_12 = arith.constant 0 : index
      %c0_13 = arith.constant 0 : index
      %13 = vector.load %arg5[%c0_12, %c0_13] : memref<1x128xf32, #tpu.memory_space<vmem>>, vector<1x128xf32>
      %14 = vector.broadcast %13 : vector<1x128xf32> to vector<512x128xf32>
      %15 = arith.addf %12, %14 : vector<512x128xf32>
      %cst_14 = arith.constant 0.000000e+00 : f32
      %16 = vector.broadcast %cst_14 : f32 to vector<512x128xf32>
      %17 = arith.maximumf %15, %16 : vector<512x128xf32>
      %c0_15 = arith.constant 0 : index
      %c0_16 = arith.constant 0 : index
      %18 = vector.load %arg6[%c0_15, %c0_16] : memref<512x128xf32, #tpu.memory_space<vmem>>, vector<512x128xf32>
      tpu.vector_store %arg6[%c0_15, %c0_16], %17 {strides = array<i32>} : memref<512x128xf32, #tpu.memory_space<vmem>>, vector<512x128xf32>,
    } else {
    }
    return
  }
  func.func @transform_0(%arg0: i32, %arg1: i32, %arg2: i32) -> (i32, i32) {
    %c0_i32 = arith.constant 0 : i32
    return %arg0, %arg2 : i32, i32
  }
  func.func @transform_1(%arg0: i32, %arg1: i32, %arg2: i32) -> (i32, i32) {
    %c0_i32 = arith.constant 0 : i32
    return %arg2, %arg1 : i32, i32
  }
  func.func @transform_2(%arg0: i32, %arg1: i32, %arg2: i32) -> (i32, i32) {
    %c0_i32 = arith.constant 0 : i32
    %c0_i32_0 = arith.constant 0 : i32
    return %c0_i32, %arg1 : i32, i32
  }
  func.func @transform_3(%arg0: i32, %arg1: i32, %arg2: i32) -> (i32, i32) {
    %c0_i32 = arith.constant 0 : i32
    return %arg0, %arg1 : i32, i32
  }
}

</mosaic_0001>

<bundles_post_ra>
// kernel: bottleneck_pallas.3
= control target key start
LH: loop header
LB: loop body
LE: loop exit
PB: predicated region body
PF: predicated region fallthrough
CT: control target
= control target key end

     0   :  { %s2251_s1 = inlined_call_operand.vmem [shape: bf16[128,128], index: 1, kind: input, shape index: {}]   ;;  %s2252_s0 = inlined_call_operand.vmem [shape: bf16[512,128], index: 0, kind: input, shape index: {}]   ;;  %s2253_s2 = inlined_call_operand.vmem [shape: f32[1,128], index: 2, kind: input, shape index: {}]   ;;  %s2254_s3 = inlined_call_operand.vmem [shape: bf16[512,128], index: 3, kind: output, shape index: {}]  }
   0x1   :  { %v1906_v0 = vld [vmem:[%s2251_s1 + $0x38] sm:$0xff]   ;;  %v1907_v1 = vld [vmem:[%s2251_s1 + $0x30] sm:$0xff]   ;;  %v1908_v2 = vld [vmem:[%s2251_s1 + $0x28] sm:$0xff]  }
   0x2   :  { %1810 = vmatprep.subr.bf16.mxu0 %v1906_v0  ;;  %1890 = vmatprep.subr.bf16.mxu1 %v1906_v0  ;;  %v1909_v3 = vld [vmem:[%s2251_s1 + $0x20] sm:$0xff]   ;;  %v1910_v6 = vld [vmem:[%s2251_s1 + $0x18] sm:$0xff]   ;;  %v1911_v7 = vld [vmem:[%s2251_s1 + $0x10] sm:$0xff]  }
   0x3   :  { %1811 = vmatpush3.bf16.msra.mxu0 %v1906_v0  ;;  %1898 = vmatpush3.bf16.msra.mxu1 %v1906_v0  ;;  %v1914_v4 = vld [vmem:[%s2252_s0] sm:$0xff]   ;;  %v1912_v8 = vld [vmem:[%s2251_s1 + $0x8] sm:$0xff]   ;;  %v1918_v12 = vld [vmem:[%s2252_s0 + $0x10] sm:$0xff]  }
   0x4   :  { %1812 = vmatprep.subr.bf16.mxu0 %v1907_v1  ;;  %1891 = vmatprep.subr.bf16.mxu1 %v1907_v1  ;;  %v1915_v5 = vld [vmem:[%s2252_s0 + $0x80] sm:$0xff]   ;;  %v1916_v10 = vld [vmem:[%s2252_s0 + $0x8] sm:$0xff]   ;;  %v1919_v13 = vld [vmem:[%s2252_s0 + $0x90] sm:$0xff]  }
   0x5   :  { %1826 = vmatprep.mubr.bf16.mxu0 %v1914_v4  ;;  %1858 = vmatprep.mubr.bf16.mxu1 %v1915_v5  ;;  %v1913_v9 = vld [vmem:[%s2251_s1] sm:$0xff]   ;;  %v1917_v11 = vld [vmem:[%s2252_s0 + $0x88] sm:$0xff]   ;;  %v1920_v14 = vld [vmem:[%s2252_s0 + $0x18] sm:$0xff]  }
   0x6   :  { %v1921_v15 = vld [vmem:[%s2252_s0 + $0x98] sm:$0xff]   ;;  %v1922_v16 = vld [vmem:[%s2252_s0 + $0x20] sm:$0xff]   ;;  %v1924_v18 = vld [vmem:[%s2252_s0 + $0x28] sm:$0xff]  }
   0x7   :  { %1813 = vmatpush3.bf16.msra.mxu0 %v1907_v1  ;;  %1899 = vmatpush3.bf16.msra.mxu1 %v1907_v1  ;;  %v1923_v17 = vld [vmem:[%s2252_s0 + $0xa0] sm:$0xff]   ;;  %v1925_v19 = vld [vmem:[%s2252_s0 + $0xa8] sm:$0xff]   ;;  %v1926_v20 = vld [vmem:[%s2252_s0 + $0x30] sm:$0xff]  }
   0x8   :  { %1814 = vmatprep.subr.bf16.mxu0 %v1908_v2  ;;  %1892 = vmatprep.subr.bf16.mxu1 %v1908_v2  ;;  %v1927_v21 = vld [vmem:[%s2252_s0 + $0xb0] sm:$0xff]   ;;  %v1928_v22 = vld [vmem:[%s2252_s0 + $0x38] sm:$0xff]   ;;  %v1930_v24 = vld [vmem:[%s2252_s0 + $0x40] sm:$0xff]  }
   0x9   :  { %v1929_v23 = vld [vmem:[%s2252_s0 + $0xb8] sm:$0xff]   ;;  %v1931_v25 = vld [vmem:[%s2252_s0 + $0xc0] sm:$0xff]   ;;  %v1932_v26 = vld [vmem:[%s2252_s0 + $0x48] sm:$0xff]  }
   0xa   :  { %v1933_v27 = vld [vmem:[%s2252_s0 + $0xc8] sm:$0xff]   ;;  %v1934_v28 = vld [vmem:[%s2252_s0 + $0x50] sm:$0xff]   ;;  %v1936_v30 = vld [vmem:[%s2252_s0 + $0x58] sm:$0xff]  }
   0xb   :  { %1815 = vmatpush3.bf16.msra.mxu0 %v1908_v2  ;;  %1900 = vmatpush3.bf16.msra.mxu1 %v1908_v2  ;;  %v1935_v29 = vld [vmem:[%s2252_s0 + $0xd0] sm:$0xff]   ;;  %v1937_v31 = vld [vmem:[%s2252_s0 + $0xd8] sm:$0xff]   ;;  %v1938_v32 = vld [vmem:[%s2252_s0 + $0x60] sm:$0xff]  }
   0xc   :  { %1816 = vmatprep.subr.bf16.mxu0 %v1909_v3  ;;  %1893 = vmatprep.subr.bf16.mxu1 %v1909_v3  ;;  %v1939_v33 = vld [vmem:[%s2252_s0 + $0xe0] sm:$0xff]   ;;  %v1940_v34 = vld [vmem:[%s2252_s0 + $0x68] sm:$0xff]   ;;  %v1942_v36 = vld [vmem:[%s2252_s0 + $0x70] sm:$0xff]  }
   0xd   :  { %v1941_v35 = vld [vmem:[%s2252_s0 + $0xe8] sm:$0xff]   ;;  %v1943_v37 = vld [vmem:[%s2252_s0 + $0xf0] sm:$0xff]   ;;  %v1944_v38 = vld [vmem:[%s2252_s0 + $0x78] sm:$0xff]  }
   0xe   :  { %v1945_v39 = vld [vmem:[%s2252_s0 + $0xf8] sm:$0xff]   ;;  %v2089_v40 = vld [vmem:[%s2253_s2] ss:$0 sm:$0xff] }
   0xf   :  { %1817 = vmatpush3.bf16.msra.mxu0 %v1909_v3  ;;  %1901 = vmatpush3.bf16.msra.mxu1 %v1909_v3 }
  0x10   :  { %1818 = vmatprep.subr.bf16.mxu0 %v1910_v6  ;;  %1894 = vmatprep.subr.bf16.mxu1 %v1910_v6 }
  0x13   :  { %1819 = vmatpush3.bf16.msra.mxu0 %v1910_v6  ;;  %1902 = vmatpush3.bf16.msra.mxu1 %v1910_v6 }
  0x14   :  { %1820 = vmatprep.subr.bf16.mxu0 %v1911_v7  ;;  %1895 = vmatprep.subr.bf16.mxu1 %v1911_v7 }
  0x17   :  { %1821 = vmatpush3.bf16.msra.mxu0 %v1911_v7  ;;  %1903 = vmatpush3.bf16.msra.mxu1 %v1911_v7 }
  0x18   :  { %1822 = vmatprep.subr.bf16.mxu0 %v1912_v8  ;;  %1896 = vmatprep.subr.bf16.mxu1 %v1912_v8 }
  0x1b   :  { %1823 = vmatpush3.bf16.msra.mxu0 %v1912_v8  ;;  %1904 = vmatpush3.bf16.msra.mxu1 %v1912_v8 }
  0x1c   :  { %1824 = vmatprep.subr.bf16.mxu0 %v1913_v9  ;;  %1897 = vmatprep.subr.bf16.mxu1 %v1913_v9 }
  0x1f   :  { %1825 = vmatpush3.bf16.msra.mxu0 %v1913_v9  ;;  %1905 = vmatpush3.bf16.msra.mxu1 %v1913_v9 }
  0x22   :  { %1827 = vmatmul.mubr.bf16.vlgmr.msra.gmra.mxu0 %v1916_v10  ;;  %1859 = vmatmul.mubr.bf16.vlgmr.msra.gmra.mxu1 %v1917_v11 }
  0x23   :  { %1830 = vmatprep.mubr.bf16.mxu0 %v1918_v12  ;;  %1862 = vmatprep.mubr.bf16.mxu1 %v1919_v13 }
  0x2a   :  { %1831 = vmatmul.mubr.bf16.gmra.mxu0 %v1920_v14  ;;  %1863 = vmatmul.mubr.bf16.gmra.mxu1 %v1921_v15 }
  0x2b   :  { %1834 = vmatprep.mubr.bf16.mxu0 %v1922_v16  ;;  %1866 = vmatprep.mubr.bf16.mxu1 %v1923_v17 }
  0x32   :  { %1835 = vmatmul.mubr.bf16.gmra.mxu0 %v1924_v18  ;;  %1867 = vmatmul.mubr.bf16.gmra.mxu1 %v1925_v19 }
  0x33   :  { %1838 = vmatprep.mubr.bf16.mxu0 %v1926_v20  ;;  %1870 = vmatprep.mubr.bf16.mxu1 %v1927_v21 }
  0x3a   :  { %1839 = vmatmul.mubr.bf16.gmra.mxu0 %v1928_v22  ;;  %1871 = vmatmul.mubr.bf16.gmra.mxu1 %v1929_v23 }
  0x3b   :  { %1842 = vmatprep.mubr.bf16.mxu0 %v1930_v24  ;;  %1874 = vmatprep.mubr.bf16.mxu1 %v1931_v25 }
  0x42   :  { %1843 = vmatmul.mubr.bf16.gmra.mxu0 %v1932_v26  ;;  %1875 = vmatmul.mubr.bf16.gmra.mxu1 %v1933_v27 }
  0x43   :  { %1846 = vmatprep.mubr.bf16.mxu0 %v1934_v28  ;;  %1878 = vmatprep.mubr.bf16.mxu1 %v1935_v29 }
  0x4a   :  { %1847 = vmatmul.mubr.bf16.gmra.mxu0 %v1936_v30  ;;  %1879 = vmatmul.mubr.bf16.gmra.mxu1 %v1937_v31 }
  0x4b   :  { %1850 = vmatprep.mubr.bf16.mxu0 %v1938_v32  ;;  %1882 = vmatprep.mubr.bf16.mxu1 %v1939_v33 }
  0x52   :  { %1851 = vmatmul.mubr.bf16.gmra.mxu0 %v1940_v34  ;;  %1883 = vmatmul.mubr.bf16.gmra.mxu1 %v1941_v35 }
  0x53   :  { %1854 = vmatprep.mubr.bf16.mxu0 %v1942_v36  ;;  %1886 = vmatprep.mubr.bf16.mxu1 %v1943_v37 }
  0x5a   :  { %1855 = vmatmul.mubr.bf16.gmra.mxu0 %v1944_v38  ;;  %1887 = vmatmul.mubr.bf16.gmra.mxu1 %v1945_v39 }
  0xe2   :  { %v1828_v41 = vpop.f32.mrf.mxu0  ;;  %v1860_v42 = vpop.f32.mrf.mxu1 }
  0xe3   :  { %v960_v43 = vadd.f32 %v1828_v41, %v2089_v40  ;;  %v992_v44 = vadd.f32 %v1860_v42, %v2089_v40 }
  0xe4   :  { %v501_v45 = vpop.f32.mrf.mxu0  ;;  %v629_v46 = vpop.f32.mrf.mxu1 }
  0xe5   :  { %v958_v47 = vadd.f32 %v2089_v40, %v501_v45  ;;  %v990_v48 = vadd.f32 %v2089_v40, %v629_v46  ;;  %v1024_v53 = vmax.f32 %v960_v43, 0.0  ;;  %v1056_v54 = vmax.f32 %v992_v44, 0.0 }
  0xe6   :  { %v1829_v49 = vpop.f32.mrf.mxu0  ;;  %v1861_v50 = vpop.f32.mrf.mxu1 }
  0xe7   :  { %v961_v51 = vadd.f32 %v1829_v49, %v2089_v40  ;;  %v993_v52 = vadd.f32 %v1861_v50, %v2089_v40  ;;  %v1022_v61 = vmax.f32 %v958_v47, 0.0  ;;  %v1054_v62 = vmax.f32 %v990_v48, 0.0 }
  0xe8   :  { %v504_v55 = vpop.f32.mrf.mxu0  ;;  %v632_v56 = vpop.f32.mrf.mxu1 }
  0xe9   :  { %v1025_v57 = vmax.f32 %v961_v51, 0.0  ;;  %v1057_v58 = vmax.f32 %v993_v52, 0.0  ;;  %v959_v59 = vadd.f32 %v2089_v40, %v504_v55  ;;  %v991_v60 = vadd.f32 %v2089_v40, %v632_v56 }
  0xea   :  { %v1832_v63 = vpop.f32.mrf.mxu0  ;;  %v1864_v0 = vpop.f32.mrf.mxu1 }
  0xeb   :  { %v1587_v1 = vpack.c.bf16 %v1025_v57, %v1024_v53  ;;  %v1667_v2 = vpack.c.bf16 %v1057_v58, %v1056_v54  ;;  %v1023_v3 = vmax.f32 %v959_v59, 0.0  ;;  %v1055_v4 = vmax.f32 %v991_v60, 0.0 }
  0xec   :  { %v964_v5 = vadd.f32 %v1832_v63, %v2089_v40  ;;  %v996_v6 = vadd.f32 %v1864_v0, %v2089_v40  ;;  %v517_v7 = vpop.f32.mrf.mxu0  ;;  %v645_v8 = vpop.f32.mrf.mxu1 }
  0xed   :  { %1739 = vst [vmem:[%s2254_s3 + $0x8] sm:$0xff] %v1587_v1   ;;  %1755 = vst [vmem:[%s2254_s3 + $0x88] sm:$0xff] %v1667_v2   ;;  %v1582_v9 = vpack.c.bf16 %v1023_v3, %v1022_v61  ;;  %v1662_v10 = vpack.c.bf16 %v1055_v4, %v1054_v62  ;;  %v962_v11 = vadd.f32 %v2089_v40, %v517_v7 }
  0xee   :  { %v994_v12 = vadd.f32 %v2089_v40, %v645_v8  ;;  %v1833_v13 = vpop.f32.mrf.mxu0  ;;  %v1865_v14 = vpop.f32.mrf.mxu1  ;;  %v1028_v17 = vmax.f32 %v964_v5, 0.0  ;;  %v1060_v18 = vmax.f32 %v996_v6, 0.0 }
  0xef   :  { %1583 = vst [vmem:[%s2254_s3] sm:$0xff] %v1582_v9   ;;  %1754 = vst [vmem:[%s2254_s3 + $0x80] sm:$0xff] %v1662_v10   ;;  %v965_v15 = vadd.f32 %v1833_v13, %v2089_v40  ;;  %v997_v16 = vadd.f32 %v1865_v14, %v2089_v40  ;;  %v1026_v25 = vmax.f32 %v962_v11, 0.0 }
  0xf0   :  { %v520_v19 = vpop.f32.mrf.mxu0  ;;  %v648_v20 = vpop.f32.mrf.mxu1  ;;  %v1058_v26 = vmax.f32 %v994_v12, 0.0 }
  0xf1   :  { %v1029_v21 = vmax.f32 %v965_v15, 0.0  ;;  %v1061_v22 = vmax.f32 %v997_v16, 0.0  ;;  %v963_v23 = vadd.f32 %v2089_v40, %v520_v19  ;;  %v995_v24 = vadd.f32 %v2089_v40, %v648_v20 }
  0xf2   :  { %v1836_v27 = vpop.f32.mrf.mxu0  ;;  %v1868_v28 = vpop.f32.mrf.mxu1 }
  0xf3   :  { %v1597_v29 = vpack.c.bf16 %v1029_v21, %v1028_v17  ;;  %v1677_v30 = vpack.c.bf16 %v1061_v22, %v1060_v18  ;;  %v1027_v31 = vmax.f32 %v963_v23, 0.0  ;;  %v1059_v32 = vmax.f32 %v995_v24, 0.0 }
  0xf4   :  { %v968_v33 = vadd.f32 %v1836_v27, %v2089_v40  ;;  %v1000_v34 = vadd.f32 %v1868_v28, %v2089_v40  ;;  %v533_v35 = vpop.f32.mrf.mxu0  ;;  %v661_v36 = vpop.f32.mrf.mxu1 }
  0xf5   :  { %1741 = vst [vmem:[%s2254_s3 + $0x18] sm:$0xff] %v1597_v29   ;;  %1757 = vst [vmem:[%s2254_s3 + $0x98] sm:$0xff] %v1677_v30   ;;  %v1592_v37 = vpack.c.bf16 %v1027_v31, %v1026_v25  ;;  %v1672_v38 = vpack.c.bf16 %v1059_v32, %v1058_v26  ;;  %v966_v39 = vadd.f32 %v2089_v40, %v533_v35 }
  0xf6   :  { %v998_v41 = vadd.f32 %v2089_v40, %v661_v36  ;;  %v1837_v42 = vpop.f32.mrf.mxu0  ;;  %v1869_v43 = vpop.f32.mrf.mxu1  ;;  %v1032_v46 = vmax.f32 %v968_v33, 0.0  ;;  %v1064_v47 = vmax.f32 %v1000_v34, 0.0 }
  0xf7   :  { %1740 = vst [vmem:[%s2254_s3 + $0x10] sm:$0xff] %v1592_v37   ;;  %1756 = vst [vmem:[%s2254_s3 + $0x90] sm:$0xff] %v1672_v38   ;;  %v969_v44 = vadd.f32 %v1837_v42, %v2089_v40  ;;  %v1001_v45 = vadd.f32 %v1869_v43, %v2089_v40  ;;  %v1030_v54 = vmax.f32 %v966_v39, 0.0 }
  0xf8   :  { %v536_v48 = vpop.f32.mrf.mxu0  ;;  %v664_v49 = vpop.f32.mrf.mxu1  ;;  %v1062_v55 = vmax.f32 %v998_v41, 0.0 }
  0xf9   :  { %v1033_v50 = vmax.f32 %v969_v44, 0.0  ;;  %v1065_v51 = vmax.f32 %v1001_v45, 0.0  ;;  %v967_v52 = vadd.f32 %v2089_v40, %v536_v48  ;;  %v999_v53 = vadd.f32 %v2089_v40, %v664_v49 }
  0xfa   :  { %v1840_v56 = vpop.f32.mrf.mxu0  ;;  %v1872_v57 = vpop.f32.mrf.mxu1 }
  0xfb   :  { %v1607_v58 = vpack.c.bf16 %v1033_v50, %v1032_v46  ;;  %v1687_v59 = vpack.c.bf16 %v1065_v51, %v1064_v47  ;;  %v1031_v60 = vmax.f32 %v967_v52, 0.0  ;;  %v1063_v61 = vmax.f32 %v999_v53, 0.0 }
  0xfc   :  { %v972_v62 = vadd.f32 %v1840_v56, %v2089_v40  ;;  %v1004_v63 = vadd.f32 %v1872_v57, %v2089_v40  ;;  %v549_v0 = vpop.f32.mrf.mxu0  ;;  %v677_v1 = vpop.f32.mrf.mxu1 }
  0xfd   :  { %1743 = vst [vmem:[%s2254_s3 + $0x28] sm:$0xff] %v1607_v58   ;;  %1759 = vst [vmem:[%s2254_s3 + $0xa8] sm:$0xff] %v1687_v59   ;;  %v1602_v2 = vpack.c.bf16 %v1031_v60, %v1030_v54  ;;  %v1682_v3 = vpack.c.bf16 %v1063_v61, %v1062_v55  ;;  %v970_v4 = vadd.f32 %v2089_v40, %v549_v0 }
  0xfe   :  { %v1002_v5 = vadd.f32 %v2089_v40, %v677_v1  ;;  %v1841_v6 = vpop.f32.mrf.mxu0  ;;  %v1873_v7 = vpop.f32.mrf.mxu1  ;;  %v1036_v10 = vmax.f32 %v972_v62, 0.0  ;;  %v1068_v11 = vmax.f32 %v1004_v63, 0.0 }
  0xff   :  { %1742 = vst [vmem:[%s2254_s3 + $0x20] sm:$0xff] %v1602_v2   ;;  %1758 = vst [vmem:[%s2254_s3 + $0xa0] sm:$0xff] %v1682_v3   ;;  %v973_v8 = vadd.f32 %v1841_v6, %v2089_v40  ;;  %v1005_v9 = vadd.f32 %v1873_v7, %v2089_v40  ;;  %v1034_v18 = vmax.f32 %v970_v4, 0.0 }
 0x100   :  { %v552_v12 = vpop.f32.mrf.mxu0  ;;  %v680_v13 = vpop.f32.mrf.mxu1  ;;  %v1066_v19 = vmax.f32 %v1002_v5, 0.0 }
 0x101   :  { %v1037_v14 = vmax.f32 %v973_v8, 0.0  ;;  %v1069_v15 = vmax.f32 %v1005_v9, 0.0  ;;  %v971_v16 = vadd.f32 %v2089_v40, %v552_v12  ;;  %v1003_v17 = vadd.f32 %v2089_v40, %v680_v13 }
 0x102   :  { %v1844_v20 = vpop.f32.mrf.mxu0  ;;  %v1876_v21 = vpop.f32.mrf.mxu1 }
 0x103   :  { %v1617_v22 = vpack.c.bf16 %v1037_v14, %v1036_v10  ;;  %v1697_v23 = vpack.c.bf16 %v1069_v15, %v1068_v11  ;;  %v1035_v24 = vmax.f32 %v971_v16, 0.0  ;;  %v1067_v25 = vmax.f32 %v1003_v17, 0.0 }
 0x104   :  { %v976_v26 = vadd.f32 %v1844_v20, %v2089_v40  ;;  %v1008_v27 = vadd.f32 %v1876_v21, %v2089_v40  ;;  %v565_v28 = vpop.f32.mrf.mxu0  ;;  %v693_v29 = vpop.f32.mrf.mxu1 }
 0x105   :  { %1745 = vst [vmem:[%s2254_s3 + $0x38] sm:$0xff] %v1617_v22   ;;  %1761 = vst [vmem:[%s2254_s3 + $0xb8] sm:$0xff] %v1697_v23   ;;  %v1612_v30 = vpack.c.bf16 %v1035_v24, %v1034_v18  ;;  %v1692_v31 = vpack.c.bf16 %v1067_v25, %v1066_v19  ;;  %v974_v32 = vadd.f32 %v2089_v40, %v565_v28 }
 0x106   :  { %v1006_v33 = vadd.f32 %v2089_v40, %v693_v29  ;;  %v1845_v34 = vpop.f32.mrf.mxu0  ;;  %v1877_v35 = vpop.f32.mrf.mxu1  ;;  %v1040_v38 = vmax.f32 %v976_v26, 0.0  ;;  %v1072_v39 = vmax.f32 %v1008_v27, 0.0 }
 0x107   :  { %1744 = vst [vmem:[%s2254_s3 + $0x30] sm:$0xff] %v1612_v30   ;;  %1760 = vst [vmem:[%s2254_s3 + $0xb0] sm:$0xff] %v1692_v31   ;;  %v977_v36 = vadd.f32 %v1845_v34, %v2089_v40  ;;  %v1009_v37 = vadd.f32 %v1877_v35, %v2089_v40  ;;  %v1038_v47 = vmax.f32 %v974_v32, 0.0 }
 0x108   :  { %v568_v41 = vpop.f32.mrf.mxu0  ;;  %v696_v42 = vpop.f32.mrf.mxu1  ;;  %v1070_v48 = vmax.f32 %v1006_v33, 0.0 }
 0x109   :  { %v1041_v43 = vmax.f32 %v977_v36, 0.0  ;;  %v1073_v44 = vmax.f32 %v1009_v37, 0.0  ;;  %v975_v45 = vadd.f32 %v2089_v40, %v568_v41  ;;  %v1007_v46 = vadd.f32 %v2089_v40, %v696_v42 }
 0x10a   :  { %v1848_v49 = vpop.f32.mrf.mxu0  ;;  %v1880_v50 = vpop.f32.mrf.mxu1 }
 0x10b   :  { %v1627_v51 = vpack.c.bf16 %v1041_v43, %v1040_v38  ;;  %v1707_v52 = vpack.c.bf16 %v1073_v44, %v1072_v39  ;;  %v1039_v53 = vmax.f32 %v975_v45, 0.0  ;;  %v1071_v54 = vmax.f32 %v1007_v46, 0.0 }
 0x10c   :  { %v980_v55 = vadd.f32 %v1848_v49, %v2089_v40  ;;  %v1012_v56 = vadd.f32 %v1880_v50, %v2089_v40  ;;  %v581_v57 = vpop.f32.mrf.mxu0  ;;  %v709_v58 = vpop.f32.mrf.mxu1 }
 0x10d   :  { %1747 = vst [vmem:[%s2254_s3 + $0x48] sm:$0xff] %v1627_v51   ;;  %1763 = vst [vmem:[%s2254_s3 + $0xc8] sm:$0xff] %v1707_v52   ;;  %v1622_v59 = vpack.c.bf16 %v1039_v53, %v1038_v47  ;;  %v1702_v60 = vpack.c.bf16 %v1071_v54, %v1070_v48  ;;  %v978_v61 = vadd.f32 %v2089_v40, %v581_v57 }
 0x10e   :  { %v1010_v62 = vadd.f32 %v2089_v40, %v709_v58  ;;  %v1849_v63 = vpop.f32.mrf.mxu0  ;;  %v1881_v0 = vpop.f32.mrf.mxu1  ;;  %v1044_v3 = vmax.f32 %v980_v55, 0.0  ;;  %v1076_v4 = vmax.f32 %v1012_v56, 0.0 }
 0x10f   :  { %1746 = vst [vmem:[%s2254_s3 + $0x40] sm:$0xff] %v1622_v59   ;;  %1762 = vst [vmem:[%s2254_s3 + $0xc0] sm:$0xff] %v1702_v60   ;;  %v981_v1 = vadd.f32 %v1849_v63, %v2089_v40  ;;  %v1013_v2 = vadd.f32 %v1881_v0, %v2089_v40  ;;  %v1042_v11 = vmax.f32 %v978_v61, 0.0 }
 0x110   :  { %v584_v5 = vpop.f32.mrf.mxu0  ;;  %v712_v6 = vpop.f32.mrf.mxu1  ;;  %v1074_v12 = vmax.f32 %v1010_v62, 0.0 }
 0x111   :  { %v1045_v7 = vmax.f32 %v981_v1, 0.0  ;;  %v1077_v8 = vmax.f32 %v1013_v2, 0.0  ;;  %v979_v9 = vadd.f32 %v2089_v40, %v584_v5  ;;  %v1011_v10 = vadd.f32 %v2089_v40, %v712_v6 }
 0x112   :  { %v1852_v13 = vpop.f32.mrf.mxu0  ;;  %v1884_v14 = vpop.f32.mrf.mxu1 }
 0x113   :  { %v1637_v15 = vpack.c.bf16 %v1045_v7, %v1044_v3  ;;  %v1717_v16 = vpack.c.bf16 %v1077_v8, %v1076_v4  ;;  %v1043_v17 = vmax.f32 %v979_v9, 0.0  ;;  %v1075_v18 = vmax.f32 %v1011_v10, 0.0 }
 0x114   :  { %v984_v19 = vadd.f32 %v1852_v13, %v2089_v40  ;;  %v1016_v20 = vadd.f32 %v1884_v14, %v2089_v40  ;;  %v597_v21 = vpop.f32.mrf.mxu0  ;;  %v725_v22 = vpop.f32.mrf.mxu1 }
 0x115   :  { %1749 = vst [vmem:[%s2254_s3 + $0x58] sm:$0xff] %v1637_v15   ;;  %1765 = vst [vmem:[%s2254_s3 + $0xd8] sm:$0xff] %v1717_v16   ;;  %v1632_v23 = vpack.c.bf16 %v1043_v17, %v1042_v11  ;;  %v1712_v24 = vpack.c.bf16 %v1075_v18, %v1074_v12  ;;  %v982_v25 = vadd.f32 %v2089_v40, %v597_v21 }
 0x116   :  { %v1014_v26 = vadd.f32 %v2089_v40, %v725_v22  ;;  %v1853_v27 = vpop.f32.mrf.mxu0  ;;  %v1885_v28 = vpop.f32.mrf.mxu1  ;;  %v1048_v31 = vmax.f32 %v984_v19, 0.0  ;;  %v1080_v32 = vmax.f32 %v1016_v20, 0.0 }
 0x117   :  { %1748 = vst [vmem:[%s2254_s3 + $0x50] sm:$0xff] %v1632_v23   ;;  %1764 = vst [vmem:[%s2254_s3 + $0xd0] sm:$0xff] %v1712_v24   ;;  %v985_v29 = vadd.f32 %v1853_v27, %v2089_v40  ;;  %v1017_v30 = vadd.f32 %v1885_v28, %v2089_v40  ;;  %v1046_v39 = vmax.f32 %v982_v25, 0.0 }
 0x118   :  { %v600_v33 = vpop.f32.mrf.mxu0  ;;  %v728_v34 = vpop.f32.mrf.mxu1  ;;  %v1078_v41 = vmax.f32 %v1014_v26, 0.0 }
 0x119   :  { %v1049_v35 = vmax.f32 %v985_v29, 0.0  ;;  %v1081_v36 = vmax.f32 %v1017_v30, 0.0  ;;  %v983_v37 = vadd.f32 %v2089_v40, %v600_v33  ;;  %v1015_v38 = vadd.f32 %v2089_v40, %v728_v34 }
 0x11a   :  { %v1856_v42 = vpop.f32.mrf.mxu0  ;;  %v1888_v43 = vpop.f32.mrf.mxu1 }
 0x11b   :  { %v1647_v44 = vpack.c.bf16 %v1049_v35, %v1048_v31  ;;  %v1727_v45 = vpack.c.bf16 %v1081_v36, %v1080_v32  ;;  %v1047_v46 = vmax.f32 %v983_v37, 0.0  ;;  %v1079_v47 = vmax.f32 %v1015_v38, 0.0 }
 0x11c   :  { %v988_v48 = vadd.f32 %v1856_v42, %v2089_v40  ;;  %v1020_v49 = vadd.f32 %v1888_v43, %v2089_v40  ;;  %v613_v50 = vpop.f32.mrf.mxu0  ;;  %v741_v51 = vpop.f32.mrf.mxu1 }
 0x11d   :  { %1751 = vst [vmem:[%s2254_s3 + $0x68] sm:$0xff] %v1647_v44   ;;  %1767 = vst [vmem:[%s2254_s3 + $0xe8] sm:$0xff] %v1727_v45   ;;  %v1642_v52 = vpack.c.bf16 %v1047_v46, %v1046_v39  ;;  %v1722_v53 = vpack.c.bf16 %v1079_v47, %v1078_v41  ;;  %v986_v54 = vadd.f32 %v2089_v40, %v613_v50 }
 0x11e   :  { %v1018_v55 = vadd.f32 %v2089_v40, %v741_v51  ;;  %v1857_v56 = vpop.f32.mrf.mxu0  ;;  %v1889_v57 = vpop.f32.mrf.mxu1  ;;  %v1052_v60 = vmax.f32 %v988_v48, 0.0  ;;  %v1084_v61 = vmax.f32 %v1020_v49, 0.0 }
 0x11f   :  { %1750 = vst [vmem:[%s2254_s3 + $0x60] sm:$0xff] %v1642_v52   ;;  %1766 = vst [vmem:[%s2254_s3 + $0xe0] sm:$0xff] %v1722_v53   ;;  %v989_v58 = vadd.f32 %v1857_v56, %v2089_v40  ;;  %v1021_v59 = vadd.f32 %v1889_v57, %v2089_v40  ;;  %v1050_v4 = vmax.f32 %v986_v54, 0.0 }
 0x120   :  { %v616_v62 = vpop.f32.mrf.mxu0  ;;  %v744_v63 = vpop.f32.mrf.mxu1  ;;  %v1082_v5 = vmax.f32 %v1018_v55, 0.0 }
 0x121   :  { %v1053_v0 = vmax.f32 %v989_v58, 0.0  ;;  %v1085_v1 = vmax.f32 %v1021_v59, 0.0  ;;  %v987_v2 = vadd.f32 %v2089_v40, %v616_v62  ;;  %v1019_v3 = vadd.f32 %v2089_v40, %v744_v63 }
 0x123   :  { %v1657_v6 = vpack.c.bf16 %v1053_v0, %v1052_v60  ;;  %v1737_v7 = vpack.c.bf16 %v1085_v1, %v1084_v61  ;;  %v1051_v8 = vmax.f32 %v987_v2, 0.0  ;;  %v1083_v9 = vmax.f32 %v1019_v3, 0.0 }
 0x125   :  { %1753 = vst [vmem:[%s2254_s3 + $0x78] sm:$0xff] %v1657_v6   ;;  %1769 = vst [vmem:[%s2254_s3 + $0xf8] sm:$0xff] %v1737_v7   ;;  %v1652_v10 = vpack.c.bf16 %v1051_v8, %v1050_v4  ;;  %v1732_v11 = vpack.c.bf16 %v1083_v9, %v1082_v5 }
 0x127   :  { %1752 = vst [vmem:[%s2254_s3 + $0x70] sm:$0xff] %v1652_v10   ;;  %1768 = vst [vmem:[%s2254_s3 + $0xf0] sm:$0xff] %v1732_v11  }

// kernel: bottleneck_pallas.5
= control target key start
LH: loop header
LB: loop body
LE: loop exit
PB: predicated region body
PF: predicated region fallthrough
CT: control target
= control target key end

     0   :  { %v1572_v0 = vmov 0   ;;  %s2126_s1 = inlined_call_operand.vmem [shape: bf16[256,128], index: 1, kind: input, shape index: {}]   ;;  %s2127_s0 = inlined_call_operand.vmem [shape: bf16[512,256], index: 0, kind: input, shape index: {}]   ;;  %s2128_s2 = inlined_call_operand.vmem [shape: f32[1,128], index: 2, kind: input, shape index: {}]   ;;  %s2129_s3 = inlined_call_operand.vmem [shape: f32[512,128], index: 3, kind: output, shape index: {}]  }
   0x1   :  { %659 = vmatprep.subr.bf16.mxu0 %v1572_v0  ;;  %1427 = vmatprep.subr.bf16.mxu1 %v1572_v0  ;;  %v1460_v1 = vld [vmem:[%s2126_s1 + $0x38] sm:$0xff]   ;;  %v1461_v2 = vld [vmem:[%s2126_s1 + $0x30] sm:$0xff]   ;;  %v1462_v3 = vld [vmem:[%s2126_s1 + $0x28] sm:$0xff]  }
   0x2   :  { %660 = vmatpush1.bf16.msra.mxu0 %v1460_v1  ;;  %1443 = vmatpush1.bf16.msra.mxu1 %v1460_v1  ;;  %v1463_v4 = vld [vmem:[%s2126_s1 + $0x20] sm:$0xff]   ;;  %v1464_v5 = vld [vmem:[%s2126_s1 + $0x18] sm:$0xff]   ;;  %v1465_v7 = vld [vmem:[%s2126_s1 + $0x10] sm:$0xff]  }
   0x3   :  { %661 = vmatprep.subr.bf16.mxu0 %v1572_v0  ;;  %1428 = vmatprep.subr.bf16.mxu1 %v1572_v0  ;;  %v1478_v6 = vld [vmem:[%s2127_s0 + $0x4] ss:$8 sps:$4 sm:$0xff]   ;;  %v1468_v11 = vld [vmem:[%s2126_s1 + $0x78] sm:$0xff]   ;;  %v1469_v12 = vld [vmem:[%s2126_s1 + $0x70] sm:$0xff]  }
   0x4   :  { %v1481_v8 = vld [vmem:[%s2127_s0 + $0x104] ss:$8 sps:$4 sm:$0xff]   ;;  %691 = vmatprep.mubr.bf16.mxu0 %v1478_v6  ;;  %v1472_v15 = vld [vmem:[%s2126_s1 + $0x58] sm:$0xff]   ;;  %v1473_v16 = vld [vmem:[%s2126_s1 + $0x50] sm:$0xff]  }
   0x5   :  { %819 = vmatprep.mubr.bf16.mxu1 %v1481_v8  ;;  %v1466_v9 = vld [vmem:[%s2126_s1 + $0x8] sm:$0xff]   ;;  %v1467_v10 = vld [vmem:[%s2126_s1] sm:$0xff]   ;;  %v1482_v21 = vld [vmem:[%s2127_s0 + $0x14] ss:$8 sps:$4 sm:$0xff]  }
   0x6   :  { %662 = vmatpush1.bf16.msra.mxu0 %v1461_v2  ;;  %1444 = vmatpush1.bf16.msra.mxu1 %v1461_v2  ;;  %v1470_v13 = vld [vmem:[%s2126_s1 + $0x68] sm:$0xff]   ;;  %v1471_v14 = vld [vmem:[%s2126_s1 + $0x60] sm:$0xff]   ;;  %v1484_v22 = vld [vmem:[%s2127_s0 + $0x114] ss:$8 sps:$4 sm:$0xff]  }
   0x7   :  { %663 = vmatprep.subr.bf16.mxu0 %v1572_v0  ;;  %1429 = vmatprep.subr.bf16.mxu1 %v1572_v0  ;;  %v1474_v17 = vld [vmem:[%s2126_s1 + $0x48] sm:$0xff]   ;;  %v1475_v18 = vld [vmem:[%s2126_s1 + $0x40] sm:$0xff]   ;;  %v1486_v23 = vld [vmem:[%s2127_s0 + $0x10] ss:$8 sps:$4 sm:$0xff]  }
   0x8   :  { %v1476_v19 = vld [vmem:[%s2127_s0] ss:$8 sps:$4 sm:$0xff]   ;;  %v1487_v24 = vld [vmem:[%s2127_s0 + $0x110] ss:$8 sps:$4 sm:$0xff]   ;;  %v1488_v25 = vld [vmem:[%s2127_s0 + $0x24] ss:$8 sps:$4 sm:$0xff]  }
   0x9   :  { %v1479_v20 = vld [vmem:[%s2127_s0 + $0x100] ss:$8 sps:$4 sm:$0xff]   ;;  %v1490_v26 = vld [vmem:[%s2127_s0 + $0x124] ss:$8 sps:$4 sm:$0xff]   ;;  %v1494_v29 = vld [vmem:[%s2127_s0 + $0x34] ss:$8 sps:$4 sm:$0xff]  }
   0xa   :  { %664 = vmatpush1.bf16.msra.mxu0 %v1462_v3  ;;  %1445 = vmatpush1.bf16.msra.mxu1 %v1462_v3  ;;  %v1492_v27 = vld [vmem:[%s2127_s0 + $0x20] ss:$8 sps:$4 sm:$0xff]   ;;  %v1496_v30 = vld [vmem:[%s2127_s0 + $0x134] ss:$8 sps:$4 sm:$0xff]   ;;  %v1498_v31 = vld [vmem:[%s2127_s0 + $0x30] ss:$8 sps:$4 sm:$0xff]  }
   0xb   :  { %665 = vmatprep.subr.bf16.mxu0 %v1572_v0  ;;  %1430 = vmatprep.subr.bf16.mxu1 %v1572_v0  ;;  %v1493_v28 = vld [vmem:[%s2127_s0 + $0x120] ss:$8 sps:$4 sm:$0xff]   ;;  %v1499_v32 = vld [vmem:[%s2127_s0 + $0x130] ss:$8 sps:$4 sm:$0xff]   ;;  %v1500_v33 = vld [vmem:[%s2127_s0 + $0x44] ss:$8 sps:$4 sm:$0xff]  }
   0xc   :  { %v1502_v34 = vld [vmem:[%s2127_s0 + $0x144] ss:$8 sps:$4 sm:$0xff]   ;;  %v1504_v35 = vld [vmem:[%s2127_s0 + $0x40] ss:$8 sps:$4 sm:$0xff]   ;;  %v1506_v37 = vld [vmem:[%s2127_s0 + $0x54] ss:$8 sps:$4 sm:$0xff]  }
   0xd   :  { %v1505_v36 = vld [vmem:[%s2127_s0 + $0x140] ss:$8 sps:$4 sm:$0xff]   ;;  %v1508_v38 = vld [vmem:[%s2127_s0 + $0x154] ss:$8 sps:$4 sm:$0xff]   ;;  %v1510_v39 = vld [vmem:[%s2127_s0 + $0x50] ss:$8 sps:$4 sm:$0xff]  }
   0xe   :  { %666 = vmatpush1.bf16.msra.mxu0 %v1463_v4  ;;  %1446 = vmatpush1.bf16.msra.mxu1 %v1463_v4  ;;  %v1511_v40 = vld [vmem:[%s2127_s0 + $0x150] ss:$8 sps:$4 sm:$0xff]   ;;  %v1512_v41 = vld [vmem:[%s2127_s0 + $0x64] ss:$8 sps:$4 sm:$0xff]   ;;  %v1516_v43 = vld [vmem:[%s2127_s0 + $0x60] ss:$8 sps:$4 sm:$0xff]  }
   0xf   :  { %667 = vmatprep.subr.bf16.mxu0 %v1572_v0  ;;  %1431 = vmatprep.subr.bf16.mxu1 %v1572_v0  ;;  %v1514_v42 = vld [vmem:[%s2127_s0 + $0x164] ss:$8 sps:$4 sm:$0xff]   ;;  %v1517_v44 = vld [vmem:[%s2127_s0 + $0x160] ss:$8 sps:$4 sm:$0xff]   ;;  %v1518_v45 = vld [vmem:[%s2127_s0 + $0x74] ss:$8 sps:$4 sm:$0xff]  }
  0x10   :  { %v1520_v46 = vld [vmem:[%s2127_s0 + $0x174] ss:$8 sps:$4 sm:$0xff]   ;;  %v1522_v47 = vld [vmem:[%s2127_s0 + $0x70] ss:$8 sps:$4 sm:$0xff]   ;;  %v1524_v49 = vld [vmem:[%s2127_s0 + $0x84] ss:$8 sps:$4 sm:$0xff]  }
  0x11   :  { %v1523_v48 = vld [vmem:[%s2127_s0 + $0x170] ss:$8 sps:$4 sm:$0xff]   ;;  %v1526_v50 = vld [vmem:[%s2127_s0 + $0x184] ss:$8 sps:$4 sm:$0xff]   ;;  %v1528_v51 = vld [vmem:[%s2127_s0 + $0x80] ss:$8 sps:$4 sm:$0xff]  }
  0x12   :  { %668 = vmatpush1.bf16.msra.mxu0 %v1464_v5  ;;  %1447 = vmatpush1.bf16.msra.mxu1 %v1464_v5  ;;  %v1529_v52 = vld [vmem:[%s2127_s0 + $0x180] ss:$8 sps:$4 sm:$0xff]   ;;  %v1530_v53 = vld [vmem:[%s2127_s0 + $0x94] ss:$8 sps:$4 sm:$0xff]   ;;  %v1534_v55 = vld [vmem:[%s2127_s0 + $0x90] ss:$8 sps:$4 sm:$0xff]  }
  0x13   :  { %669 = vmatprep.subr.bf16.mxu0 %v1572_v0  ;;  %1432 = vmatprep.subr.bf16.mxu1 %v1572_v0  ;;  %v1532_v54 = vld [vmem:[%s2127_s0 + $0x194] ss:$8 sps:$4 sm:$0xff]   ;;  %v1535_v56 = vld [vmem:[%s2127_s0 + $0x190] ss:$8 sps:$4 sm:$0xff]   ;;  %v1536_v57 = vld [vmem:[%s2127_s0 + $0xa4] ss:$8 sps:$4 sm:$0xff]  }
  0x14   :  { %v1538_v58 = vld [vmem:[%s2127_s0 + $0x1a4] ss:$8 sps:$4 sm:$0xff]   ;;  %v1540_v59 = vld [vmem:[%s2127_s0 + $0xa0] ss:$8 sps:$4 sm:$0xff]   ;;  %v1542_v61 = vld [vmem:[%s2127_s0 + $0xb4] ss:$8 sps:$4 sm:$0xff]  }
  0x15   :  { %v1541_v60 = vld [vmem:[%s2127_s0 + $0x1a0] ss:$8 sps:$4 sm:$0xff]   ;;  %v1544_v62 = vld [vmem:[%s2127_s0 + $0x1b4] ss:$8 sps:$4 sm:$0xff]   ;;  %v1546_v63 = vld [vmem:[%s2127_s0 + $0xb0] ss:$8 sps:$4 sm:$0xff]  }
  0x16   :  { %670 = vmatpush1.bf16.msra.mxu0 %v1465_v7  ;;  %1448 = vmatpush1.bf16.msra.mxu1 %v1465_v7  ;;  %v1548_v1 = vld [vmem:[%s2127_s0 + $0xc4] ss:$8 sps:$4 sm:$0xff]   ;;  %v1552_v3 = vld [vmem:[%s2127_s0 + $0xc0] ss:$8 sps:$4 sm:$0xff]   ;;  %v1554_v5 = vld [vmem:[%s2127_s0 + $0xd4] ss:$8 sps:$4 sm:$0xff]  }
  0x17   :  { %671 = vmatprep.subr.bf16.mxu0 %v1572_v0  ;;  %1433 = vmatprep.subr.bf16.mxu1 %v1572_v0  ;;  %v1550_v2 = vld [vmem:[%s2127_s0 + $0x1c4] ss:$8 sps:$4 sm:$0xff]   ;;  %v1553_v4 = vld [vmem:[%s2127_s0 + $0x1c0] ss:$8 sps:$4 sm:$0xff]   ;;  %v1556_v6 = vld [vmem:[%s2127_s0 + $0x1d4] ss:$8 sps:$4 sm:$0xff]  }
  0x18   :  { %v1558_v7 = vld [vmem:[%s2127_s0 + $0xd0] ss:$8 sps:$4 sm:$0xff]  }
  0x19   :  { %v1559_v8 = vld [vmem:[%s2127_s0 + $0x1d0] ss:$8 sps:$4 sm:$0xff]  }
  0x1a   :  { %672 = vmatpush1.bf16.msra.mxu0 %v1466_v9  ;;  %1449 = vmatpush1.bf16.msra.mxu1 %v1466_v9  ;;  %v1560_v9 = vld [vmem:[%s2127_s0 + $0xe4] ss:$8 sps:$4 sm:$0xff]  }
  0x1b   :  { %673 = vmatprep.subr.bf16.mxu0 %v1572_v0  ;;  %1434 = vmatprep.subr.bf16.mxu1 %v1572_v0 }
  0x1e   :  { %674 = vmatpush1.bf16.msra.mxu0 %v1467_v10  ;;  %1450 = vmatpush1.bf16.msra.mxu1 %v1467_v10  ;;  %v1562_v10 = vld [vmem:[%s2127_s0 + $0x1e4] ss:$8 sps:$4 sm:$0xff]  }
  0x1f   :  { %675 = vmatprep.subr.bf16.mxu0 %v1572_v0  ;;  %1435 = vmatprep.subr.bf16.mxu1 %v1572_v0 }
  0x22   :  { %676 = vmatpush2.bf16.msra.mxu0 %v1468_v11  ;;  %1451 = vmatpush2.bf16.msra.mxu1 %v1468_v11  ;;  %v1564_v11 = vld [vmem:[%s2127_s0 + $0xe0] ss:$8 sps:$4 sm:$0xff]  }
  0x23   :  { %677 = vmatprep.subr.bf16.mxu0 %v1572_v0  ;;  %1436 = vmatprep.subr.bf16.mxu1 %v1572_v0 }
  0x26   :  { %678 = vmatpush2.bf16.msra.mxu0 %v1469_v12  ;;  %1452 = vmatpush2.bf16.msra.mxu1 %v1469_v12  ;;  %v1565_v12 = vld [vmem:[%s2127_s0 + $0x1e0] ss:$8 sps:$4 sm:$0xff]  }
  0x27   :  { %679 = vmatprep.subr.bf16.mxu0 %v1572_v0  ;;  %1437 = vmatprep.subr.bf16.mxu1 %v1572_v0 }
  0x2a   :  { %680 = vmatpush2.bf16.msra.mxu0 %v1470_v13  ;;  %1453 = vmatpush2.bf16.msra.mxu1 %v1470_v13  ;;  %v1566_v13 = vld [vmem:[%s2127_s0 + $0xf4] ss:$8 sps:$4 sm:$0xff]  }
  0x2b   :  { %681 = vmatprep.subr.bf16.mxu0 %v1572_v0  ;;  %1438 = vmatprep.subr.bf16.mxu1 %v1572_v0 }
  0x2e   :  { %682 = vmatpush2.bf16.msra.mxu0 %v1471_v14  ;;  %1454 = vmatpush2.bf16.msra.mxu1 %v1471_v14  ;;  %v1568_v14 = vld [vmem:[%s2127_s0 + $0x1f4] ss:$8 sps:$4 sm:$0xff]  }
  0x2f   :  { %683 = vmatprep.subr.bf16.mxu0 %v1572_v0  ;;  %1439 = vmatprep.subr.bf16.mxu1 %v1572_v0 }
  0x32   :  { %684 = vmatpush2.bf16.msra.mxu0 %v1472_v15  ;;  %1455 = vmatpush2.bf16.msra.mxu1 %v1472_v15  ;;  %v1570_v15 = vld [vmem:[%s2127_s0 + $0xf0] ss:$8 sps:$4 sm:$0xff]  }
  0x33   :  { %685 = vmatprep.subr.bf16.mxu0 %v1572_v0  ;;  %1440 = vmatprep.subr.bf16.mxu1 %v1572_v0 }
  0x36   :  { %686 = vmatpush2.bf16.msra.mxu0 %v1473_v16  ;;  %1456 = vmatpush2.bf16.msra.mxu1 %v1473_v16  ;;  %v1571_v16 = vld [vmem:[%s2127_s0 + $0x1f0] ss:$8 sps:$4 sm:$0xff]  }
  0x37   :  { %687 = vmatprep.subr.bf16.mxu0 %v1572_v0  ;;  %1441 = vmatprep.subr.bf16.mxu1 %v1572_v0 }
  0x3a   :  { %688 = vmatpush2.bf16.msra.mxu0 %v1474_v17  ;;  %1457 = vmatpush2.bf16.msra.mxu1 %v1474_v17  ;;  %v1868_v17 = vld [vmem:[%s2128_s2] ss:$0 sm:$0xff] }
  0x3b   :  { %689 = vmatprep.subr.bf16.mxu0 %v1572_v0  ;;  %1442 = vmatprep.subr.bf16.mxu1 %v1572_v0  ;;  %v1547_v0 = vld [vmem:[%s2127_s0 + $0x1b0] ss:$8 sps:$4 sm:$0xff]  }
  0x3e   :  { %690 = vmatpush2.bf16.msra.mxu0 %v1475_v18  ;;  %1458 = vmatpush2.bf16.msra.mxu1 %v1475_v18 }
  0x41   :  { %692 = vmatmul.mubr.bf16.vlgmr.msra.gmra.mxu0 %v1476_v19  ;;  %820 = vmatmul.mubr.bf16.vlgmr.msra.gmra.mxu1 %v1479_v20 }
  0x42   :  { %699 = vmatprep.mubr.bf16.mxu0 %v1482_v21  ;;  %827 = vmatprep.mubr.bf16.mxu1 %v1484_v22 }
  0x49   :  { %700 = vmatmul.mubr.bf16.gmra.mxu0 %v1486_v23  ;;  %828 = vmatmul.mubr.bf16.gmra.mxu1 %v1487_v24 }
  0x4a   :  { %707 = vmatprep.mubr.bf16.mxu0 %v1488_v25  ;;  %835 = vmatprep.mubr.bf16.mxu1 %v1490_v26 }
  0x51   :  { %708 = vmatmul.mubr.bf16.gmra.mxu0 %v1492_v27  ;;  %836 = vmatmul.mubr.bf16.gmra.mxu1 %v1493_v28 }
  0x52   :  { %715 = vmatprep.mubr.bf16.mxu0 %v1494_v29  ;;  %843 = vmatprep.mubr.bf16.mxu1 %v1496_v30 }
  0x59   :  { %716 = vmatmul.mubr.bf16.gmra.mxu0 %v1498_v31  ;;  %844 = vmatmul.mubr.bf16.gmra.mxu1 %v1499_v32 }
  0x5a   :  { %723 = vmatprep.mubr.bf16.mxu0 %v1500_v33  ;;  %851 = vmatprep.mubr.bf16.mxu1 %v1502_v34 }
  0x61   :  { %724 = vmatmul.mubr.bf16.gmra.mxu0 %v1504_v35  ;;  %852 = vmatmul.mubr.bf16.gmra.mxu1 %v1505_v36 }
  0x62   :  { %731 = vmatprep.mubr.bf16.mxu0 %v1506_v37  ;;  %859 = vmatprep.mubr.bf16.mxu1 %v1508_v38 }
  0x69   :  { %732 = vmatmul.mubr.bf16.gmra.mxu0 %v1510_v39  ;;  %860 = vmatmul.mubr.bf16.gmra.mxu1 %v1511_v40 }
  0x6a   :  { %739 = vmatprep.mubr.bf16.mxu0 %v1512_v41  ;;  %867 = vmatprep.mubr.bf16.mxu1 %v1514_v42 }
  0x71   :  { %740 = vmatmul.mubr.bf16.gmra.mxu0 %v1516_v43  ;;  %868 = vmatmul.mubr.bf16.gmra.mxu1 %v1517_v44 }
  0x72   :  { %747 = vmatprep.mubr.bf16.mxu0 %v1518_v45  ;;  %875 = vmatprep.mubr.bf16.mxu1 %v1520_v46 }
  0x79   :  { %748 = vmatmul.mubr.bf16.gmra.mxu0 %v1522_v47  ;;  %876 = vmatmul.mubr.bf16.gmra.mxu1 %v1523_v48 }
  0x7a   :  { %755 = vmatprep.mubr.bf16.mxu0 %v1524_v49  ;;  %883 = vmatprep.mubr.bf16.mxu1 %v1526_v50 }
  0x81   :  { %756 = vmatmul.mubr.bf16.gmra.mxu0 %v1528_v51  ;;  %884 = vmatmul.mubr.bf16.gmra.mxu1 %v1529_v52 }
  0x82   :  { %763 = vmatprep.mubr.bf16.mxu0 %v1530_v53  ;;  %891 = vmatprep.mubr.bf16.mxu1 %v1532_v54 }
  0x89   :  { %764 = vmatmul.mubr.bf16.gmra.mxu0 %v1534_v55  ;;  %892 = vmatmul.mubr.bf16.gmra.mxu1 %v1535_v56 }
  0x8a   :  { %771 = vmatprep.mubr.bf16.mxu0 %v1536_v57  ;;  %899 = vmatprep.mubr.bf16.mxu1 %v1538_v58 }
  0x91   :  { %772 = vmatmul.mubr.bf16.gmra.mxu0 %v1540_v59  ;;  %900 = vmatmul.mubr.bf16.gmra.mxu1 %v1541_v60 }
  0x92   :  { %779 = vmatprep.mubr.bf16.mxu0 %v1542_v61  ;;  %907 = vmatprep.mubr.bf16.mxu1 %v1544_v62 }
  0x99   :  { %780 = vmatmul.mubr.bf16.gmra.mxu0 %v1546_v63  ;;  %908 = vmatmul.mubr.bf16.gmra.mxu1 %v1547_v0 }
  0x9a   :  { %787 = vmatprep.mubr.bf16.mxu0 %v1548_v1  ;;  %915 = vmatprep.mubr.bf16.mxu1 %v1550_v2 }
  0xa1   :  { %788 = vmatmul.mubr.bf16.gmra.mxu0 %v1552_v3  ;;  %916 = vmatmul.mubr.bf16.gmra.mxu1 %v1553_v4 }
  0xa2   :  { %795 = vmatprep.mubr.bf16.mxu0 %v1554_v5  ;;  %923 = vmatprep.mubr.bf16.mxu1 %v1556_v6 }
  0xa9   :  { %796 = vmatmul.mubr.bf16.gmra.mxu0 %v1558_v7  ;;  %924 = vmatmul.mubr.bf16.gmra.mxu1 %v1559_v8 }
  0xaa   :  { %803 = vmatprep.mubr.bf16.mxu0 %v1560_v9  ;;  %931 = vmatprep.mubr.bf16.mxu1 %v1562_v10 }
  0xb1   :  { %804 = vmatmul.mubr.bf16.gmra.mxu0 %v1564_v11  ;;  %932 = vmatmul.mubr.bf16.gmra.mxu1 %v1565_v12 }
  0xb2   :  { %811 = vmatprep.mubr.bf16.mxu0 %v1566_v13  ;;  %939 = vmatprep.mubr.bf16.mxu1 %v1568_v14 }
  0xb9   :  { %812 = vmatmul.mubr.bf16.gmra.mxu0 %v1570_v15  ;;  %940 = vmatmul.mubr.bf16.gmra.mxu1 %v1571_v16 }
 0x101   :  { %v693_v18 = vpop.f32.mrf.mxu0  ;;  %v821_v19 = vpop.f32.mrf.mxu1 }
 0x102   :  { %v1150_v20 = vadd.f32 %v1868_v17, %v693_v18  ;;  %v1182_v21 = vadd.f32 %v1868_v17, %v821_v19 }
 0x103   :  { %v695_v22 = vpop.f32.mrf.mxu0  ;;  %v823_v23 = vpop.f32.mrf.mxu1 }
 0x104   :  { %v1214_v24 = vmax.f32 %v1150_v20, 0.0  ;;  %v1246_v25 = vmax.f32 %v1182_v21, 0.0 }
 0x105   :  { %v696_v26 = vpop.f32.mrf.mxu0  ;;  %v824_v27 = vpop.f32.mrf.mxu1 }
 0x106   :  { %1278 = vst [vmem:[%s2129_s3] sm:$0xff] %v1214_v24  ;;  %1310 = vst [vmem:[%s2129_s3 + $0x100] sm:$0xff] %v1246_v25  ;;  %v1151_v28 = vadd.f32 %v1868_v17, %v696_v26  ;;  %v1183_v29 = vadd.f32 %v1868_v17, %v824_v27 }
 0x107   :  { %v698_v30 = vpop.f32.mrf.mxu0  ;;  %v826_v31 = vpop.f32.mrf.mxu1 }
 0x108   :  { %v1215_v32 = vmax.f32 %v1151_v28, 0.0  ;;  %v1247_v33 = vmax.f32 %v1183_v29, 0.0 }
 0x109   :  { %v701_v34 = vpop.f32.mrf.mxu0  ;;  %v829_v35 = vpop.f32.mrf.mxu1 }
 0x10a   :  { %1279 = vst [vmem:[%s2129_s3 + $0x8] sm:$0xff] %v1215_v32  ;;  %1311 = vst [vmem:[%s2129_s3 + $0x108] sm:$0xff] %v1247_v33  ;;  %v1152_v36 = vadd.f32 %v1868_v17, %v701_v34  ;;  %v1184_v37 = vadd.f32 %v1868_v17, %v829_v35 }
 0x10b   :  { %v703_v38 = vpop.f32.mrf.mxu0  ;;  %v831_v39 = vpop.f32.mrf.mxu1 }
 0x10c   :  { %v1216_v40 = vmax.f32 %v1152_v36, 0.0  ;;  %v1248_v41 = vmax.f32 %v1184_v37, 0.0 }
 0x10d   :  { %v704_v42 = vpop.f32.mrf.mxu0  ;;  %v832_v43 = vpop.f32.mrf.mxu1 }
 0x10e   :  { %1280 = vst [vmem:[%s2129_s3 + $0x10] sm:$0xff] %v1216_v40  ;;  %1312 = vst [vmem:[%s2129_s3 + $0x110] sm:$0xff] %v1248_v41  ;;  %v1153_v44 = vadd.f32 %v1868_v17, %v704_v42  ;;  %v1185_v45 = vadd.f32 %v1868_v17, %v832_v43 }
 0x10f   :  { %v706_v46 = vpop.f32.mrf.mxu0  ;;  %v834_v47 = vpop.f32.mrf.mxu1 }
 0x110   :  { %v1217_v48 = vmax.f32 %v1153_v44, 0.0  ;;  %v1249_v49 = vmax.f32 %v1185_v45, 0.0 }
 0x111   :  { %v709_v50 = vpop.f32.mrf.mxu0  ;;  %v837_v51 = vpop.f32.mrf.mxu1 }
 0x112   :  { %1281 = vst [vmem:[%s2129_s3 + $0x18] sm:$0xff] %v1217_v48  ;;  %1313 = vst [vmem:[%s2129_s3 + $0x118] sm:$0xff] %v1249_v49  ;;  %v1154_v52 = vadd.f32 %v1868_v17, %v709_v50  ;;  %v1186_v53 = vadd.f32 %v1868_v17, %v837_v51 }
 0x113   :  { %v711_v54 = vpop.f32.mrf.mxu0  ;;  %v839_v55 = vpop.f32.mrf.mxu1 }
 0x114   :  { %v1218_v56 = vmax.f32 %v1154_v52, 0.0  ;;  %v1250_v57 = vmax.f32 %v1186_v53, 0.0 }
 0x115   :  { %v712_v58 = vpop.f32.mrf.mxu0  ;;  %v840_v59 = vpop.f32.mrf.mxu1 }
 0x116   :  { %1282 = vst [vmem:[%s2129_s3 + $0x20] sm:$0xff] %v1218_v56  ;;  %1314 = vst [vmem:[%s2129_s3 + $0x120] sm:$0xff] %v1250_v57  ;;  %v1155_v60 = vadd.f32 %v1868_v17, %v712_v58  ;;  %v1187_v61 = vadd.f32 %v1868_v17, %v840_v59 }
 0x117   :  { %v714_v62 = vpop.f32.mrf.mxu0  ;;  %v842_v63 = vpop.f32.mrf.mxu1 }
 0x118   :  { %v1219_v0 = vmax.f32 %v1155_v60, 0.0  ;;  %v1251_v1 = vmax.f32 %v1187_v61, 0.0 }
 0x119   :  { %v717_v2 = vpop.f32.mrf.mxu0  ;;  %v845_v3 = vpop.f32.mrf.mxu1 }
 0x11a   :  { %1283 = vst [vmem:[%s2129_s3 + $0x28] sm:$0xff] %v1219_v0  ;;  %1315 = vst [vmem:[%s2129_s3 + $0x128] sm:$0xff] %v1251_v1  ;;  %v1156_v4 = vadd.f32 %v1868_v17, %v717_v2  ;;  %v1188_v5 = vadd.f32 %v1868_v17, %v845_v3 }
 0x11b   :  { %v719_v6 = vpop.f32.mrf.mxu0  ;;  %v847_v7 = vpop.f32.mrf.mxu1 }
 0x11c   :  { %v1220_v8 = vmax.f32 %v1156_v4, 0.0  ;;  %v1252_v9 = vmax.f32 %v1188_v5, 0.0 }
 0x11d   :  { %v720_v10 = vpop.f32.mrf.mxu0  ;;  %v848_v11 = vpop.f32.mrf.mxu1 }
 0x11e   :  { %1284 = vst [vmem:[%s2129_s3 + $0x30] sm:$0xff] %v1220_v8  ;;  %1316 = vst [vmem:[%s2129_s3 + $0x130] sm:$0xff] %v1252_v9  ;;  %v1157_v12 = vadd.f32 %v1868_v17, %v720_v10  ;;  %v1189_v13 = vadd.f32 %v1868_v17, %v848_v11 }
 0x11f   :  { %v722_v14 = vpop.f32.mrf.mxu0  ;;  %v850_v15 = vpop.f32.mrf.mxu1 }
 0x120   :  { %v1221_v16 = vmax.f32 %v1157_v12, 0.0  ;;  %v1253_v18 = vmax.f32 %v1189_v13, 0.0 }
 0x121   :  { %v725_v19 = vpop.f32.mrf.mxu0  ;;  %v853_v20 = vpop.f32.mrf.mxu1 }
 0x122   :  { %1285 = vst [vmem:[%s2129_s3 + $0x38] sm:$0xff] %v1221_v16  ;;  %1317 = vst [vmem:[%s2129_s3 + $0x138] sm:$0xff] %v1253_v18  ;;  %v1158_v21 = vadd.f32 %v1868_v17, %v725_v19  ;;  %v1190_v22 = vadd.f32 %v1868_v17, %v853_v20 }
 0x123   :  { %v727_v23 = vpop.f32.mrf.mxu0  ;;  %v855_v24 = vpop.f32.mrf.mxu1 }
 0x124   :  { %v1222_v25 = vmax.f32 %v1158_v21, 0.0  ;;  %v1254_v26 = vmax.f32 %v1190_v22, 0.0 }
 0x125   :  { %v728_v27 = vpop.f32.mrf.mxu0  ;;  %v856_v28 = vpop.f32.mrf.mxu1 }
 0x126   :  { %1286 = vst [vmem:[%s2129_s3 + $0x40] sm:$0xff] %v1222_v25  ;;  %1318 = vst [vmem:[%s2129_s3 + $0x140] sm:$0xff] %v1254_v26  ;;  %v1159_v29 = vadd.f32 %v1868_v17, %v728_v27  ;;  %v1191_v30 = vadd.f32 %v1868_v17, %v856_v28 }
 0x127   :  { %v730_v31 = vpop.f32.mrf.mxu0  ;;  %v858_v32 = vpop.f32.mrf.mxu1 }
 0x128   :  { %v1223_v33 = vmax.f32 %v1159_v29, 0.0  ;;  %v1255_v34 = vmax.f32 %v1191_v30, 0.0 }
 0x129   :  { %v733_v35 = vpop.f32.mrf.mxu0  ;;  %v861_v36 = vpop.f32.mrf.mxu1 }
 0x12a   :  { %1287 = vst [vmem:[%s2129_s3 + $0x48] sm:$0xff] %v1223_v33  ;;  %1319 = vst [vmem:[%s2129_s3 + $0x148] sm:$0xff] %v1255_v34  ;;  %v1160_v37 = vadd.f32 %v1868_v17, %v733_v35  ;;  %v1192_v38 = vadd.f32 %v1868_v17, %v861_v36 }
 0x12b   :  { %v735_v39 = vpop.f32.mrf.mxu0  ;;  %v863_v40 = vpop.f32.mrf.mxu1 }
 0x12c   :  { %v1224_v41 = vmax.f32 %v1160_v37, 0.0  ;;  %v1256_v42 = vmax.f32 %v1192_v38, 0.0 }
 0x12d   :  { %v736_v43 = vpop.f32.mrf.mxu0  ;;  %v864_v44 = vpop.f32.mrf.mxu1 }
 0x12e   :  { %1288 = vst [vmem:[%s2129_s3 + $0x50] sm:$0xff] %v1224_v41  ;;  %1320 = vst [vmem:[%s2129_s3 + $0x150] sm:$0xff] %v1256_v42  ;;  %v1161_v45 = vadd.f32 %v1868_v17, %v736_v43  ;;  %v1193_v46 = vadd.f32 %v1868_v17, %v864_v44 }
 0x12f   :  { %v738_v47 = vpop.f32.mrf.mxu0  ;;  %v866_v48 = vpop.f32.mrf.mxu1 }
 0x130   :  { %v1225_v49 = vmax.f32 %v1161_v45, 0.0  ;;  %v1257_v50 = vmax.f32 %v1193_v46, 0.0 }
 0x131   :  { %v741_v51 = vpop.f32.mrf.mxu0  ;;  %v869_v52 = vpop.f32.mrf.mxu1 }
 0x132   :  { %1289 = vst [vmem:[%s2129_s3 + $0x58] sm:$0xff] %v1225_v49  ;;  %1321 = vst [vmem:[%s2129_s3 + $0x158] sm:$0xff] %v1257_v50  ;;  %v1162_v53 = vadd.f32 %v1868_v17, %v741_v51  ;;  %v1194_v54 = vadd.f32 %v1868_v17, %v869_v52 }
 0x133   :  { %v743_v55 = vpop.f32.mrf.mxu0  ;;  %v871_v56 = vpop.f32.mrf.mxu1 }
 0x134   :  { %v1226_v57 = vmax.f32 %v1162_v53, 0.0  ;;  %v1258_v58 = vmax.f32 %v1194_v54, 0.0 }
 0x135   :  { %v744_v59 = vpop.f32.mrf.mxu0  ;;  %v872_v60 = vpop.f32.mrf.mxu1 }
 0x136   :  { %1290 = vst [vmem:[%s2129_s3 + $0x60] sm:$0xff] %v1226_v57  ;;  %1322 = vst [vmem:[%s2129_s3 + $0x160] sm:$0xff] %v1258_v58  ;;  %v1163_v61 = vadd.f32 %v1868_v17, %v744_v59  ;;  %v1195_v62 = vadd.f32 %v1868_v17, %v872_v60 }
 0x137   :  { %v746_v63 = vpop.f32.mrf.mxu0  ;;  %v874_v0 = vpop.f32.mrf.mxu1 }
 0x138   :  { %v1227_v1 = vmax.f32 %v1163_v61, 0.0  ;;  %v1259_v2 = vmax.f32 %v1195_v62, 0.0 }
 0x139   :  { %v749_v3 = vpop.f32.mrf.mxu0  ;;  %v877_v4 = vpop.f32.mrf.mxu1 }
 0x13a   :  { %1291 = vst [vmem:[%s2129_s3 + $0x68] sm:$0xff] %v1227_v1  ;;  %1323 = vst [vmem:[%s2129_s3 + $0x168] sm:$0xff] %v1259_v2  ;;  %v1164_v5 = vadd.f32 %v1868_v17, %v749_v3  ;;  %v1196_v6 = vadd.f32 %v1868_v17, %v877_v4 }
 0x13b   :  { %v751_v7 = vpop.f32.mrf.mxu0  ;;  %v879_v8 = vpop.f32.mrf.mxu1 }
 0x13c   :  { %v1228_v9 = vmax.f32 %v1164_v5, 0.0  ;;  %v1260_v10 = vmax.f32 %v1196_v6, 0.0 }
 0x13d   :  { %v752_v11 = vpop.f32.mrf.mxu0  ;;  %v880_v12 = vpop.f32.mrf.mxu1 }
 0x13e   :  { %1292 = vst [vmem:[%s2129_s3 + $0x70] sm:$0xff] %v1228_v9  ;;  %1324 = vst [vmem:[%s2129_s3 + $0x170] sm:$0xff] %v1260_v10  ;;  %v1165_v13 = vadd.f32 %v1868_v17, %v752_v11  ;;  %v1197_v14 = vadd.f32 %v1868_v17, %v880_v12 }
 0x13f   :  { %v754_v15 = vpop.f32.mrf.mxu0  ;;  %v882_v16 = vpop.f32.mrf.mxu1 }
 0x140   :  { %v1229_v18 = vmax.f32 %v1165_v13, 0.0  ;;  %v1261_v19 = vmax.f32 %v1197_v14, 0.0 }
 0x141   :  { %v757_v20 = vpop.f32.mrf.mxu0  ;;  %v885_v21 = vpop.f32.mrf.mxu1 }
 0x142   :  { %1293 = vst [vmem:[%s2129_s3 + $0x78] sm:$0xff] %v1229_v18  ;;  %1325 = vst [vmem:[%s2129_s3 + $0x178] sm:$0xff] %v1261_v19  ;;  %v1166_v22 = vadd.f32 %v1868_v17, %v757_v20  ;;  %v1198_v23 = vadd.f32 %v1868_v17, %v885_v21 }
 0x143   :  { %v759_v24 = vpop.f32.mrf.mxu0  ;;  %v887_v25 = vpop.f32.mrf.mxu1 }
 0x144   :  { %v1230_v26 = vmax.f32 %v1166_v22, 0.0  ;;  %v1262_v27 = vmax.f32 %v1198_v23, 0.0 }
 0x145   :  { %v760_v28 = vpop.f32.mrf.mxu0  ;;  %v888_v29 = vpop.f32.mrf.mxu1 }
 0x146   :  { %1294 = vst [vmem:[%s2129_s3 + $0x80] sm:$0xff] %v1230_v26  ;;  %1326 = vst [vmem:[%s2129_s3 + $0x180] sm:$0xff] %v1262_v27  ;;  %v1167_v30 = vadd.f32 %v1868_v17, %v760_v28  ;;  %v1199_v31 = vadd.f32 %v1868_v17, %v888_v29 }
 0x147   :  { %v762_v32 = vpop.f32.mrf.mxu0  ;;  %v890_v33 = vpop.f32.mrf.mxu1 }
 0x148   :  { %v1231_v34 = vmax.f32 %v1167_v30, 0.0  ;;  %v1263_v35 = vmax.f32 %v1199_v31, 0.0 }
 0x149   :  { %v765_v36 = vpop.f32.mrf.mxu0  ;;  %v893_v37 = vpop.f32.mrf.mxu1 }
 0x14a   :  { %1295 = vst [vmem:[%s2129_s3 + $0x88] sm:$0xff] %v1231_v34  ;;  %1327 = vst [vmem:[%s2129_s3 + $0x188] sm:$0xff] %v1263_v35  ;;  %v1168_v38 = vadd.f32 %v1868_v17, %v765_v36  ;;  %v1200_v39 = vadd.f32 %v1868_v17, %v893_v37 }
 0x14b   :  { %v767_v40 = vpop.f32.mrf.mxu0  ;;  %v895_v41 = vpop.f32.mrf.mxu1 }
 0x14c   :  { %v1232_v42 = vmax.f32 %v1168_v38, 0.0  ;;  %v1264_v43 = vmax.f32 %v1200_v39, 0.0 }
 0x14d   :  { %v768_v44 = vpop.f32.mrf.mxu0  ;;  %v896_v45 = vpop.f32.mrf.mxu1 }
 0x14e   :  { %1296 = vst [vmem:[%s2129_s3 + $0x90] sm:$0xff] %v1232_v42  ;;  %1328 = vst [vmem:[%s2129_s3 + $0x190] sm:$0xff] %v1264_v43  ;;  %v1169_v46 = vadd.f32 %v1868_v17, %v768_v44  ;;  %v1201_v47 = vadd.f32 %v1868_v17, %v896_v45 }
 0x14f   :  { %v770_v48 = vpop.f32.mrf.mxu0  ;;  %v898_v49 = vpop.f32.mrf.mxu1 }
 0x150   :  { %v1233_v50 = vmax.f32 %v1169_v46, 0.0  ;;  %v1265_v51 = vmax.f32 %v1201_v47, 0.0 }
 0x151   :  { %v773_v52 = vpop.f32.mrf.mxu0  ;;  %v901_v53 = vpop.f32.mrf.mxu1 }
 0x152   :  { %1297 = vst [vmem:[%s2129_s3 + $0x98] sm:$0xff] %v1233_v50  ;;  %1329 = vst [vmem:[%s2129_s3 + $0x198] sm:$0xff] %v1265_v51  ;;  %v1170_v54 = vadd.f32 %v1868_v17, %v773_v52  ;;  %v1202_v55 = vadd.f32 %v1868_v17, %v901_v53 }
 0x153   :  { %v775_v56 = vpop.f32.mrf.mxu0  ;;  %v903_v57 = vpop.f32.mrf.mxu1 }
 0x154   :  { %v1234_v58 = vmax.f32 %v1170_v54, 0.0  ;;  %v1266_v59 = vmax.f32 %v1202_v55, 0.0 }
 0x155   :  { %v776_v60 = vpop.f32.mrf.mxu0  ;;  %v904_v61 = vpop.f32.mrf.mxu1 }
 0x156   :  { %1298 = vst [vmem:[%s2129_s3 + $0xa0] sm:$0xff] %v1234_v58  ;;  %1330 = vst [vmem:[%s2129_s3 + $0x1a0] sm:$0xff] %v1266_v59  ;;  %v1171_v62 = vadd.f32 %v1868_v17, %v776_v60  ;;  %v1203_v63 = vadd.f32 %v1868_v17, %v904_v61 }
 0x157   :  { %v778_v0 = vpop.f32.mrf.mxu0  ;;  %v906_v1 = vpop.f32.mrf.mxu1 }
 0x158   :  { %v1235_v2 = vmax.f32 %v1171_v62, 0.0  ;;  %v1267_v3 = vmax.f32 %v1203_v63, 0.0 }
 0x159   :  { %v781_v4 = vpop.f32.mrf.mxu0  ;;  %v909_v5 = vpop.f32.mrf.mxu1 }
 0x15a   :  { %1299 = vst [vmem:[%s2129_s3 + $0xa8] sm:$0xff] %v1235_v2  ;;  %1331 = vst [vmem:[%s2129_s3 + $0x1a8] sm:$0xff] %v1267_v3  ;;  %v1172_v6 = vadd.f32 %v1868_v17, %v781_v4  ;;  %v1204_v7 = vadd.f32 %v1868_v17, %v909_v5 }
 0x15b   :  { %v783_v8 = vpop.f32.mrf.mxu0  ;;  %v911_v9 = vpop.f32.mrf.mxu1 }
 0x15c   :  { %v1236_v10 = vmax.f32 %v1172_v6, 0.0  ;;  %v1268_v11 = vmax.f32 %v1204_v7, 0.0 }
 0x15d   :  { %v784_v12 = vpop.f32.mrf.mxu0  ;;  %v912_v13 = vpop.f32.mrf.mxu1 }
 0x15e   :  { %1300 = vst [vmem:[%s2129_s3 + $0xb0] sm:$0xff] %v1236_v10  ;;  %1332 = vst [vmem:[%s2129_s3 + $0x1b0] sm:$0xff] %v1268_v11  ;;  %v1173_v14 = vadd.f32 %v1868_v17, %v784_v12  ;;  %v1205_v15 = vadd.f32 %v1868_v17, %v912_v13 }
 0x15f   :  { %v786_v16 = vpop.f32.mrf.mxu0  ;;  %v914_v18 = vpop.f32.mrf.mxu1 }
 0x160   :  { %v1237_v19 = vmax.f32 %v1173_v14, 0.0  ;;  %v1269_v20 = vmax.f32 %v1205_v15, 0.0 }
 0x161   :  { %v789_v21 = vpop.f32.mrf.mxu0  ;;  %v917_v22 = vpop.f32.mrf.mxu1 }
 0x162   :  { %1301 = vst [vmem:[%s2129_s3 + $0xb8] sm:$0xff] %v1237_v19  ;;  %1333 = vst [vmem:[%s2129_s3 + $0x1b8] sm:$0xff] %v1269_v20  ;;  %v1174_v23 = vadd.f32 %v1868_v17, %v789_v21  ;;  %v1206_v24 = vadd.f32 %v1868_v17, %v917_v22 }
 0x163   :  { %v791_v25 = vpop.f32.mrf.mxu0  ;;  %v919_v26 = vpop.f32.mrf.mxu1 }
 0x164   :  { %v1238_v27 = vmax.f32 %v1174_v23, 0.0  ;;  %v1270_v28 = vmax.f32 %v1206_v24, 0.0 }
 0x165   :  { %v792_v29 = vpop.f32.mrf.mxu0  ;;  %v920_v30 = vpop.f32.mrf.mxu1 }
 0x166   :  { %1302 = vst [vmem:[%s2129_s3 + $0xc0] sm:$0xff] %v1238_v27  ;;  %1334 = vst [vmem:[%s2129_s3 + $0x1c0] sm:$0xff] %v1270_v28  ;;  %v1175_v31 = vadd.f32 %v1868_v17, %v792_v29  ;;  %v1207_v32 = vadd.f32 %v1868_v17, %v920_v30 }
 0x167   :  { %v794_v33 = vpop.f32.mrf.mxu0  ;;  %v922_v34 = vpop.f32.mrf.mxu1 }
 0x168   :  { %v1239_v35 = vmax.f32 %v1175_v31, 0.0  ;;  %v1271_v36 = vmax.f32 %v1207_v32, 0.0 }
 0x169   :  { %v797_v37 = vpop.f32.mrf.mxu0  ;;  %v925_v38 = vpop.f32.mrf.mxu1 }
 0x16a   :  { %1303 = vst [vmem:[%s2129_s3 + $0xc8] sm:$0xff] %v1239_v35  ;;  %1335 = vst [vmem:[%s2129_s3 + $0x1c8] sm:$0xff] %v1271_v36  ;;  %v1176_v39 = vadd.f32 %v1868_v17, %v797_v37  ;;  %v1208_v40 = vadd.f32 %v1868_v17, %v925_v38 }
 0x16b   :  { %v799_v41 = vpop.f32.mrf.mxu0  ;;  %v927_v42 = vpop.f32.mrf.mxu1 }
 0x16c   :  { %v1240_v43 = vmax.f32 %v1176_v39, 0.0  ;;  %v1272_v44 = vmax.f32 %v1208_v40, 0.0 }
 0x16d   :  { %v800_v45 = vpop.f32.mrf.mxu0  ;;  %v928_v46 = vpop.f32.mrf.mxu1 }
 0x16e   :  { %1304 = vst [vmem:[%s2129_s3 + $0xd0] sm:$0xff] %v1240_v43  ;;  %1336 = vst [vmem:[%s2129_s3 + $0x1d0] sm:$0xff] %v1272_v44  ;;  %v1177_v47 = vadd.f32 %v1868_v17, %v800_v45  ;;  %v1209_v48 = vadd.f32 %v1868_v17, %v928_v46 }
 0x16f   :  { %v802_v49 = vpop.f32.mrf.mxu0  ;;  %v930_v50 = vpop.f32.mrf.mxu1 }
 0x170   :  { %v1241_v51 = vmax.f32 %v1177_v47, 0.0  ;;  %v1273_v52 = vmax.f32 %v1209_v48, 0.0 }
 0x171   :  { %v805_v53 = vpop.f32.mrf.mxu0  ;;  %v933_v54 = vpop.f32.mrf.mxu1 }
 0x172   :  { %1305 = vst [vmem:[%s2129_s3 + $0xd8] sm:$0xff] %v1241_v51  ;;  %1337 = vst [vmem:[%s2129_s3 + $0x1d8] sm:$0xff] %v1273_v52  ;;  %v1178_v55 = vadd.f32 %v1868_v17, %v805_v53  ;;  %v1210_v56 = vadd.f32 %v1868_v17, %v933_v54 }
 0x173   :  { %v807_v57 = vpop.f32.mrf.mxu0  ;;  %v935_v58 = vpop.f32.mrf.mxu1 }
 0x174   :  { %v1242_v59 = vmax.f32 %v1178_v55, 0.0  ;;  %v1274_v60 = vmax.f32 %v1210_v56, 0.0 }
 0x175   :  { %v808_v61 = vpop.f32.mrf.mxu0  ;;  %v936_v62 = vpop.f32.mrf.mxu1 }
 0x176   :  { %1306 = vst [vmem:[%s2129_s3 + $0xe0] sm:$0xff] %v1242_v59  ;;  %1338 = vst [vmem:[%s2129_s3 + $0x1e0] sm:$0xff] %v1274_v60  ;;  %v1179_v63 = vadd.f32 %v1868_v17, %v808_v61  ;;  %v1211_v0 = vadd.f32 %v1868_v17, %v936_v62 }
 0x177   :  { %v810_v1 = vpop.f32.mrf.mxu0  ;;  %v938_v2 = vpop.f32.mrf.mxu1 }
 0x178   :  { %v1243_v3 = vmax.f32 %v1179_v63, 0.0  ;;  %v1275_v4 = vmax.f32 %v1211_v0, 0.0 }
 0x179   :  { %v813_v5 = vpop.f32.mrf.mxu0  ;;  %v941_v6 = vpop.f32.mrf.mxu1 }
 0x17a   :  { %1307 = vst [vmem:[%s2129_s3 + $0xe8] sm:$0xff] %v1243_v3  ;;  %1339 = vst [vmem:[%s2129_s3 + $0x1e8] sm:$0xff] %v1275_v4  ;;  %v1180_v7 = vadd.f32 %v1868_v17, %v813_v5  ;;  %v1212_v8 = vadd.f32 %v1868_v17, %v941_v6 }
 0x17b   :  { %v815_v9 = vpop.f32.mrf.mxu0  ;;  %v943_v10 = vpop.f32.mrf.mxu1 }
 0x17c   :  { %v1244_v11 = vmax.f32 %v1180_v7, 0.0  ;;  %v1276_v12 = vmax.f32 %v1212_v8, 0.0 }
 0x17d   :  { %v816_v13 = vpop.f32.mrf.mxu0  ;;  %v944_v14 = vpop.f32.mrf.mxu1 }
 0x17e   :  { %1308 = vst [vmem:[%s2129_s3 + $0xf0] sm:$0xff] %v1244_v11  ;;  %1340 = vst [vmem:[%s2129_s3 + $0x1f0] sm:$0xff] %v1276_v12  ;;  %v1181_v15 = vadd.f32 %v1868_v17, %v816_v13  ;;  %v1213_v16 = vadd.f32 %v1868_v17, %v944_v14 }
 0x17f   :  { %v818_v18 = vpop.f32.mrf.mxu0  ;;  %v946_v19 = vpop.f32.mrf.mxu1 }
 0x180   :  { %v1245_v20 = vmax.f32 %v1181_v15, 0.0  ;;  %v1277_v21 = vmax.f32 %v1213_v16, 0.0 }
 0x182   :  { %1309 = vst [vmem:[%s2129_s3 + $0xf8] sm:$0xff] %v1245_v20  ;;  %1341 = vst [vmem:[%s2129_s3 + $0x1f8] sm:$0xff] %v1277_v21 }

// kernel: bottleneck_pallas.4
= control target key start
LH: loop header
LB: loop body
LE: loop exit
PB: predicated region body
PF: predicated region fallthrough
CT: control target
= control target key end

     0   :  { %s4035_s12 = smov 0   ;;  %s4037_s13 = smov 0   ;;  %s4832_s0 = inlined_call_operand.vmem [shape: bf16[2,4,144,128], index: 0, kind: input, shape index: {}]   ;;  %s4833_s1 = inlined_call_operand.vmem [shape: bf16[9,128,128], index: 1, kind: input, shape index: {}]   ;;  %s4834_s2 = inlined_call_operand.vmem [shape: f32[1,128], index: 2, kind: input, shape index: {}]   ;;  %s4835_s3 = inlined_call_operand.vmem [shape: bf16[2,128,128], index: 3, kind: output, shape index: {}]  }
   0x1   :  { %s4039_s14 = smov 0  }
   0x2 LB: > { %s39_s15 = sadd.s32 1, %s4009_s13  ;;  %p2982_p0 = scmp.ge.s32.totalorder %s4013_s14, 1  ;;  %s4013_s14 = sphi %s4039_s14, %s13_s14   ;;  %s4009_s13 = sphi %s4037_s13, %s4857_s13   ;;  %s4005_s12 = sphi %s4035_s12, %s4856_s12  }
   0x3   : > { %p41_p1 = scmp.ge.s32.totalorder %s39_s15, 2  ;;  %p196_p2 = scmp.lt.s32.totalorder %s4013_s14, 3 }
   0x5   : > { %s4859_s15 = smov (%p41_p1, %s39_s15), 0  ;;  %p197_p3 = pnand %p2982_p0, %p196_p2 }
   0x7   : > { %200 = sbr.rel (%p197_p3) target bundleno = 400 (0x190), region = 32 }
   0xc   : > { %v3871_v0 = vld [vmem:[%s4833_s1 + $0x38] sm:$0xff]   ;;  %p241_p4 = scmp.lt.s32.totalorder %s4005_s12, 1  ;;  %v3873_v2 = vld [vmem:[%s4833_s1 + $0x30] sm:$0xff]   ;;  %v3875_v4 = vld [vmem:[%s4833_s1 + $0x28] sm:$0xff]  }
   0xd   : > { %v3872_v1 = vld [vmem:[%s4833_s1 + $0x78] sm:$0xff]   ;;  %3542 = vmatprep.subr.bf16.mxu0 %v3871_v0  ;;  %v3874_v3 = vld [vmem:[%s4833_s1 + $0x70] sm:$0xff]   ;;  %v3876_v5 = vld [vmem:[%s4833_s1 + $0x68] sm:$0xff]  }
   0xe   : > { %3574 = vmatprep.subr.bf16.mxu1 %v3872_v1  ;;  %3543 = vmatpush3.bf16.msra.mxu0 %v3871_v0  ;;  %s4861_s12 = smov (!%p241_p4, %s4005_s12), 1  ;;  %v3877_v6 = vld [vmem:[%s4833_s1 + $0x20] sm:$0xff]   ;;  %v3879_v8 = vld [vmem:[%s4833_s1 + $0x18] sm:$0xff]   ;;  %v3881_v10 = vld [vmem:[%s4833_s1 + $0x10] sm:$0xff]  }
   0xf   : > { %3575 = vmatpush3.bf16.msra.mxu1 %v3872_v1  ;;  %3544 = vmatprep.subr.bf16.mxu0 %v3873_v2  ;;  %v3878_v7 = vld [vmem:[%s4833_s1 + $0x60] sm:$0xff]   ;;  %s3846_s5 = smul.u32 288, %s4861_s12  ;;  %v3880_v9 = vld [vmem:[%s4833_s1 + $0x58] sm:$0xff]   ;;  %v3882_v11 = vld [vmem:[%s4833_s1 + $0x50] sm:$0xff]  }
  0x10   : > { %3576 = vmatprep.subr.bf16.mxu1 %v3874_v3  ;;  %v3883_v14 = vld [vmem:[%s4833_s1 + $0x8] sm:$0xff]   ;;  %v3885_v16 = vld [vmem:[%s4833_s1] sm:$0xff]   ;;  %v3891_v19 = vld [vmem:[%s4833_s1 + $0xb8] sm:$0xff]  }
  0x11   : > { %s4089_s16 = scalar_lea.vmem %s4832_s0, %s3846_s5  ;;  %v3884_v15 = vld [vmem:[%s4833_s1 + $0x48] sm:$0xff]   ;;  %v3886_v17 = vld [vmem:[%s4833_s1 + $0x40] sm:$0xff]   ;;  %v3892_v20 = vld [vmem:[%s4833_s1 + $0xf8] sm:$0xff]   ;;  %s3334_s5 = sshll.u32 %s4861_s12, 6 }
  0x12   : > { %3545 = vmatpush3.bf16.msra.mxu0 %v3873_v2  ;;  %v4098_v12 = vld [vmem:[%s4089_s16] sm:$0xff]   ;;  %v3888_v13 = vld [vmem:[%s4089_s16 + $0x48] sm:$0xff]   ;;  %v3890_v21 = vld [vmem:[%s4089_s16 + $0x50] sm:$0xff]   ;;  %s4769_s7 = scalar_lea.vmem %s4835_s3, %s3334_s5 }
  0x13   : > { %3577 = vmatpush3.bf16.msra.mxu1 %v3874_v3  ;;  %3546 = vmatprep.subr.bf16.mxu0 %v3875_v4  ;;  %v4115_v18 = vld [vmem:[%s4089_s16 + $0x8] sm:$0xff]   ;;  %v3893_v22 = vld [vmem:[%s4833_s1 + $0xb0] sm:$0xff]   ;;  %v3896_v25 = vld [vmem:[%s4089_s16 + $0x58] sm:$0xff]  }
  0x14   : > { %3578 = vmatprep.subr.bf16.mxu1 %v3876_v5  ;;  %3558 = vmatprep.mubr.bf16.mxu0 %v4098_v12  ;;  %v3894_v23 = vld [vmem:[%s4833_s1 + $0xf0] sm:$0xff]   ;;  %v4136_v26 = vld [vmem:[%s4089_s16 + $0x18] sm:$0xff]   ;;  %v3899_v27 = vld [vmem:[%s4833_s1 + $0xa8] sm:$0xff]  }
  0x15   : > { %3590 = vmatprep.mubr.bf16.mxu1 %v3888_v13  ;;  %v4131_v24 = vld [vmem:[%s4089_s16 + $0x10] sm:$0xff]   ;;  %v3900_v28 = vld [vmem:[%s4833_s1 + $0xe8] sm:$0xff]   ;;  %v3898_v29 = vld [vmem:[%s4089_s16 + $0x60] sm:$0xff]  }
  0x16   : > { %3547 = vmatpush3.bf16.msra.mxu0 %v3875_v4  ;;  %v3901_v30 = vld [vmem:[%s4833_s1 + $0xa0] sm:$0xff]   ;;  %v3904_v33 = vld [vmem:[%s4089_s16 + $0x68] sm:$0xff]   ;;  %v3907_v35 = vld [vmem:[%s4833_s1 + $0x98] sm:$0xff]  }
  0x17   : > { %3579 = vmatpush3.bf16.msra.mxu1 %v3876_v5  ;;  %3548 = vmatprep.subr.bf16.mxu0 %v3877_v6  ;;  %v3902_v31 = vld [vmem:[%s4833_s1 + $0xe0] sm:$0xff]   ;;  %v4158_v34 = vld [vmem:[%s4089_s16 + $0x28] sm:$0xff]   ;;  %v3908_v36 = vld [vmem:[%s4833_s1 + $0xd8] sm:$0xff]  }
  0x18   : > { %3580 = vmatprep.subr.bf16.mxu1 %v3878_v7  ;;  %v4153_v32 = vld [vmem:[%s4089_s16 + $0x20] sm:$0xff]   ;;  %v3906_v37 = vld [vmem:[%s4089_s16 + $0x70] sm:$0xff]   ;;  %v3912_v41 = vld [vmem:[%s4089_s16 + $0x78] sm:$0xff]  }
  0x19   : > { %v3909_v38 = vld [vmem:[%s4833_s1 + $0x90] sm:$0xff]   ;;  %v3915_v42 = vld [vmem:[%s4833_s1 + $0x88] sm:$0xff]   ;;  %v4187_v44 = vld [vmem:[%s4089_s16 + $0x38] sm:$0xff]  }
  0x1a   : > { %3549 = vmatpush3.bf16.msra.mxu0 %v3877_v6  ;;  %v3910_v39 = vld [vmem:[%s4833_s1 + $0xd0] sm:$0xff]   ;;  %v3916_v43 = vld [vmem:[%s4833_s1 + $0xc8] sm:$0xff]   ;;  %v3914_v45 = vld [vmem:[%s4089_s16 + $0x80] sm:$0xff]  }
  0x1b   : > { %3581 = vmatpush3.bf16.msra.mxu1 %v3878_v7  ;;  %3550 = vmatprep.subr.bf16.mxu0 %v3879_v8  ;;  %v4175_v40 = vld [vmem:[%s4089_s16 + $0x30] sm:$0xff]   ;;  %v3917_v46 = vld [vmem:[%s4833_s1 + $0x80] sm:$0xff]   ;;  %v3921_v49 = vld [vmem:[%s4833_s1 + $0x138] sm:$0xff]  }
  0x1c   : > { %3582 = vmatprep.subr.bf16.mxu1 %v3880_v9  ;;  %v3918_v47 = vld [vmem:[%s4833_s1 + $0xc0] sm:$0xff]   ;;  %v4198_v48 = vld [vmem:[%s4089_s16 + $0x90] sm:$0xff]   ;;  %v3922_v50 = vld [vmem:[%s4833_s1 + $0x178] sm:$0xff]  }
  0x1d   : > { %v4209_v51 = vld [vmem:[%s4089_s16 + $0x98] sm:$0xff]   ;;  %v3923_v52 = vld [vmem:[%s4833_s1 + $0x130] sm:$0xff]   ;;  %v4219_v54 = vld [vmem:[%s4089_s16 + $0xa0] sm:$0xff]  }
  0x1e   : > { %3551 = vmatpush3.bf16.msra.mxu0 %v3879_v8  ;;  %v3924_v53 = vld [vmem:[%s4833_s1 + $0x170] sm:$0xff]   ;;  %v3927_v55 = vld [vmem:[%s4833_s1 + $0x128] sm:$0xff]   ;;  %v3929_v58 = vld [vmem:[%s4833_s1 + $0x120] sm:$0xff]  }
  0x1f   : > { %3583 = vmatpush3.bf16.msra.mxu1 %v3880_v9  ;;  %3552 = vmatprep.subr.bf16.mxu0 %v3881_v10  ;;  %v3928_v56 = vld [vmem:[%s4833_s1 + $0x168] sm:$0xff]   ;;  %v3930_v59 = vld [vmem:[%s4833_s1 + $0x160] sm:$0xff]   ;;  %v4241_v60 = vld [vmem:[%s4089_s16 + $0xb0] sm:$0xff]  }
  0x20   : > { %3584 = vmatprep.subr.bf16.mxu1 %v3882_v11  ;;  %v4231_v57 = vld [vmem:[%s4089_s16 + $0xa8] sm:$0xff]   ;;  %v3933_v61 = vld [vmem:[%s4833_s1 + $0x118] sm:$0xff]   ;;  %v3935_v0 = vld [vmem:[%s4833_s1 + $0x110] sm:$0xff]  }
  0x21   : > { %v3934_v62 = vld [vmem:[%s4833_s1 + $0x158] sm:$0xff]   ;;  %v3936_v1 = vld [vmem:[%s4833_s1 + $0x150] sm:$0xff]   ;;  %v4263_v2 = vld [vmem:[%s4089_s16 + $0xc0] sm:$0xff]  }
  0x22   : > { %3553 = vmatpush3.bf16.msra.mxu0 %v3881_v10  ;;  %v4253_v63 = vld [vmem:[%s4089_s16 + $0xb8] sm:$0xff]   ;;  %v3939_v3 = vld [vmem:[%s4833_s1 + $0x108] sm:$0xff]   ;;  %v3941_v6 = vld [vmem:[%s4833_s1 + $0x100] sm:$0xff]  }
  0x23   : > { %3585 = vmatpush3.bf16.msra.mxu1 %v3882_v11  ;;  %3554 = vmatprep.subr.bf16.mxu0 %v3883_v14  ;;  %v3940_v4 = vld [vmem:[%s4833_s1 + $0x148] sm:$0xff]   ;;  %v3942_v7 = vld [vmem:[%s4833_s1 + $0x140] sm:$0xff]   ;;  %v3943_v8 = vld [vmem:[%s4089_s16 + $0xd8] sm:$0xff]  }
  0x24   : > { %3586 = vmatprep.subr.bf16.mxu1 %v3884_v15  ;;  %v4275_v5 = vld [vmem:[%s4089_s16 + $0xc8] sm:$0xff]   ;;  %v3945_v9 = vld [vmem:[%s4833_s1 + $0x1b8] sm:$0xff]   ;;  %v3944_v11 = vld [vmem:[%s4089_s16 + $0xe0] sm:$0xff]  }
  0x25   : > { %v3946_v10 = vld [vmem:[%s4833_s1 + $0x1f8] sm:$0xff]   ;;  %v3948_v13 = vld [vmem:[%s4833_s1 + $0x1f0] sm:$0xff]  }
  0x26   : > { %3555 = vmatpush3.bf16.msra.mxu0 %v3883_v14  ;;  %v3949_v14 = vld [vmem:[%s4089_s16 + $0xe8] sm:$0xff]  }
  0x27   : > { %3587 = vmatpush3.bf16.msra.mxu1 %v3884_v15  ;;  %3556 = vmatprep.subr.bf16.mxu0 %v3885_v16  ;;  %v3951_v15 = vld [vmem:[%s4833_s1 + $0x1a8] sm:$0xff]  }
  0x28   : > { %3588 = vmatprep.subr.bf16.mxu1 %v3886_v17 }
  0x2a   : > { %3557 = vmatpush3.bf16.msra.mxu0 %v3885_v16  ;;  %v3952_v16 = vld [vmem:[%s4833_s1 + $0x1e8] sm:$0xff]  }
  0x2b   : > { %3589 = vmatpush3.bf16.msra.mxu1 %v3886_v17  ;;  %3606 = vmatprep.subr.bf16.mxu0 %v3891_v19  ;;  %v3950_v17 = vld [vmem:[%s4089_s16 + $0xf0] sm:$0xff]  }
  0x2c   : > { %3638 = vmatprep.subr.bf16.mxu1 %v3892_v20 }
  0x2d   : > { %3559 = vmatmul.mubr.bf16.vlgmr.msra.gmra.mxu0 %v4115_v18 }
  0x2e   : > { %3591 = vmatmul.mubr.bf16.vlgmr.msra.gmra.mxu1 %v3890_v21  ;;  %3607 = vmatpush3.bf16.msra.mxu0 %v3891_v19  ;;  %v3954_v19 = vld [vmem:[%s4833_s1 + $0x1e0] sm:$0xff]   ;;  %v3957_v21 = vld [vmem:[%s4833_s1 + $0x198] sm:$0xff]  }
  0x2f   : > { %3639 = vmatpush3.bf16.msra.mxu1 %v3892_v20  ;;  %3608 = vmatprep.subr.bf16.mxu0 %v3893_v22  ;;  %v3955_v20 = vld [vmem:[%s4089_s16 + $0xf8] sm:$0xff]  }
  0x30   : > { %3640 = vmatprep.subr.bf16.mxu1 %v3894_v23  ;;  %3562 = vmatprep.mubr.bf16.mxu0 %v4131_v24 }
  0x31   : > { %3594 = vmatprep.mubr.bf16.mxu1 %v3896_v25  ;;  %v3960_v25 = vld [vmem:[%s4833_s1 + $0x1d0] sm:$0xff]  }
  0x32   : > { %3609 = vmatpush3.bf16.msra.mxu0 %v3893_v22  ;;  %v3958_v22 = vld [vmem:[%s4833_s1 + $0x1d8] sm:$0xff]  }
  0x33   : > { %3641 = vmatpush3.bf16.msra.mxu1 %v3894_v23  ;;  %3610 = vmatprep.subr.bf16.mxu0 %v3899_v27  ;;  %v3956_v23 = vld [vmem:[%s4089_s16 + $0x100] sm:$0xff]  }
  0x34   : > { %3642 = vmatprep.subr.bf16.mxu1 %v3900_v28 }
  0x35   : > { %3563 = vmatmul.mubr.bf16.gmra.mxu0 %v4136_v26 }
  0x36   : > { %3595 = vmatmul.mubr.bf16.gmra.mxu1 %v3898_v29  ;;  %3611 = vmatpush3.bf16.msra.mxu0 %v3899_v27  ;;  %v3963_v27 = vld [vmem:[%s4833_s1 + $0x188] sm:$0xff]   ;;  %v3962_v29 = vld [vmem:[%s4089_s16 + $0x110] sm:$0xff]  }
  0x37   : > { %3643 = vmatpush3.bf16.msra.mxu1 %v3900_v28  ;;  %3612 = vmatprep.subr.bf16.mxu0 %v3901_v30  ;;  %v3964_v28 = vld [vmem:[%s4833_s1 + $0x1c8] sm:$0xff]  }
  0x38   : > { %3644 = vmatprep.subr.bf16.mxu1 %v3902_v31  ;;  %3566 = vmatprep.mubr.bf16.mxu0 %v4153_v32 }
  0x39   : > { %3598 = vmatprep.mubr.bf16.mxu1 %v3904_v33  ;;  %v3968_v33 = vld [vmem:[%s4089_s16 + $0x50] sm:$0xff]  }
  0x3a   : > { %3613 = vmatpush3.bf16.msra.mxu0 %v3901_v30  ;;  %v3965_v30 = vld [vmem:[%s4833_s1 + $0x180] sm:$0xff]  }
  0x3b   : > { %3645 = vmatpush3.bf16.msra.mxu1 %v3902_v31  ;;  %3614 = vmatprep.subr.bf16.mxu0 %v3907_v35  ;;  %v3966_v31 = vld [vmem:[%s4833_s1 + $0x1c0] sm:$0xff]  }
  0x3c   : > { %3646 = vmatprep.subr.bf16.mxu1 %v3908_v36 }
  0x3d   : > { %3567 = vmatmul.mubr.bf16.gmra.mxu0 %v4158_v34 }
  0x3e   : > { %3599 = vmatmul.mubr.bf16.gmra.mxu1 %v3906_v37  ;;  %3615 = vmatpush3.bf16.msra.mxu0 %v3907_v35  ;;  %v4358_v35 = vld [vmem:[%s4089_s16 + $0x10] sm:$0xff]  }
  0x3f   : > { %3647 = vmatpush3.bf16.msra.mxu1 %v3908_v36  ;;  %3616 = vmatprep.subr.bf16.mxu0 %v3909_v38  ;;  %v3970_v36 = vld [vmem:[%s4089_s16 + $0x58] sm:$0xff]   ;;  %v3972_v37 = vld [vmem:[%s4833_s1 + $0x230] sm:$0xff]  }
  0x40   : > { %3648 = vmatprep.subr.bf16.mxu1 %v3910_v39  ;;  %3570 = vmatprep.mubr.bf16.mxu0 %v4175_v40 }
  0x41   : > { %3602 = vmatprep.mubr.bf16.mxu1 %v3912_v41  ;;  %v3975_v41 = vld [vmem:[%s4089_s16 + $0x20] sm:$0xff]  }
  0x42   : > { %3617 = vmatpush3.bf16.msra.mxu0 %v3909_v38  ;;  %v4365_v38 = vld [vmem:[%s4089_s16 + $0x18] sm:$0xff]  }
  0x43   : > { %3649 = vmatpush3.bf16.msra.mxu1 %v3910_v39  ;;  %3618 = vmatprep.subr.bf16.mxu0 %v3915_v42  ;;  %v3974_v39 = vld [vmem:[%s4089_s16 + $0x60] sm:$0xff]  }
  0x44   : > { %3650 = vmatprep.subr.bf16.mxu1 %v3916_v43 }
  0x45   : > { %3571 = vmatmul.mubr.bf16.gmra.mxu0 %v4187_v44 }
  0x46   : > { %3603 = vmatmul.mubr.bf16.gmra.mxu1 %v3914_v45  ;;  %3619 = vmatpush3.bf16.msra.mxu0 %v3915_v42  ;;  %v3976_v42 = vld [vmem:[%s4089_s16 + $0x68] sm:$0xff]   ;;  %v3980_v45 = vld [vmem:[%s4089_s16 + $0x70] sm:$0xff]  }
  0x47   : > { %3651 = vmatpush3.bf16.msra.mxu1 %v3916_v43  ;;  %3620 = vmatprep.subr.bf16.mxu0 %v3917_v46  ;;  %v3978_v43 = vld [vmem:[%s4833_s1 + $0x220] sm:$0xff]  }
  0x48   : > { %3652 = vmatprep.subr.bf16.mxu1 %v3918_v47  ;;  %3622 = vmatprep.mubr.bf16.mxu0 %v4098_v12  ;;  %v3947_v12 = vld [vmem:[%s4833_s1 + $0x1b0] sm:$0xff]  }
  0x49   : > { %3654 = vmatprep.mubr.bf16.mxu1 %v4198_v48 }
  0x4a   : > { %3621 = vmatpush3.bf16.msra.mxu0 %v3917_v46  ;;  %v3983_v46 = vld [vmem:[%s4833_s1 + $0x218] sm:$0xff]  }
  0x4b   : > { %3653 = vmatpush3.bf16.msra.mxu1 %v3918_v47  ;;  %3670 = vmatprep.subr.bf16.mxu0 %v3921_v49  ;;  %v3981_v47 = vld [vmem:[%s4089_s16 + $0x30] sm:$0xff]  }
  0x4c   : > { %3702 = vmatprep.subr.bf16.mxu1 %v3922_v50 }
  0x4d   : > { %3623 = vmatmul.mubr.bf16.vlgmr.msra.gmra.mxu0 %v4115_v18  ;;  %v3953_v18 = vld [vmem:[%s4833_s1 + $0x1a0] sm:$0xff]  }
  0x4e   : > { %3655 = vmatmul.mubr.bf16.vlgmr.msra.gmra.mxu1 %v4209_v51  ;;  %3671 = vmatpush3.bf16.msra.mxu0 %v3921_v49  ;;  %v3984_v49 = vld [vmem:[%s4833_s1 + $0x210] sm:$0xff]  }
  0x4f   : > { %3703 = vmatpush3.bf16.msra.mxu1 %v3922_v50  ;;  %3672 = vmatprep.subr.bf16.mxu0 %v3923_v52  ;;  %v3985_v50 = vld [vmem:[%s4089_s16 + $0x38] sm:$0xff]  }
  0x50   : > { %3704 = vmatprep.subr.bf16.mxu1 %v3924_v53  ;;  %3626 = vmatprep.mubr.bf16.mxu0 %v4131_v24  ;;  %v3959_v24 = vld [vmem:[%s4833_s1 + $0x190] sm:$0xff]  }
  0x51   : > { %3658 = vmatprep.mubr.bf16.mxu1 %v4219_v54 }
  0x52   : > { %3673 = vmatpush3.bf16.msra.mxu0 %v3923_v52  ;;  %v3989_v52 = vld [vmem:[%s4833_s1 + $0x208] sm:$0xff]  }
  0x53   : > { %3705 = vmatpush3.bf16.msra.mxu1 %v3924_v53  ;;  %3674 = vmatprep.subr.bf16.mxu0 %v3927_v55  ;;  %v3987_v53 = vld [vmem:[%s4089_s16 + $0x40] sm:$0xff]  }
  0x54   : > { %3706 = vmatprep.subr.bf16.mxu1 %v3928_v56 }
  0x55   : > { %3627 = vmatmul.mubr.bf16.gmra.mxu0 %v4136_v26  ;;  %v3961_v26 = vld [vmem:[%s4089_s16 + $0x108] sm:$0xff]  }
  0x56   : > { %3659 = vmatmul.mubr.bf16.gmra.mxu1 %v4231_v57  ;;  %3675 = vmatpush3.bf16.msra.mxu0 %v3927_v55  ;;  %v3990_v55 = vld [vmem:[%s4833_s1 + $0x200] sm:$0xff]  }
  0x57   : > { %3707 = vmatpush3.bf16.msra.mxu1 %v3928_v56  ;;  %3676 = vmatprep.subr.bf16.mxu0 %v3929_v58 }
  0x58   : > { %3708 = vmatprep.subr.bf16.mxu1 %v3930_v59  ;;  %3630 = vmatprep.mubr.bf16.mxu0 %v4153_v32  ;;  %v4349_v32 = vld [vmem:[%s4089_s16 + $0x8] sm:$0xff]  }
  0x59   : > { %3662 = vmatprep.mubr.bf16.mxu1 %v4241_v60 }
  0x5a   : > { %3677 = vmatpush3.bf16.msra.mxu0 %v3929_v58 }
  0x5b   : > { %3709 = vmatpush3.bf16.msra.mxu1 %v3930_v59  ;;  %3678 = vmatprep.subr.bf16.mxu0 %v3933_v61 }
  0x5c   : > { %3710 = vmatprep.subr.bf16.mxu1 %v3934_v62 }
  0x5d   : > { %3631 = vmatmul.mubr.bf16.gmra.mxu0 %v4158_v34  ;;  %v3971_v34 = vld [vmem:[%s4833_s1 + $0x238] sm:$0xff]  }
  0x5e   : > { %3663 = vmatmul.mubr.bf16.gmra.mxu1 %v4253_v63  ;;  %3679 = vmatpush3.bf16.msra.mxu0 %v3933_v61 }
  0x5f   : > { %3711 = vmatpush3.bf16.msra.mxu1 %v3934_v62  ;;  %3680 = vmatprep.subr.bf16.mxu0 %v3935_v0 }
  0x60   : > { %3712 = vmatprep.subr.bf16.mxu1 %v3936_v1  ;;  %3634 = vmatprep.mubr.bf16.mxu0 %v4175_v40  ;;  %v3977_v40 = vld [vmem:[%s4833_s1 + $0x228] sm:$0xff]  }
  0x61   : > { %3666 = vmatprep.mubr.bf16.mxu1 %v4263_v2 }
  0x62   : > { %3681 = vmatpush3.bf16.msra.mxu0 %v3935_v0 }
  0x63   : > { %3713 = vmatpush3.bf16.msra.mxu1 %v3936_v1  ;;  %3682 = vmatprep.subr.bf16.mxu0 %v3939_v3 }
  0x64   : > { %3714 = vmatprep.subr.bf16.mxu1 %v3940_v4 }
  0x65   : > { %3635 = vmatmul.mubr.bf16.gmra.mxu0 %v4187_v44  ;;  %v3979_v44 = vld [vmem:[%s4089_s16 + $0x28] sm:$0xff]  }
  0x66   : > { %3667 = vmatmul.mubr.bf16.gmra.mxu1 %v4275_v5  ;;  %3683 = vmatpush3.bf16.msra.mxu0 %v3939_v3 }
  0x67   : > { %3715 = vmatpush3.bf16.msra.mxu1 %v3940_v4  ;;  %3684 = vmatprep.subr.bf16.mxu0 %v3941_v6 }
  0x68   : > { %3716 = vmatprep.subr.bf16.mxu1 %v3942_v7  ;;  %3686 = vmatprep.mubr.bf16.mxu0 %v3943_v8 }
  0x69   : > { %3718 = vmatprep.mubr.bf16.mxu1 %v4198_v48  ;;  %v3982_v48 = vld [vmem:[%s4089_s16 + $0x78] sm:$0xff]  }
  0x6a   : > { %3685 = vmatpush3.bf16.msra.mxu0 %v3941_v6 }
  0x6b   : > { %3717 = vmatpush3.bf16.msra.mxu1 %v3942_v7  ;;  %3734 = vmatprep.subr.bf16.mxu0 %v3945_v9 }
  0x6c   : > { %3766 = vmatprep.subr.bf16.mxu1 %v3946_v10 }
  0x6d   : > { %3687 = vmatmul.mubr.bf16.vlgmr.msra.gmra.mxu0 %v3944_v11 }
  0x6e   : > { %3719 = vmatmul.mubr.bf16.vlgmr.msra.gmra.mxu1 %v4209_v51  ;;  %3735 = vmatpush3.bf16.msra.mxu0 %v3945_v9  ;;  %v3986_v51 = vld [vmem:[%s4089_s16 + $0x80] sm:$0xff]  }
  0x6f   : > { %3767 = vmatpush3.bf16.msra.mxu1 %v3946_v10  ;;  %3736 = vmatprep.subr.bf16.mxu0 %v3947_v12 }
  0x70   : > { %3768 = vmatprep.subr.bf16.mxu1 %v3948_v13  ;;  %3690 = vmatprep.mubr.bf16.mxu0 %v3949_v14 }
  0x71   : > { %3722 = vmatprep.mubr.bf16.mxu1 %v4219_v54  ;;  %v3988_v54 = vld [vmem:[%s4089_s16 + $0x88] sm:$0xff]  }
  0x72   : > { %3737 = vmatpush3.bf16.msra.mxu0 %v3947_v12 }
  0x73   : > { %3769 = vmatpush3.bf16.msra.mxu1 %v3948_v13  ;;  %3738 = vmatprep.subr.bf16.mxu0 %v3951_v15 }
  0x74   : > { %3770 = vmatprep.subr.bf16.mxu1 %v3952_v16 }
  0x75   : > { %3691 = vmatmul.mubr.bf16.gmra.mxu0 %v3950_v17 }
  0x76   : > { %3723 = vmatmul.mubr.bf16.gmra.mxu1 %v4231_v57  ;;  %3739 = vmatpush3.bf16.msra.mxu0 %v3951_v15 }
  0x77   : > { %3771 = vmatpush3.bf16.msra.mxu1 %v3952_v16  ;;  %3740 = vmatprep.subr.bf16.mxu0 %v3953_v18 }
  0x78   : > { %3772 = vmatprep.subr.bf16.mxu1 %v3954_v19  ;;  %3694 = vmatprep.mubr.bf16.mxu0 %v3955_v20 }
  0x79   : > { %3726 = vmatprep.mubr.bf16.mxu1 %v4241_v60 }
  0x7a   : > { %3741 = vmatpush3.bf16.msra.mxu0 %v3953_v18 }
  0x7b   : > { %3773 = vmatpush3.bf16.msra.mxu1 %v3954_v19  ;;  %3742 = vmatprep.subr.bf16.mxu0 %v3957_v21 }
  0x7c   : > { %3774 = vmatprep.subr.bf16.mxu1 %v3958_v22 }
  0x7d   : > { %3695 = vmatmul.mubr.bf16.gmra.mxu0 %v3956_v23 }
  0x7e   : > { %3727 = vmatmul.mubr.bf16.gmra.mxu1 %v4253_v63  ;;  %3743 = vmatpush3.bf16.msra.mxu0 %v3957_v21 }
  0x7f   : > { %3775 = vmatpush3.bf16.msra.mxu1 %v3958_v22  ;;  %3744 = vmatprep.subr.bf16.mxu0 %v3959_v24 }
  0x80   : > { %3776 = vmatprep.subr.bf16.mxu1 %v3960_v25  ;;  %3698 = vmatprep.mubr.bf16.mxu0 %v3961_v26 }
  0x81   : > { %3730 = vmatprep.mubr.bf16.mxu1 %v4263_v2 }
  0x82   : > { %3745 = vmatpush3.bf16.msra.mxu0 %v3959_v24 }
  0x83   : > { %3777 = vmatpush3.bf16.msra.mxu1 %v3960_v25  ;;  %3746 = vmatprep.subr.bf16.mxu0 %v3963_v27 }
  0x84   : > { %3778 = vmatprep.subr.bf16.mxu1 %v3964_v28 }
  0x85   : > { %3699 = vmatmul.mubr.bf16.gmra.mxu0 %v3962_v29 }
  0x86   : > { %3731 = vmatmul.mubr.bf16.gmra.mxu1 %v4275_v5  ;;  %3747 = vmatpush3.bf16.msra.mxu0 %v3963_v27 }
  0x87   : > { %3779 = vmatpush3.bf16.msra.mxu1 %v3964_v28  ;;  %3748 = vmatprep.subr.bf16.mxu0 %v3965_v30 }
  0x88   : > { %3780 = vmatprep.subr.bf16.mxu1 %v3966_v31  ;;  %3750 = vmatprep.mubr.bf16.mxu0 %v4349_v32 }
  0x89   : > { %3782 = vmatprep.mubr.bf16.mxu1 %v3968_v33 }
  0x8a   : > { %3749 = vmatpush3.bf16.msra.mxu0 %v3965_v30 }
  0x8b   : > { %3781 = vmatpush3.bf16.msra.mxu1 %v3966_v31  ;;  %3798 = vmatprep.subr.bf16.mxu0 %v3971_v34 }
  0x8c   : > { %3830 = vmatprep.subr.bf16.mxu1 %v3971_v34 }
  0x8d   : > { %3751 = vmatmul.mubr.bf16.vlgmr.msra.gmra.mxu0 %v4358_v35 }
  0x8e   : > { %3783 = vmatmul.mubr.bf16.vlgmr.msra.gmra.mxu1 %v3970_v36  ;;  %3799 = vmatpush3.bf16.msra.mxu0 %v3971_v34 }
  0x8f   : > { %3838 = vmatpush3.bf16.msra.mxu1 %v3971_v34  ;;  %3800 = vmatprep.subr.bf16.mxu0 %v3972_v37 }
  0x90   : > { %3831 = vmatprep.subr.bf16.mxu1 %v3972_v37  ;;  %3754 = vmatprep.mubr.bf16.mxu0 %v4365_v38 }
  0x91   : > { %3786 = vmatprep.mubr.bf16.mxu1 %v3974_v39 }
  0x92   : > { %3801 = vmatpush3.bf16.msra.mxu0 %v3972_v37 }
  0x93   : > { %3839 = vmatpush3.bf16.msra.mxu1 %v3972_v37  ;;  %3802 = vmatprep.subr.bf16.mxu0 %v3977_v40 }
  0x94   : > { %3832 = vmatprep.subr.bf16.mxu1 %v3977_v40 }
  0x95   : > { %3755 = vmatmul.mubr.bf16.gmra.mxu0 %v3975_v41 }
  0x96   : > { %3787 = vmatmul.mubr.bf16.gmra.mxu1 %v3976_v42  ;;  %3803 = vmatpush3.bf16.msra.mxu0 %v3977_v40 }
  0x97   : > { %3840 = vmatpush3.bf16.msra.mxu1 %v3977_v40  ;;  %3804 = vmatprep.subr.bf16.mxu0 %v3978_v43 }
  0x98   : > { %3833 = vmatprep.subr.bf16.mxu1 %v3978_v43  ;;  %3758 = vmatprep.mubr.bf16.mxu0 %v3979_v44 }
  0x99   : > { %3790 = vmatprep.mubr.bf16.mxu1 %v3980_v45 }
  0x9a   : > { %3805 = vmatpush3.bf16.msra.mxu0 %v3978_v43 }
  0x9b   : > { %3841 = vmatpush3.bf16.msra.mxu1 %v3978_v43  ;;  %3806 = vmatprep.subr.bf16.mxu0 %v3983_v46 }
  0x9c   : > { %3834 = vmatprep.subr.bf16.mxu1 %v3983_v46 }
  0x9d   : > { %3759 = vmatmul.mubr.bf16.gmra.mxu0 %v3981_v47 }
  0x9e   : > { %3791 = vmatmul.mubr.bf16.gmra.mxu1 %v3982_v48  ;;  %3807 = vmatpush3.bf16.msra.mxu0 %v3983_v46 }
  0x9f   : > { %3842 = vmatpush3.bf16.msra.mxu1 %v3983_v46  ;;  %3808 = vmatprep.subr.bf16.mxu0 %v3984_v49 }
  0xa0   : > { %3835 = vmatprep.subr.bf16.mxu1 %v3984_v49  ;;  %3762 = vmatprep.mubr.bf16.mxu0 %v3985_v50 }
  0xa1   : > { %3794 = vmatprep.mubr.bf16.mxu1 %v3986_v51 }
  0xa2   : > { %3809 = vmatpush3.bf16.msra.mxu0 %v3984_v49 }
  0xa3   : > { %3843 = vmatpush3.bf16.msra.mxu1 %v3984_v49  ;;  %3810 = vmatprep.subr.bf16.mxu0 %v3989_v52 }
  0xa4   : > { %3836 = vmatprep.subr.bf16.mxu1 %v3989_v52 }
  0xa5   : > { %3763 = vmatmul.mubr.bf16.gmra.mxu0 %v3987_v53 }
  0xa6   : > { %3795 = vmatmul.mubr.bf16.gmra.mxu1 %v3988_v54  ;;  %3811 = vmatpush3.bf16.msra.mxu0 %v3989_v52 }
  0xa7   : > { %3844 = vmatpush3.bf16.msra.mxu1 %v3989_v52  ;;  %3812 = vmatprep.subr.bf16.mxu0 %v3990_v55 }
  0xa8   : > { %3837 = vmatprep.subr.bf16.mxu1 %v3990_v55  ;;  %3814 = vmatprep.mubr.bf16.mxu0 %v4349_v32 }
  0xa9   : > { %3822 = vmatprep.mubr.bf16.mxu1 %v3979_v44 }
  0xaa   : > { %3813 = vmatpush3.bf16.msra.mxu0 %v3990_v55 }
  0xab   : > { %3845 = vmatpush3.bf16.msra.mxu1 %v3990_v55 }
  0xad   : > { %3815 = vmatmul.mubr.bf16.vlgmr.msra.gmra.mxu0 %v4358_v35  ;;  %v1028_v35 = vlaneseq }
  0xae   : > { %3823 = vmatmul.mubr.bf16.vlgmr.msra.gmra.mxu1 %v3981_v47  ;;  %3818 = vmatprep.mubr.bf16.mxu0 %v4365_v38 }
  0xaf   : > { %3826 = vmatprep.mubr.bf16.mxu1 %v3985_v50  ;;  %v4431_v42 = vshrl.u32 %v1028_v35, 7 }
  0xb1   : > { %vm1030_vm0 = vcmp.lt.s32.totalorder %v4431_v42, 7 }
  0xb5   : > { %3819 = vmatmul.mubr.bf16.gmra.mxu0 %v3975_v41 }
  0xb6   : > { %3827 = vmatmul.mubr.bf16.gmra.mxu1 %v3987_v53 }
  0xed   : > { %v3560_v56 = vpop.f32.mrf.mxu0 }
  0xee   : > { %v3592_v57 = vpop.f32.mrf.mxu1 }
  0xef   : > { %v4401_v58 = vadd.f32 %v3592_v57, %v3560_v56  ;;  %v462_v59 = vpop.f32.mrf.mxu0 }
  0xf0   : > { %v739_v60 = vpop.f32.mrf.mxu1 }
  0xf1   : > { %v4403_v61 = vadd.f32 %v739_v60, %v462_v59  ;;  %v3561_v62 = vpop.f32.mrf.mxu0 }
  0xf2   : > { %v3593_v63 = vpop.f32.mrf.mxu1 }
  0xf3   : > { %v4405_v0 = vadd.f32 %v3593_v63, %v3561_v62  ;;  %v465_v1 = vpop.f32.mrf.mxu0 }
  0xf4   : > { %v742_v2 = vpop.f32.mrf.mxu1 }
  0xf5   : > { %v819_v3 = vadd.f32 %v742_v2, %v465_v1  ;;  %v3564_v4 = vpop.f32.mrf.mxu0 }
  0xf6   : > { %v3596_v5 = vpop.f32.mrf.mxu1 }
  0xf7   : > { %v4407_v6 = vadd.f32 %v3596_v5, %v3564_v4  ;;  %v478_v7 = vpop.f32.mrf.mxu0 }
  0xf8   : > { %v755_v8 = vpop.f32.mrf.mxu1 }
  0xf9   : > { %v4409_v9 = vadd.f32 %v755_v8, %v478_v7  ;;  %v3565_v10 = vpop.f32.mrf.mxu0 }
  0xfa   : > { %v3597_v11 = vpop.f32.mrf.mxu1 }
  0xfb   : > { %v4411_v12 = vadd.f32 %v3597_v11, %v3565_v10  ;;  %v481_v13 = vpop.f32.mrf.mxu0 }
  0xfc   : > { %v758_v14 = vpop.f32.mrf.mxu1 }
  0xfd   : > { %v4413_v15 = vadd.f32 %v758_v14, %v481_v13  ;;  %v3568_v16 = vpop.f32.mrf.mxu0 }
  0xfe   : > { %v3600_v17 = vpop.f32.mrf.mxu1 }
  0xff   : > { %v4415_v18 = vadd.f32 %v3600_v17, %v3568_v16  ;;  %v494_v19 = vpop.f32.mrf.mxu0 }
 0x100   : > { %v771_v20 = vpop.f32.mrf.mxu1 }
 0x101   : > { %v4417_v21 = vadd.f32 %v771_v20, %v494_v19  ;;  %v3569_v22 = vpop.f32.mrf.mxu0 }
 0x102   : > { %v3601_v23 = vpop.f32.mrf.mxu1 }
 0x103   : > { %v4419_v24 = vadd.f32 %v3601_v23, %v3569_v22  ;;  %v497_v25 = vpop.f32.mrf.mxu0 }
 0x104   : > { %v774_v26 = vpop.f32.mrf.mxu1 }
 0x105   : > { %v4421_v27 = vadd.f32 %v774_v26, %v497_v25  ;;  %v3572_v28 = vpop.f32.mrf.mxu0 }
 0x106   : > { %v3604_v29 = vpop.f32.mrf.mxu1 }
 0x107   : > { %v4423_v30 = vadd.f32 %v3604_v29, %v3572_v28  ;;  %v510_v31 = vpop.f32.mrf.mxu0 }
 0x108   : > { %v787_v32 = vpop.f32.mrf.mxu1 }
 0x109   : > { %v4425_v33 = vadd.f32 %v787_v32, %v510_v31  ;;  %v3573_v34 = vpop.f32.mrf.mxu0 }
 0x10a   : > { %v3605_v36 = vpop.f32.mrf.mxu1 }
 0x10b   : > { %v4427_v37 = vadd.f32 %v3605_v36, %v3573_v34  ;;  %v513_v38 = vpop.f32.mrf.mxu0 }
 0x10c   : > { %v790_v39 = vpop.f32.mrf.mxu1 }
 0x10d   : > { %v4429_v40 = vadd.f32 %v790_v39, %v513_v38  ;;  %v3624_v41 = vpop.f32.mrf.mxu0 }
 0x10e   : > { %v3656_v43 = vpop.f32.mrf.mxu1  ;;  %v1014_v47 = vrot.slane %v3624_v41, 1 }
 0x10f   : > { %v4433_v44 = vpop.f32.mrf.mxu0 }
 0x110   : > { %v1261_v45 = vpop.f32.mrf.mxu1  ;;  %v1012_v51 = vrot.slane %v4433_v44, 1 }
 0x111   : > { %v3625_v46 = vpop.f32.mrf.mxu0 }
 0x112   : > { %v1015_v48 = vrot.slane %v3625_v46, 1  ;;  %v3657_v49 = vpop.f32.mrf.mxu1 }
 0x113   : > { %v952_v50 = vpop.f32.mrf.mxu0 }
 0x114   : > { %v1043_v52 = vsel %vm1030_vm0, %v1014_v47, %v1015_v48  ;;  %v1013_v53 = vrot.slane %v952_v50, 1  ;;  %v1264_v54 = vpop.f32.mrf.mxu1 }
 0x115   : > { %v3628_v55 = vpop.f32.mrf.mxu0  ;;  %v1065_v56 = vadd.f32 %v1043_v52, %v4401_v58 }
 0x116   : > { %v1045_v57 = vsel %vm1030_vm0, %v1012_v51, %v1013_v53  ;;  %v1044_v59 = vsel %vm1030_vm0, %v1013_v53, %v1014_v47  ;;  %v3660_v60 = vpop.f32.mrf.mxu1  ;;  %v1018_v10 = vrot.slane %v3628_v55, 1 }
 0x117   : > { %v1064_v62 = vadd.f32 %v1044_v59, %v819_v3  ;;  %v965_v63 = vpop.f32.mrf.mxu0  ;;  %v4446_v1 = vadd.f32 %v3656_v43, %v1065_v56  ;;  %v1063_v2 = vadd.f32 %v1045_v57, %v4403_v61 }
 0x118   : > { %v1016_v4 = vrot.slane %v965_v63, 1  ;;  %v1277_v5 = vpop.f32.mrf.mxu1 }
 0x119   : > { %v4449_v7 = vadd.f32 %v1264_v54, %v1064_v62  ;;  %v3629_v58 = vpop.f32.mrf.mxu0  ;;  %v4451_v8 = vadd.f32 %v1261_v45, %v1063_v2 }
 0x11a   : > { %v1042_v11 = vsel %vm1030_vm0, %v1015_v48, %v1016_v4  ;;  %v1019_v13 = vrot.slane %v3629_v58, 1  ;;  %v3661_v14 = vpop.f32.mrf.mxu1 }
 0x11b   : > { %v968_v16 = vpop.f32.mrf.mxu0  ;;  %v1066_v3 = vadd.f32 %v1042_v11, %v4405_v0 }
 0x11c   : > { %v1039_v17 = vsel %vm1030_vm0, %v1018_v10, %v1019_v13  ;;  %v1017_v61 = vrot.slane %v968_v16, 1  ;;  %v1280_v19 = vpop.f32.mrf.mxu1 }
 0x11d   : > { %v3632_v20 = vpop.f32.mrf.mxu0  ;;  %v4458_v22 = vadd.f32 %v3657_v49, %v1066_v3  ;;  %v1069_v23 = vadd.f32 %v1039_v17, %v4407_v6 }
 0x11e   : > { %v1041_v25 = vsel %vm1030_vm0, %v1016_v4, %v1017_v61  ;;  %v1040_v26 = vsel %vm1030_vm0, %v1017_v61, %v1018_v10  ;;  %v3664_v28 = vpop.f32.mrf.mxu1  ;;  %v1022_v39 = vrot.slane %v3632_v20, 1 }
 0x11f   : > { %v1068_v29 = vadd.f32 %v1040_v26, %v4413_v15  ;;  %v981_v0 = vpop.f32.mrf.mxu0  ;;  %v4466_v31 = vadd.f32 %v3660_v60, %v1069_v23  ;;  %v1067_v32 = vadd.f32 %v1041_v25, %v4409_v9 }
 0x120   : > { %v1020_v34 = vrot.slane %v981_v0, 1  ;;  %v1293_v35 = vpop.f32.mrf.mxu1 }
 0x121   : > { %v4469_v36 = vadd.f32 %v1280_v19, %v1068_v29  ;;  %v3633_v38 = vpop.f32.mrf.mxu0  ;;  %v4471_v6 = vadd.f32 %v1277_v5, %v1067_v32 }
 0x122   : > { %v1038_v41 = vsel %vm1030_vm0, %v1019_v13, %v1020_v34  ;;  %v1023_v43 = vrot.slane %v3633_v38, 1  ;;  %v3665_v45 = vpop.f32.mrf.mxu1 }
 0x123   : > { %v984_v46 = vpop.f32.mrf.mxu0  ;;  %v1070_v15 = vadd.f32 %v1038_v41, %v4411_v12 }
 0x124   : > { %v1035_v47 = vsel %vm1030_vm0, %v1022_v39, %v1023_v43  ;;  %v1021_v9 = vrot.slane %v984_v46, 1  ;;  %v1296_v48 = vpop.f32.mrf.mxu1 }
 0x125   : > { %v3636_v49 = vpop.f32.mrf.mxu0  ;;  %v4478_v50 = vadd.f32 %v3661_v14, %v1070_v15  ;;  %v1073_v52 = vadd.f32 %v1035_v47, %v4415_v18 }
 0x126   : > { %v1037_v53 = vsel %vm1030_vm0, %v1020_v34, %v1021_v9  ;;  %v1036_v54 = vsel %vm1030_vm0, %v1021_v9, %v1022_v39  ;;  %v3668_v55 = vpop.f32.mrf.mxu1  ;;  %v1026_v4 = vrot.slane %v3636_v49, 1 }
 0x127   : > { %v1072_v56 = vadd.f32 %v1036_v54, %v4421_v27  ;;  %v997_v12 = vpop.f32.mrf.mxu0  ;;  %v4486_v57 = vadd.f32 %v3664_v28, %v1073_v52  ;;  %v1071_v59 = vadd.f32 %v1037_v53, %v4417_v21 }
 0x128   : > { %v1024_v60 = vrot.slane %v997_v12, 1  ;;  %v1309_v62 = vpop.f32.mrf.mxu1 }
 0x129   : > { %v4489_v63 = vadd.f32 %v1296_v48, %v1072_v56  ;;  %v3637_v2 = vpop.f32.mrf.mxu0  ;;  %v4491_v18 = vadd.f32 %v1293_v35, %v1071_v59 }
 0x12a   : > { %v1034_v5 = vsel %vm1030_vm0, %v1023_v43, %v1024_v60  ;;  %v1027_v58 = vrot.slane %v3637_v2, 1  ;;  %v3669_v10 = vpop.f32.mrf.mxu1 }
 0x12b   : > { %v1000_v11 = vpop.f32.mrf.mxu0  ;;  %v1074_v27 = vadd.f32 %v1034_v5, %v4419_v24 }
 0x12c   : > { %v1031_v13 = vsel %vm1030_vm0, %v1026_v4, %v1027_v58  ;;  %v1046_v21 = vsel %vm1030_vm0, %v1027_v58, %v1012_v51  ;;  %v1025_v14 = vrot.slane %v1000_v11, 1  ;;  %v1312_v16 = vpop.f32.mrf.mxu1 }
 0x12d   : > { %v1078_v3 = vadd.f32 %v1046_v21, %v4427_v37  ;;  %v3688_v17 = vpop.f32.mrf.mxu0  ;;  %v4503_v61 = vadd.f32 %v3665_v45, %v1074_v27  ;;  %v1077_v19 = vadd.f32 %v1031_v13, %v4423_v30 }
 0x12e   : > { %v1033_v24 = vsel %vm1030_vm0, %v1024_v60, %v1025_v14  ;;  %v1032_v20 = vsel %vm1030_vm0, %v1025_v14, %v1026_v4  ;;  %v1619_v44 = vadd.f32 %v3688_v17, %v4446_v1  ;;  %v4511_v23 = vpop.f32.mrf.mxu1 }
 0x12f   : > { %v4513_v51 = vadd.f32 %v3669_v10, %v1078_v3  ;;  %v1076_v25 = vadd.f32 %v1032_v20, %v4429_v40  ;;  %v4516_v37 = vpop.f32.mrf.mxu0  ;;  %v4518_v26 = vadd.f32 %v3668_v55, %v1077_v19  ;;  %v1075_v30 = vadd.f32 %v1033_v24, %v4425_v33 }
 0x130   : > { %v4520_v28 = vpop.f32.mrf.mxu1  ;;  %v4836_v35 = vrot.slane %v4511_v23, 1 }
 0x131   : > { %v4523_v29 = vadd.f32 %v1312_v16, %v1076_v25  ;;  %v3689_v0 = vpop.f32.mrf.mxu0  ;;  %v4526_v34 = vadd.f32 %v1309_v62, %v1075_v30 }
 0x132   : > { %v1620_v32 = vadd.f32 %v3689_v0, %v4458_v22  ;;  %v3721_v1 = vpop.f32.mrf.mxu1 }
 0x133   : > { %v1814_v38 = vrot.slane %v3721_v1, 1  ;;  %v1541_v40 = vpop.f32.mrf.mxu0 }
 0x134   : > { %v1751_v39 = vpop.f32.mrf.mxu1 }
 0x135   : > { %v3692_v41 = vpop.f32.mrf.mxu0  ;;  %v1839_v43 = vsel %vm1030_vm0, %v4836_v35, %v1814_v38  ;;  %v1812_v1 = vrot.slane %v1751_v39, 1  ;;  %v1617_v39 = vadd.f32 %v4516_v37, %v4451_v8 }
 0x136   : > { %v4534_v33 = vadd.f32 %v3692_v41, %v4466_v31  ;;  %v4536_v45 = vpop.f32.mrf.mxu1  ;;  %v4538_v22 = vadd.f32 %v1839_v43, %v1619_v44  ;;  %v1811_v43 = vrot.slane %v4520_v28, 1 }
 0x137   : > { %v1554_v46 = vpop.f32.mrf.mxu0  ;;  %v1817_v28 = vrot.slane %v4536_v45, 1 }
 0x138   : > { %v4541_v15 = vadd.f32 %v1554_v46, %v4471_v6  ;;  %v1764_v47 = vpop.f32.mrf.mxu1  ;;  %v1841_v35 = vsel %vm1030_vm0, %v1811_v43, %v1812_v1 }
 0x139   : > { %v1815_v9 = vrot.slane %v1764_v47, 1  ;;  %v3693_v48 = vpop.f32.mrf.mxu0 }
 0x13a   : > { %v4543_v49 = vpop.f32.mrf.mxu1 }
 0x13b   : > { %v1557_v52 = vpop.f32.mrf.mxu0  ;;  %v1838_v53 = vsel %vm1030_vm0, %v1814_v38, %v1815_v9 }
 0x13c   : > { %v4548_v31 = vadd.f32 %v1557_v52, %v4469_v36  ;;  %v4550_v54 = vpop.f32.mrf.mxu1  ;;  %v4552_v55 = vadd.f32 %v1838_v53, %v1620_v32  ;;  %v1818_v52 = vrot.slane %v4543_v49, 1 }
 0x13d   : > { %v3696_v56 = vpop.f32.mrf.mxu0  ;;  %v1816_v53 = vrot.slane %v4550_v54, 1 }
 0x13e   : > { %v4554_v12 = vpop.f32.mrf.mxu1  ;;  %v1627_v45 = vadd.f32 %v3696_v56, %v4486_v57 }
 0x13f   : > { %v1570_v6 = vpop.f32.mrf.mxu0  ;;  %v1837_v37 = vsel %vm1030_vm0, %v1815_v9, %v1816_v53 }
 0x140   : > { %v4556_v59 = vpop.f32.mrf.mxu1 }
 0x141   : > { %v4558_v60 = vpop.f32.mrf.mxu0 }
 0x142   : > { %v4560_v62 = vpop.f32.mrf.mxu1 }
 0x143   : > { %v1573_v2 = vpop.f32.mrf.mxu0  ;;  %v1822_v8 = vrot.slane %v4560_v62, 1 }
 0x144   : > { %v4562_v4 = vpop.f32.mrf.mxu1 }
 0x145   : > { %v4564_v5 = vpop.f32.mrf.mxu0 }
 0x146   : > { %v4566_v36 = vpop.f32.mrf.mxu1 }
 0x147   : > { %v4568_v58 = vpop.f32.mrf.mxu0 }
 0x148   : > { %v4570_v10 = vpop.f32.mrf.mxu1 }
 0x149   : > { %v3701_v11 = vpop.f32.mrf.mxu0  ;;  %v1823_v62 = vrot.slane %v4570_v10, 1 }
 0x14a   : > { %v4572_v27 = vpop.f32.mrf.mxu1 }
 0x14b   : > { %v4574_v13 = vpop.f32.mrf.mxu0 }
 0x14c   : > { %v4576_v21 = vpop.f32.mrf.mxu1 }
 0x14d   : > { %v4578_v14 = vpop.f32.mrf.mxu0 }
 0x14e   : > { %v4580_v16 = vpop.f32.mrf.mxu1 }
 0x14f   : > { %v4582_v3 = vpop.f32.mrf.mxu0 }
 0x150   : > { %v4584_v17 = vpop.f32.mrf.mxu1 }
 0x151   : > { %4837 = vst [vmem:[#allocation3_spill] sm:$0xff] %v4584_v17  ;;  %v4586_v19 = vpop.f32.mrf.mxu0  ;;  %v1819_v17 = vrot.slane %v4556_v59, 1  ;;  %v1821_v59 = vrot.slane %v4554_v12, 1  ;;  %v1626_v12 = vadd.f32 %v1573_v2, %v4489_v63  ;;  %v1628_v2 = vadd.f32 %v4558_v60, %v4503_v61 }
 0x152   : > { %v4588_v24 = vpop.f32.mrf.mxu1  ;;  %v1629_v61 = vadd.f32 %v4568_v58, %v4526_v34  ;;  %v1630_v60 = vadd.f32 %v4574_v13, %v4523_v29 }
 0x153   : > { %4838 = vst [vmem:[#allocation4_spill] sm:$0xff] %v4588_v24  ;;  %v4590_v20 = vpop.f32.mrf.mxu0  ;;  %v1834_v10 = vsel %vm1030_vm0, %v1818_v52, %v1819_v17 }
 0x154   : > { %v4592_v44 = vpop.f32.mrf.mxu1 }
 0x155   : > { %4839 = vst [vmem:[#allocation5_spill] sm:$0xff] %v4592_v44  ;;  %v4594_v25 = vpop.f32.mrf.mxu0  ;;  %v1859_v44 = vadd.f32 %v1841_v35, %v1617_v39  ;;  %v1826_v39 = vrot.slane %v4572_v27, 1  ;;  %v1831_v27 = vsel %vm1030_vm0, %v1821_v59, %v1822_v8 }
 0x156   : > { %v4596_v30 = vpop.f32.mrf.mxu1 }
 0x157   : > { %4840 = vst [vmem:[#allocation6_spill] sm:$0xff] %v4596_v30  ;;  %v4598_v0 = vpop.f32.mrf.mxu0 }
 0x158   : > { %v4600_v32 = vpop.f32.mrf.mxu1 }
 0x159   : > { %4841 = vst [vmem:[#allocation7_spill] sm:$0xff] %v4600_v32  ;;  %v4602_v38 = vpop.f32.mrf.mxu0 }
 0x15a   : > { %v4604_v41 = vpop.f32.mrf.mxu1 }
 0x15b   : > { %4842 = vst [vmem:[#allocation8_spill] sm:$0xff] %v4604_v41  ;;  %v4607_v46 = vpop.f32.mrf.mxu0  ;;  %v1618_v41 = vadd.f32 %v1541_v40, %v4449_v7  ;;  %v1835_v7 = vsel %vm1030_vm0, %v1817_v28, %v1818_v52 }
 0x15c   : > { %v4609_v47 = vpop.f32.mrf.mxu1  ;;  %v1865_v57 = vadd.f32 %v1835_v7, %v4534_v33 }
 0x15d   : > { %4843 = vst [vmem:[#allocation9_spill] sm:$0xff] %v4609_v47  ;;  %v4615_v30 = vpop.f32.mrf.mxu0  ;;  %v4845_v47 = vrot.slane %v4511_v23, 1  ;;  %v1624_v23 = vadd.f32 %v3693_v48, %v4478_v50  ;;  %v1824_v50 = vrot.slane %v4576_v21, 1  ;;  %v1863_v48 = vadd.f32 %v1837_v37, %v4541_v15 }
 0x15e   : > { %v4620_v32 = vpop.f32.mrf.mxu1  ;;  %v2144_v13 = vadd.f32 %v4594_v25, %v1865_v57  ;;  %v4848_v57 = vld [vmem:[#allocation4_spill] sm:$0xff] }
 0x15f   : > { %4844 = vst [vmem:[#allocation10_spill] sm:$0xff] %v4620_v32  ;;  %v1840_v49 = vsel %vm1030_vm0, %v1812_v1, %v4845_v47  ;;  %v4627_v54 = vpop.f32.mrf.mxu0  ;;  %v1820_v1 = vrot.slane %v4562_v4, 1  ;;  %v1625_v32 = vadd.f32 %v1570_v6, %v4491_v18  ;;  %v1825_v4 = vrot.slane %v4566_v36, 1 }
 0x160   : > { %v4629_v24 = vpop.f32.mrf.mxu1  ;;  %v1860_v35 = vadd.f32 %v1840_v49, %v1618_v41  ;;  %v1632_v18 = vadd.f32 %v3701_v11, %v4513_v51  ;;  %v1830_v36 = vsel %vm1030_vm0, %v1822_v8, %v1823_v62  ;;  %v1842_v51 = vsel %vm1030_vm0, %v1826_v39, %v1811_v43 }
 0x161   : > { %4846 = vst [vmem:[#allocation11_spill] sm:$0xff] %v4629_v24  ;;  %v3761_v40 = vpop.f32.mrf.mxu0  ;;  %v1836_v24 = vsel %vm1030_vm0, %v1816_v53, %v1817_v28  ;;  %v1833_v33 = vsel %vm1030_vm0, %v1819_v17, %v1820_v1  ;;  %v1832_v15 = vsel %vm1030_vm0, %v1820_v1, %v1821_v59  ;;  %v1827_v21 = vsel %vm1030_vm0, %v1825_v4, %v1826_v39 }
 0x162   : > { %v4640_v47 = vpop.f32.mrf.mxu1  ;;  %v1864_v6 = vadd.f32 %v1836_v24, %v4548_v31  ;;  %v1631_v31 = vadd.f32 %v4564_v5, %v4518_v26  ;;  %v1866_v11 = vadd.f32 %v1834_v10, %v1624_v23  ;;  %v1869_v17 = vadd.f32 %v1831_v27, %v1627_v45  ;;  %v4851_v10 = vld [vmem:[#allocation7_spill] sm:$0xff] }
 0x163   : > { %v2094_v9 = vpop.f32.mrf.mxu0  ;;  %v1829_v24 = vsel %vm1030_vm0, %v1823_v62, %v1824_v50  ;;  %v1867_v28 = vadd.f32 %v1833_v33, %v1625_v32  ;;  %v1868_v49 = vadd.f32 %v1832_v15, %v1626_v12  ;;  %v2140_v43 = vadd.f32 %v4578_v14, %v4538_v22 }
 0x164   : > { %v4651_v56 = vpop.f32.mrf.mxu1  ;;  %v1870_v7 = vadd.f32 %v1830_v36, %v1628_v2  ;;  %v1873_v26 = vadd.f32 %v1827_v21, %v1631_v31  ;;  %v1874_v5 = vadd.f32 %v1842_v51, %v1632_v18  ;;  %v2138_v23 = vadd.f32 %v4582_v3, %v1859_v44  ;;  %v4853_v18 = vld [vmem:[#allocation9_spill] sm:$0xff] }
 0x165   : > { %v3764_v41 = vpop.f32.mrf.mxu0  ;;  %v2141_v45 = vadd.f32 %v4586_v19, %v4552_v55  ;;  %v1871_v1 = vadd.f32 %v1829_v24, %v1629_v61  ;;  %v1828_v34 = vsel %vm1030_vm0, %v1824_v50, %v1825_v4  ;;  %v2139_v58 = vadd.f32 %v4590_v20, %v1860_v35  ;;  %v4847_v50 = vld [vmem:[#allocation3_spill] sm:$0xff] }
 0x166   : > { %v3796_v63 = vpop.f32.mrf.mxu1  ;;  %v2142_v22 = vadd.f32 %v4598_v0, %v1863_v48  ;;  %v2145_v14 = vadd.f32 %v4602_v38, %v1866_v11  ;;  %v2143_v3 = vadd.f32 %v4607_v46, %v1864_v6  ;;  %v2148_v44 = vadd.f32 %v4615_v30, %v1869_v17  ;;  %v4849_v30 = vld [vmem:[#allocation5_spill] sm:$0xff]  ;;  %v4854_v33 = vld [vmem:[#allocation10_spill] sm:$0xff] }
 0x167   : > { %v2107_v52 = vpop.f32.mrf.mxu0  ;;  %v2146_v55 = vadd.f32 %v4627_v54, %v1867_v28  ;;  %v2149_v19 = vadd.f32 %v3761_v40, %v1870_v7  ;;  %v2417_v62 = vadd.f32 %v4580_v16, %v2140_v43  ;;  %v2147_v39 = vadd.f32 %v2094_v9, %v1868_v49  ;;  %v4850_v54 = vld [vmem:[#allocation6_spill] sm:$0xff]  ;;  %v4852_v9 = vld [vmem:[#allocation8_spill] sm:$0xff] }
 0x168   : > { %v2384_v53 = vpop.f32.mrf.mxu1  ;;  %v2152_v20 = vadd.f32 %v3764_v41, %v1873_v26  ;;  %v1872_v35 = vadd.f32 %v1828_v34, %v1630_v60  ;;  %v2415_v0 = vadd.f32 %v4847_v50, %v2138_v23  ;;  %v4700_v38 = vadd.f32 %v4848_v57, %v2141_v45  ;;  %v4855_v2 = vld [vmem:[#allocation11_spill] sm:$0xff] }
 0x169   : > { %v3765_v8 = vpop.f32.mrf.mxu0  ;;  %v2150_v48 = vadd.f32 %v2107_v52, %v1871_v1  ;;  %v2416_v4 = vadd.f32 %v4849_v30, %v2139_v58  ;;  %v4706_v40 = vadd.f32 %v4850_v54, %v2144_v13  ;;  %v4709_v16 = vadd.f32 %v4851_v10, %v2142_v22 }
 0x16a   : > { %v3797_v37 = vpop.f32.mrf.mxu1  ;;  %v2153_v12 = vadd.f32 %v3765_v8, %v1874_v5  ;;  %v4712_v27 = vadd.f32 %v4852_v9, %v2145_v14  ;;  %v4717_v6 = vadd.f32 %v4853_v18, %v2143_v3  ;;  %v2425_v15 = vadd.f32 %v4854_v33, %v2148_v44 }
 0x16b   : > { %v2110_v29 = vpop.f32.mrf.mxu0  ;;  %v2423_v36 = vadd.f32 %v4855_v2, %v2146_v55  ;;  %v2426_v21 = vadd.f32 %v4640_v47, %v2149_v19  ;;  %v2424_v51 = vadd.f32 %v4651_v56, %v2147_v39  ;;  %v4723_v31 = vadd.f32 %v3796_v63, %v2152_v20  ;;  %v4737_v56 = vld [vmem:[%s4834_s2] ss:$0 sm:$0xff] }
 0x16c   : > { %v4692_v32 = vpop.f32.mrf.mxu1  ;;  %v4725_v61 = vadd.f32 %v2384_v53, %v2150_v48  ;;  %v4727_v60 = vadd.f32 %v3797_v37, %v2153_v12  ;;  %v4729_v43 = vadd.f32 %v2110_v29, %v1872_v35 }
 0x16d   : > { %v3816_v59 = vpop.f32.mrf.mxu0 }
 0x16e   : > { %v3824_v25 = vpop.f32.mrf.mxu1  ;;  %v2611_v11 = vrot.slane %v3816_v59, 1 }
 0x16f   : > { %v4702_v46 = vpop.f32.mrf.mxu0  ;;  %v2619_v28 = vrot.slane %v3824_v25, 1 }
 0x170   : > { %v4714_v41 = vpop.f32.mrf.mxu1  ;;  %v2609_v7 = vrot.slane %v4702_v46, 1 }
 0x171   : > { %v3817_v52 = vpop.f32.mrf.mxu0  ;;  %v2617_v26 = vrot.slane %v4714_v41, 1 }
 0x172   : > { %v2612_v17 = vrot.slane %v3817_v52, 1  ;;  %v3825_v24 = vpop.f32.mrf.mxu1 }
 0x173   : > { %v2620_v49 = vrot.slane %v3825_v24, 1  ;;  %v2549_v8 = vpop.f32.mrf.mxu0 }
 0x174   : > { %v2637_v47 = vsel %vm1030_vm0, %v2611_v11, %v2612_v17  ;;  %v2610_v63 = vrot.slane %v2549_v8, 1  ;;  %v2581_v53 = vpop.f32.mrf.mxu1 }
 0x175   : > { %v2659_v5 = vadd.f32 %v2637_v47, %v2417_v62  ;;  %v2629_v37 = vsel %vm1030_vm0, %v2619_v28, %v2620_v49  ;;  %v2618_v23 = vrot.slane %v2581_v53, 1  ;;  %v4742_v45 = vpop.f32.mrf.mxu0 }
 0x176   : > { %v2667_v1 = vadd.f32 %v2629_v37, %v2425_v15  ;;  %v2638_v34 = vsel %vm1030_vm0, %v2610_v63, %v2611_v11  ;;  %v2639_v29 = vsel %vm1030_vm0, %v2609_v7, %v2610_v63  ;;  %v2615_v58 = vrot.slane %v4742_v45, 1  ;;  %v4749_v13 = vpop.f32.mrf.mxu1 }
 0x177   : > { %v2717_v22 = vadd.f32 %v4737_v56, %v2659_v5  ;;  %v2657_v14 = vadd.f32 %v2639_v29, %v2415_v0  ;;  %v2658_v3 = vadd.f32 %v2638_v34, %v2416_v4  ;;  %v2630_v44 = vsel %vm1030_vm0, %v2618_v23, %v2619_v28  ;;  %v2562_v55 = vpop.f32.mrf.mxu0 }
 0x178   : > { %v2725_v19 = vadd.f32 %v4737_v56, %v2667_v1  ;;  %v2631_v59 = vsel %vm1030_vm0, %v2617_v26, %v2618_v23  ;;  %v2666_v62 = vadd.f32 %v2630_v44, %v2424_v51  ;;  %v2623_v39 = vrot.slane %v4749_v13, 1  ;;  %v4758_v20 = vpop.f32.mrf.mxu1 }
 0x179   : > { %v2733_v35 = vmax.f32 %v2717_v22, 0.0  ;;  %v2715_v25 = vadd.f32 %v4737_v56, %v2657_v14  ;;  %v2716_v50 = vadd.f32 %v4737_v56, %v2658_v3  ;;  %v2665_v0 = vadd.f32 %v2631_v59, %v2423_v36  ;;  %v3821_v57 = vpop.f32.mrf.mxu0 }
 0x17a   : > { %v2741_v48 = vmax.f32 %v2725_v19, 0.0  ;;  %v2724_v12 = vadd.f32 %v4737_v56, %v2666_v62  ;;  %v2613_v46 = vrot.slane %v2562_v55, 1  ;;  %v2621_v30 = vrot.slane %v4758_v20, 1  ;;  %v3829_v4 = vpop.f32.mrf.mxu1 }
 0x17b   : > { %v2731_v54 = vmax.f32 %v2715_v25, 0.0  ;;  %v2732_v10 = vmax.f32 %v2716_v50, 0.0  ;;  %v2723_v9 = vadd.f32 %v4737_v56, %v2665_v0  ;;  %v2616_v41 = vrot.slane %v3821_v57, 1  ;;  %v2565_v24 = vpop.f32.mrf.mxu0 }
 0x17c   : > { %v2740_v18 = vmax.f32 %v2724_v12, 0.0  ;;  %v2636_v33 = vsel %vm1030_vm0, %v2612_v17, %v2613_v46  ;;  %v2628_v15 = vsel %vm1030_vm0, %v2620_v49, %v2621_v30  ;;  %v2624_v2 = vrot.slane %v3829_v4, 1  ;;  %v2597_v47 = vpop.f32.mrf.mxu1 }
 0x17d   : > { %v3354_v36 = vpack.c.bf16 %v2732_v10, %v2731_v54  ;;  %v2739_v52 = vmax.f32 %v2723_v9, 0.0  ;;  %v2660_v51 = vadd.f32 %v2636_v33, %v4700_v38  ;;  %v2668_v11 = vadd.f32 %v2628_v15, %v2426_v21 }
 0x17e   : > { %v2632_v28 = vsel %vm1030_vm0, %v2616_v41, %v2617_v26  ;;  %v2633_v8 = vsel %vm1030_vm0, %v2615_v58, %v2616_v41  ;;  %v2625_v17 = vsel %vm1030_vm0, %v2623_v39, %v2624_v2  ;;  %v2640_v49 = vsel %vm1030_vm0, %v2624_v2, %v2609_v7 }
 0x17f   : > { %3355 = vst [vmem:[%s4769_s7] sm:$0xff] %v3354_v36   ;;  %v3374_v38 = vpack.c.bf16 %v2740_v18, %v2739_v52  ;;  %v2718_v21 = vadd.f32 %v4737_v56, %v2660_v51  ;;  %v2726_v63 = vadd.f32 %v4737_v56, %v2668_v11  ;;  %v2663_v53 = vadd.f32 %v2633_v8, %v4706_v40 }
 0x180   : > { %v2664_v26 = vadd.f32 %v2632_v28, %v4712_v27  ;;  %v2671_v5 = vadd.f32 %v2625_v17, %v4723_v31  ;;  %v2672_v37 = vadd.f32 %v2640_v49, %v4727_v60  ;;  %v2614_v23 = vrot.slane %v2565_v24, 1 }
 0x181   : > { %3394 = vst [vmem:[%s4769_s7 + $0x20] sm:$0xff] %v3374_v38   ;;  %v2734_v45 = vmax.f32 %v2718_v21, 0.0  ;;  %v2742_v1 = vmax.f32 %v2726_v63, 0.0  ;;  %v2721_v7 = vadd.f32 %v4737_v56, %v2663_v53  ;;  %v2622_v34 = vrot.slane %v2597_v47, 1 }
 0x182   : > { %v2722_v29 = vadd.f32 %v4737_v56, %v2664_v26  ;;  %v2729_v22 = vadd.f32 %v4737_v56, %v2671_v5  ;;  %v2730_v40 = vadd.f32 %v4737_v56, %v2672_v37  ;;  %v2634_v27 = vsel %vm1030_vm0, %v2614_v23, %v2615_v58 }
 0x183   : > { %v3359_v31 = vpack.c.bf16 %v2734_v45, %v2733_v35  ;;  %v3379_v60 = vpack.c.bf16 %v2742_v1, %v2741_v48  ;;  %v2737_v14 = vmax.f32 %v2721_v7, 0.0  ;;  %v2635_v3 = vsel %vm1030_vm0, %v2613_v46, %v2614_v23 }
 0x184   : > { %v2738_v44 = vmax.f32 %v2722_v29, 0.0  ;;  %v2745_v55 = vmax.f32 %v2729_v22, 0.0  ;;  %v2746_v19 = vmax.f32 %v2730_v40, 0.0  ;;  %v2661_v59 = vadd.f32 %v2635_v3, %v4709_v16 }
 0x185   : > { %v2428_v62 = vadd.f32 %v4692_v32, %v4729_v43  ;;  %3391 = vst [vmem:[%s4769_s7 + $0x8] sm:$0xff] %v3359_v31   ;;  %3395 = vst [vmem:[%s4769_s7 + $0x28] sm:$0xff] %v3379_v60   ;;  %v2662_v58 = vadd.f32 %v2634_v27, %v4717_v6  ;;  %v2626_v20 = vsel %vm1030_vm0, %v2622_v34, %v2623_v39 }
 0x186   : > { %v2627_v35 = vsel %vm1030_vm0, %v2621_v30, %v2622_v34  ;;  %v3369_v25 = vpack.c.bf16 %v2738_v44, %v2737_v14  ;;  %v3389_v50 = vpack.c.bf16 %v2746_v19, %v2745_v55  ;;  %v2719_v16 = vadd.f32 %v4737_v56, %v2661_v59 }
 0x187   : > { %v2669_v32 = vadd.f32 %v2627_v35, %v4725_v61  ;;  %v2720_v43 = vadd.f32 %v4737_v56, %v2662_v58  ;;  %v2670_v0 = vadd.f32 %v2626_v20, %v2428_v62 }
 0x188   : > { %3393 = vst [vmem:[%s4769_s7 + $0x18] sm:$0xff] %v3369_v25   ;;  %3397 = vst [vmem:[%s4769_s7 + $0x38] sm:$0xff] %v3389_v50   ;;  %v2735_v6 = vmax.f32 %v2719_v16, 0.0 }
 0x189   : > { %v2727_v13 = vadd.f32 %v4737_v56, %v2669_v32  ;;  %v2736_v39 = vmax.f32 %v2720_v43, 0.0  ;;  %v2728_v42 = vadd.f32 %v4737_v56, %v2670_v0 }
 0x18b   : > { %v2743_v57 = vmax.f32 %v2727_v13, 0.0  ;;  %v3364_v48 = vpack.c.bf16 %v2736_v39, %v2735_v6  ;;  %v2744_v12 = vmax.f32 %v2728_v42, 0.0 }
 0x18d   : > { %3392 = vst [vmem:[%s4769_s7 + $0x10] sm:$0xff] %v3364_v48   ;;  %v3384_v46 = vpack.c.bf16 %v2744_v12, %v2743_v57 }
 0x18f   : > { %3396 = vst [vmem:[%s4769_s7 + $0x30] sm:$0xff] %v3384_v46  }
 0x190 PF: > { %s13_s14 = sadd.s32 1, %s4013_s14   ;;  %s4856_s12 = smov %s4009_s13 }
 0x191   : > { %p10_p5 = scmp.ge.s32.totalorder %s13_s14, 4   ;;  %s4857_s13 = smov %s4859_s15 }
 0x193   :  { %12 = sbr.rel (!%p10_p5) target bundleno = 2 (0x2), region = 90 }

</bundles_post_ra>
